<compile_context>
chip_gen: v5e
topology: v5e:2x2
jax: 0.10.0
libtpu: 0.0.40
codegen_flags: <defaults>
</compile_context>

<pallas_src>
import jax
import jax.numpy as jnp
import numpy as np
from jax import lax
from jax.experimental import pallas as pl
from jax.experimental.pallas import tpu as pltpu

_NEG_SLOPE = 0.2
_CONST_KEYS = ("pool", "s1", "w1", "b1", "s2", "w2", "b2", "s3", "w3", "b3", "w4", "b4")


# ----------------------------- fused Pallas kernel ------------------------------

def _fused_fcd_kernel(x_ref, pool_ref,
                      s1_ref, w1_ref, b1_ref,
                      s2_ref, w2_ref, b2_ref,
                      s3_ref, w3_ref, b3_ref,
                      w4_ref, b4_ref,
                      o_ref):
    cdt = x_ref.dtype                       # MXU operand dtype (bf16 or f32)
    x = x_ref[0]                            # (H*W, Cin)

    # F.interpolate(scale_factor=0.5, mode='area') == 2x2 mean: one matmul with the 0.25 pooling matrix.
    h = jnp.dot(pool_ref[...], x, preferred_element_type=jnp.float32).astype(cdt)

    def conv4x4_lrelu(h_in, s_ref, w_ref, b_ref):
        # h_in: (M_in, C_in) cdt;  s_ref: (16, M_out, M_in);  w_ref: (16, C_in, C_out);  b_ref: (1, C_out)
        n_taps, m_out, _ = s_ref.shape
        c_out = w_ref.shape[2]
        acc = jnp.zeros((m_out, c_out), jnp.float32)
        for t in range(n_taps):             # unrolled: 16 taps of the 4x4 / stride-2 / pad-1 conv
            # exact 0/1 gather of input rows (zero rows reproduce the zero padding)
            g = jnp.dot(s_ref[t], h_in, preferred_element_type=jnp.float32).astype(h_in.dtype)
            acc = acc + jnp.dot(g, w_ref[t], preferred_element_type=jnp.float32)
        acc = acc + b_ref[...]                               # (1, C_out) broadcasts over rows, f32
        return jnp.where(acc >= 0, acc, _NEG_SLOPE * acc)    # LeakyReLU(0.2) in f32

    h1 = conv4x4_lrelu(h, s1_ref, w1_ref, b1_ref)                # (M1, ndf)    f32
    h2 = conv4x4_lrelu(h1.astype(cdt), s2_ref, w2_ref, b2_ref)   # (M2, 2*ndf)  f32
    h3 = conv4x4_lrelu(h2.astype(cdt), s3_ref, w3_ref, b3_ref)   # (M3, 4*ndf)  f32

    # 1x1 classifier: elementwise multiply + lane reduction (VPU/XLU), all f32.
    out = jnp.sum(h3 * w4_ref[...], axis=-1, keepdims=True) + b4_ref[...]   # (M3, 1)
    o_ref[0] = out.astype(o_ref.dtype)


# ----------------------------- forward wrapper -----------------------------------

def fc_discriminator_forward(x_nchw, consts):
    """x_nchw: (N, C, H, W), H and W divisible by 16. Returns (N, 1, H//16, W//16)."""
    N, C, H, W = x_nchw.shape
    assert H % 16 == 0 and W % 16 == 0, "fused path assumes H, W divisible by 16 (even at every stage)"
    cdt = consts["pool"].dtype
    M3 = consts["s3"].shape[1]

    # NCHW -> (N, H*W, C) rows, cast MXU operands to the compute dtype.
    x_flat = jnp.transpose(x_nchw, (0, 2, 3, 1)).reshape(N, H * W, C).astype(cdt)

    def const_spec(a):
        nd = a.ndim
        return pl.BlockSpec(a.shape, lambda i, _nd=nd: (0,) * _nd)

    out = pl.pallas_call(
        _fused_fcd_kernel,
        out_shape=jax.ShapeDtypeStruct((N, M3, 1), jnp.float32),
        grid=(N,),
        in_specs=[pl.BlockSpec((1, H * W, C), lambda i: (i, 0, 0))]
        + [const_spec(consts[k]) for k in _CONST_KEYS],
        out_specs=pl.BlockSpec((1, M3, 1), lambda i: (i, 0, 0)),
        compiler_params=pltpu.CompilerParams(
            dimension_semantics=("parallel",)),   # batch axis -> megacore sharding on v7x
    )(x_flat, *(consts[k] for k in _CONST_KEYS))

    Ho, Wo = H // 16, W // 16
    return jnp.transpose(out.reshape(N, Ho, Wo, 1), (0, 3, 1, 2))   # NCHW


# ----------------------------- one-time constant prep ----------------------------

def _pool_matrix(H, W):
    """(Hp*Wp, H*W) matrix: 2x2 average pool ('area' interpolation, scale 0.5, even H/W)."""
    Hp, Wp = H // 2, W // 2
    P = np.zeros((Hp * Wp, H * W), np.float32)
    for i in range(Hp):
        for j in range(Wp):
            for di in range(2):
                for dj in range(2):
                    P[i * Wp + j, (2 * i + di) * W + (2 * j + dj)] = 0.25
    return P


def _tap_select_matrices(Hi, Wi):
    """(16, Ho*Wo, Hi*Wi) 0/1 matrices: tap (kh,kw) of a 4x4, stride-2, pad-1 conv.

    Out-of-bounds taps (the zero padding) are simply all-zero rows.
    """
    Ho, Wo = Hi // 2, Wi // 2
    S = np.zeros((16, Ho * Wo, Hi * Wi), np.float32)
    for kh in range(4):
        for kw in range(4):
            t = kh * 4 + kw
            for i in range(Ho):
                r = 2 * i + kh - 1
                if not (0 <= r < Hi):
                    continue
                for j in range(Wo):
                    c = 2 * j + kw - 1
                    if 0 <= c < Wi:
                        S[t, i * Wo + j, r * Wi + c] = 1.0
    return S


def prepare_constants(params, H, W, compute_dtype=jnp.bfloat16):
    """One-time weight re-layout + pooling / tap-selection matrices (hoisted out of the forward)."""
    Hp, Wp = H // 2, W // 2        # after area pool
    H1, W1 = Hp // 2, Wp // 2      # after conv1
    H2, W2 = H1 // 2, W1 // 2      # after conv2

    def wstack(w):                 # (Cout, Cin, 4, 4) -> (16, Cin, Cout), tap-major (kh*4+kw)
        cout, cin = w.shape[0], w.shape[1]
        return jnp.transpose(w, (2, 3, 1, 0)).reshape(16, cin, cout).astype(compute_dtype)

    def brow(b):
        return jnp.asarray(b, jnp.float32).reshape(1, -1)

    return {
        "pool": jnp.asarray(_pool_matrix(H, W), compute_dtype),
        "s1": jnp.asarray(_tap_select_matrices(Hp, Wp), compute_dtype),
        "s2": jnp.asarray(_tap_select_matrices(H1, W1), compute_dtype),
        "s3": jnp.asarray(_tap_select_matrices(H2, W2), compute_dtype),
        "w1": wstack(params["w1"]), "b1": brow(params["b1"]),
        "w2": wstack(params["w2"]), "b2": brow(params["b2"]),
        "w3": wstack(params["w3"]), "b3": brow(params["b3"]),
        "w4": jnp.asarray(params["w4"], jnp.float32).reshape(1, -1),   # (1, 4*ndf), f32 (VPU path)
        "b4": jnp.asarray(params["b4"], jnp.float32).reshape(1, 1),
    }


# ----------------------------- parameter init ------------------------------------

def init_params(key, in_channels, ndf=16):
    ks = jax.random.split(key, 8)

    def w(k, cout, cin, kh, kw):
        return 0.05 * jax.random.normal(k, (cout, cin, kh, kw), jnp.float32)

    def bias(k, cout):
        return 0.05 * jax.random.normal(k, (cout,), jnp.float32)

    return {
        "w1": w(ks[0], ndf, in_channels, 4, 4), "b1": bias(ks[1], ndf),
        "w2": w(ks[2], ndf * 2, ndf, 4, 4),     "b2": bias(ks[3], ndf * 2),
        "w3": w(ks[4], ndf * 4, ndf * 2, 4, 4), "b3": bias(ks[5], ndf * 4),
        "w4": w(ks[6], 1, ndf * 4, 1, 1),       "b4": bias(ks[7], 1),
    }


# ----------------------------- pure-JAX reference --------------------------------

def _reference(x_nchw, p):
    def conv(x, w, b, stride, pad):
        y = lax.conv_general_dilated(
            x, w, (stride, stride), [(pad, pad), (pad, pad)],
            dimension_numbers=("NCHW", "OIHW", "NCHW"))
        return y + b.reshape(1, -1, 1, 1)

    def lrelu(x):
        return jnp.where(x >= 0, x, 0.2 * x)

    N, C, H, W = x_nchw.shape
    x = x_nchw.reshape(N, C, H // 2, 2, W // 2, 2).mean(axis=(3, 5))   # area 0.5x (even H, W)
    x = lrelu(conv(x, p["w1"], p["b1"], 2, 1))
    x = lrelu(conv(x, p["w2"], p["b2"], 2, 1))
    x = lrelu(conv(x, p["w3"], p["b3"], 2, 1))
    return conv(x, p["w4"], p["b4"], 1, 0)


# ----------------------------- main -----------------------------------------------

if __name__ == "__main__":
    key = jax.random.PRNGKey(0)
    k_x, k_p = jax.random.split(key)

    N, Cin, H, W = 2, 4, 16, 16
    x = jax.random.normal(k_x, (N, Cin, H, W), jnp.float32)
    params = init_params(k_p, Cin, ndf=16)

    ref = jax.block_until_ready(_reference(x, params))

    # Strict structural check: f32 MXU operands must match the XLA conv reference tightly.
    consts_f32 = prepare_constants(params, H, W, compute_dtype=jnp.float32)
    out_f32 = jax.block_until_ready(jax.jit(fc_discriminator_forward)(x, consts_f32))
    assert out_f32.shape == ref.shape == (N, 1, H // 16, W // 16), (out_f32.shape, ref.shape)
    assert jnp.allclose(out_f32, ref, atol=1e-4, rtol=1e-4), float(jnp.max(jnp.abs(out_f32 - ref)))

    # Fast path (v6e/v7x): bf16 MXU operands, f32 accumulation -> bf16-level tolerance vs f32 reference.
    consts_bf16 = prepare_constants(params, H, W, compute_dtype=jnp.bfloat16)
    out_bf16 = jax.block_until_ready(jax.jit(fc_discriminator_forward)(x, consts_bf16))
    assert out_bf16.shape == ref.shape
    assert jnp.allclose(out_bf16, ref, atol=2e-2, rtol=2e-2), float(jnp.max(jnp.abs(out_bf16 - ref)))

    print("KERNEL_OK")
</pallas_src>

<mosaic_0001>
module attributes {stable_mosaic.version = 11 : i64} {
  func.func @_fused_fcd_kernel(%arg0: i32, %arg1: memref<1x256x4xf32, #tpu.memory_space<vmem>>, %arg2: memref<64x256xf32, #tpu.memory_space<vmem>>, %arg3: memref<16x16x64xf32, #tpu.memory_space<vmem>>, %arg4: memref<16x4x16xf32, #tpu.memory_space<vmem>>, %arg5: memref<1x16xf32, #tpu.memory_space<vmem>>, %arg6: memref<16x4x16xf32, #tpu.memory_space<vmem>>, %arg7: memref<16x16x32xf32, #tpu.memory_space<vmem>>, %arg8: memref<1x32xf32, #tpu.memory_space<vmem>>, %arg9: memref<16x1x4xf32, #tpu.memory_space<vmem>>, %arg10: memref<16x32x64xf32, #tpu.memory_space<vmem>>, %arg11: memref<1x64xf32, #tpu.memory_space<vmem>>, %arg12: memref<1x64xf32, #tpu.memory_space<vmem>>, %arg13: memref<1x1xf32, #tpu.memory_space<vmem>>, %arg14: memref<1x1x1xf32, #tpu.memory_space<vmem>>) attributes {dimension_semantics = [#tpu.dimension_semantics<parallel>], iteration_bounds = array<i64: 2>, scalar_prefetch = 0 : i64, scratch_operands = 0 : i64, tpu.core_type = #tpu.core_type<tc>, window_params = [{transform_indices = @transform_0, window_bounds = array<i64: 1, 256, 4>}, {pipeline_mode = #tpu.pipeline_mode<synchronous>, transform_indices = @transform_1, window_bounds = array<i64: 64, 256>}, {pipeline_mode = #tpu.pipeline_mode<synchronous>, transform_indices = @transform_2, window_bounds = array<i64: 16, 16, 64>}, {pipeline_mode = #tpu.pipeline_mode<synchronous>, transform_indices = @transform_3, window_bounds = array<i64: 16, 4, 16>}, {pipeline_mode = #tpu.pipeline_mode<synchronous>, transform_indices = @transform_4, window_bounds = array<i64: 1, 16>}, {pipeline_mode = #tpu.pipeline_mode<synchronous>, transform_indices = @transform_5, window_bounds = array<i64: 16, 4, 16>}, {pipeline_mode = #tpu.pipeline_mode<synchronous>, transform_indices = @transform_6, window_bounds = array<i64: 16, 16, 32>}, {pipeline_mode = #tpu.pipeline_mode<synchronous>, transform_indices = @transform_7, window_bounds = array<i64: 1, 32>}, {pipeline_mode = #tpu.pipeline_mode<synchronous>, transform_indices = @transform_8, window_bounds = array<i64: 16, 1, 4>}, {pipeline_mode = #tpu.pipeline_mode<synchronous>, transform_indices = @transform_9, window_bounds = array<i64: 16, 32, 64>}, {pipeline_mode = #tpu.pipeline_mode<synchronous>, transform_indices = @transform_10, window_bounds = array<i64: 1, 64>}, {pipeline_mode = #tpu.pipeline_mode<synchronous>, transform_indices = @transform_11, window_bounds = array<i64: 1, 64>}, {pipeline_mode = #tpu.pipeline_mode<synchronous>, transform_indices = @transform_12, window_bounds = array<i64: 1, 1>}, {transform_indices = @transform_13, window_bounds = array<i64: 1, 1, 1>}]} {
    %c0 = arith.constant 0 : index
    %c0_0 = arith.constant 0 : index
    %c0_1 = arith.constant 0 : index
    %0 = vector.load %arg1[%c0, %c0_0, %c0_1] : memref<1x256x4xf32, #tpu.memory_space<vmem>>, vector<1x256x4xf32>
    %1 = vector.shape_cast %0 : vector<1x256x4xf32> to vector<256x4xf32>
    %c0_2 = arith.constant 0 : index
    %c0_3 = arith.constant 0 : index
    %2 = vector.load %arg2[%c0_2, %c0_3] : memref<64x256xf32, #tpu.memory_space<vmem>>, vector<64x256xf32>
    %cst = arith.constant dense<0.000000e+00> : vector<64x4xf32>
    %3 = tpu.matmul %2, %1, %cst {dimension_numbers = #tpu.dot_dimension_numbers<[1], [0], [0], [1], [0, 0, 1, 1], [], []>} : vector<64x256xf32>, vector<256x4xf32>, vector<64x4xf32> -> vector<64x4xf32>
    %cst_4 = arith.constant 0.000000e+00 : f32
    %4 = vector.broadcast %cst_4 : f32 to vector<16x16xf32>
    %c0_5 = arith.constant 0 : index
    %c0_6 = arith.constant 0 : index
    %c0_7 = arith.constant 0 : index
    %5 = vector.load %arg3[%c0_5, %c0_6, %c0_7] : memref<16x16x64xf32, #tpu.memory_space<vmem>>, vector<1x16x64xf32>
    %6 = vector.shape_cast %5 : vector<1x16x64xf32> to vector<16x64xf32>
    %cst_8 = arith.constant dense<0.000000e+00> : vector<16x4xf32>
    %7 = tpu.matmul %6, %3, %cst_8 {dimension_numbers = #tpu.dot_dimension_numbers<[1], [0], [0], [1], [0, 0, 1, 1], [], []>} : vector<16x64xf32>, vector<64x4xf32>, vector<16x4xf32> -> vector<16x4xf32>
    %c0_9 = arith.constant 0 : index
    %c0_10 = arith.constant 0 : index
    %c0_11 = arith.constant 0 : index
    %8 = vector.load %arg4[%c0_9, %c0_10, %c0_11] : memref<16x4x16xf32, #tpu.memory_space<vmem>>, vector<1x4x16xf32>
    %9 = vector.shape_cast %8 : vector<1x4x16xf32> to vector<4x16xf32>
    %cst_12 = arith.constant dense<0.000000e+00> : vector<16x16xf32>
    %10 = tpu.matmul %7, %9, %cst_12 {dimension_numbers = #tpu.dot_dimension_numbers<[1], [0], [0], [1], [0, 0, 1, 1], [], []>} : vector<16x4xf32>, vector<4x16xf32>, vector<16x16xf32> -> vector<16x16xf32>
    %11 = arith.addf %4, %10 : vector<16x16xf32>
    %c1 = arith.constant 1 : index
    %c0_13 = arith.constant 0 : index
    %c0_14 = arith.constant 0 : index
    %12 = vector.load %arg3[%c1, %c0_13, %c0_14] : memref<16x16x64xf32, #tpu.memory_space<vmem>>, vector<1x16x64xf32>
    %13 = vector.shape_cast %12 : vector<1x16x64xf32> to vector<16x64xf32>
    %cst_15 = arith.constant dense<0.000000e+00> : vector<16x4xf32>
    %14 = tpu.matmul %13, %3, %cst_15 {dimension_numbers = #tpu.dot_dimension_numbers<[1], [0], [0], [1], [0, 0, 1, 1], [], []>} : vector<16x64xf32>, vector<64x4xf32>, vector<16x4xf32> -> vector<16x4xf32>
    %c1_16 = arith.constant 1 : index
    %c0_17 = arith.constant 0 : index
    %c0_18 = arith.constant 0 : index
    %15 = vector.load %arg4[%c1_16, %c0_17, %c0_18] : memref<16x4x16xf32, #tpu.memory_space<vmem>>, vector<1x4x16xf32>
    %16 = vector.shape_cast %15 : vector<1x4x16xf32> to vector<4x16xf32>
    %cst_19 = arith.constant dense<0.000000e+00> : vector<16x16xf32>
    %17 = tpu.matmul %14, %16, %cst_19 {dimension_numbers = #tpu.dot_dimension_numbers<[1], [0], [0], [1], [0, 0, 1, 1], [], []>} : vector<16x4xf32>, vector<4x16xf32>, vector<16x16xf32> -> vector<16x16xf32>
    %18 = arith.addf %11, %17 : vector<16x16xf32>
    %c2 = arith.constant 2 : index
    %c0_20 = arith.constant 0 : index
    %c0_21 = arith.constant 0 : index
    %19 = vector.load %arg3[%c2, %c0_20, %c0_21] : memref<16x16x64xf32, #tpu.memory_space<vmem>>, vector<1x16x64xf32>
    %20 = vector.shape_cast %19 : vector<1x16x64xf32> to vector<16x64xf32>
    %cst_22 = arith.constant dense<0.000000e+00> : vector<16x4xf32>
    %21 = tpu.matmul %20, %3, %cst_22 {dimension_numbers = #tpu.dot_dimension_numbers<[1], [0], [0], [1], [0, 0, 1, 1], [], []>} : vector<16x64xf32>, vector<64x4xf32>, vector<16x4xf32> -> vector<16x4xf32>
    %c2_23 = arith.constant 2 : index
    %c0_24 = arith.constant 0 : index
    %c0_25 = arith.constant 0 : index
    %22 = vector.load %arg4[%c2_23, %c0_24, %c0_25] : memref<16x4x16xf32, #tpu.memory_space<vmem>>, vector<1x4x16xf32>
    %23 = vector.shape_cast %22 : vector<1x4x16xf32> to vector<4x16xf32>
    %cst_26 = arith.constant dense<0.000000e+00> : vector<16x16xf32>
    %24 = tpu.matmul %21, %23, %cst_26 {dimension_numbers = #tpu.dot_dimension_numbers<[1], [0], [0], [1], [0, 0, 1, 1], [], []>} : vector<16x4xf32>, vector<4x16xf32>, vector<16x16xf32> -> vector<16x16xf32>
    %25 = arith.addf %18, %24 : vector<16x16xf32>
    %c3 = arith.constant 3 : index
    %c0_27 = arith.constant 0 : index
    %c0_28 = arith.constant 0 : index
    %26 = vector.load %arg3[%c3, %c0_27, %c0_28] : memref<16x16x64xf32, #tpu.memory_space<vmem>>, vector<1x16x64xf32>
    %27 = vector.shape_cast %26 : vector<1x16x64xf32> to vector<16x64xf32>
    %cst_29 = arith.constant dense<0.000000e+00> : vector<16x4xf32>
    %28 = tpu.matmul %27, %3, %cst_29 {dimension_numbers = #tpu.dot_dimension_numbers<[1], [0], [0], [1], [0, 0, 1, 1], [], []>} : vector<16x64xf32>, vector<64x4xf32>, vector<16x4xf32> -> vector<16x4xf32>
    %c3_30 = arith.constant 3 : index
    %c0_31 = arith.constant 0 : index
    %c0_32 = arith.constant 0 : index
    %29 = vector.load %arg4[%c3_30, %c0_31, %c0_32] : memref<16x4x16xf32, #tpu.memory_space<vmem>>, vector<1x4x16xf32>
    %30 = vector.shape_cast %29 : vector<1x4x16xf32> to vector<4x16xf32>
    %cst_33 = arith.constant dense<0.000000e+00> : vector<16x16xf32>
    %31 = tpu.matmul %28, %30, %cst_33 {dimension_numbers = #tpu.dot_dimension_numbers<[1], [0], [0], [1], [0, 0, 1, 1], [], []>} : vector<16x4xf32>, vector<4x16xf32>, vector<16x16xf32> -> vector<16x16xf32>
    %32 = arith.addf %25, %31 : vector<16x16xf32>
    %c4 = arith.constant 4 : index
    %c0_34 = arith.constant 0 : index
    %c0_35 = arith.constant 0 : index
    %33 = vector.load %arg3[%c4, %c0_34, %c0_35] : memref<16x16x64xf32, #tpu.memory_space<vmem>>, vector<1x16x64xf32>
    %34 = vector.shape_cast %33 : vector<1x16x64xf32> to vector<16x64xf32>
    %cst_36 = arith.constant dense<0.000000e+00> : vector<16x4xf32>
    %35 = tpu.matmul %34, %3, %cst_36 {dimension_numbers = #tpu.dot_dimension_numbers<[1], [0], [0], [1], [0, 0, 1, 1], [], []>} : vector<16x64xf32>, vector<64x4xf32>, vector<16x4xf32> -> vector<16x4xf32>
    %c4_37 = arith.constant 4 : index
    %c0_38 = arith.constant 0 : index
    %c0_39 = arith.constant 0 : index
    %36 = vector.load %arg4[%c4_37, %c0_38, %c0_39] : memref<16x4x16xf32, #tpu.memory_space<vmem>>, vector<1x4x16xf32>
    %37 = vector.shape_cast %36 : vector<1x4x16xf32> to vector<4x16xf32>
    %cst_40 = arith.constant dense<0.000000e+00> : vector<16x16xf32>
    %38 = tpu.matmul %35, %37, %cst_40 {dimension_numbers = #tpu.dot_dimension_numbers<[1], [0], [0], [1], [0, 0, 1, 1], [], []>} : vector<16x4xf32>, vector<4x16xf32>, vector<16x16xf32> -> vector<16x16xf32>
    %39 = arith.addf %32, %38 : vector<16x16xf32>
    %c5 = arith.constant 5 : index
    %c0_41 = arith.constant 0 : index
    %c0_42 = arith.constant 0 : index
    %40 = vector.load %arg3[%c5, %c0_41, %c0_42] : memref<16x16x64xf32, #tpu.memory_space<vmem>>, vector<1x16x64xf32>
    %41 = vector.shape_cast %40 : vector<1x16x64xf32> to vector<16x64xf32>
    %cst_43 = arith.constant dense<0.000000e+00> : vector<16x4xf32>
    %42 = tpu.matmul %41, %3, %cst_43 {dimension_numbers = #tpu.dot_dimension_numbers<[1], [0], [0], [1], [0, 0, 1, 1], [], []>} : vector<16x64xf32>, vector<64x4xf32>, vector<16x4xf32> -> vector<16x4xf32>
    %c5_44 = arith.constant 5 : index
    %c0_45 = arith.constant 0 : index
    %c0_46 = arith.constant 0 : index
    %43 = vector.load %arg4[%c5_44, %c0_45, %c0_46] : memref<16x4x16xf32, #tpu.memory_space<vmem>>, vector<1x4x16xf32>
    %44 = vector.shape_cast %43 : vector<1x4x16xf32> to vector<4x16xf32>
    %cst_47 = arith.constant dense<0.000000e+00> : vector<16x16xf32>
    %45 = tpu.matmul %42, %44, %cst_47 {dimension_numbers = #tpu.dot_dimension_numbers<[1], [0], [0], [1], [0, 0, 1, 1], [], []>} : vector<16x4xf32>, vector<4x16xf32>, vector<16x16xf32> -> vector<16x16xf32>
    %46 = arith.addf %39, %45 : vector<16x16xf32>
    %c6 = arith.constant 6 : index
    %c0_48 = arith.constant 0 : index
    %c0_49 = arith.constant 0 : index
    %47 = vector.load %arg3[%c6, %c0_48, %c0_49] : memref<16x16x64xf32, #tpu.memory_space<vmem>>, vector<1x16x64xf32>
    %48 = vector.shape_cast %47 : vector<1x16x64xf32> to vector<16x64xf32>
    %cst_50 = arith.constant dense<0.000000e+00> : vector<16x4xf32>
    %49 = tpu.matmul %48, %3, %cst_50 {dimension_numbers = #tpu.dot_dimension_numbers<[1], [0], [0], [1], [0, 0, 1, 1], [], []>} : vector<16x64xf32>, vector<64x4xf32>, vector<16x4xf32> -> vector<16x4xf32>
    %c6_51 = arith.constant 6 : index
    %c0_52 = arith.constant 0 : index
    %c0_53 = arith.constant 0 : index
    %50 = vector.load %arg4[%c6_51, %c0_52, %c0_53] : memref<16x4x16xf32, #tpu.memory_space<vmem>>, vector<1x4x16xf32>
    %51 = vector.shape_cast %50 : vector<1x4x16xf32> to vector<4x16xf32>
    %cst_54 = arith.constant dense<0.000000e+00> : vector<16x16xf32>
    %52 = tpu.matmul %49, %51, %cst_54 {dimension_numbers = #tpu.dot_dimension_numbers<[1], [0], [0], [1], [0, 0, 1, 1], [], []>} : vector<16x4xf32>, vector<4x16xf32>, vector<16x16xf32> -> vector<16x16xf32>
    %53 = arith.addf %46, %52 : vector<16x16xf32>
    %c7 = arith.constant 7 : index
    %c0_55 = arith.constant 0 : index
    %c0_56 = arith.constant 0 : index
    %54 = vector.load %arg3[%c7, %c0_55, %c0_56] : memref<16x16x64xf32, #tpu.memory_space<vmem>>, vector<1x16x64xf32>
    %55 = vector.shape_cast %54 : vector<1x16x64xf32> to vector<16x64xf32>
    %cst_57 = arith.constant dense<0.000000e+00> : vector<16x4xf32>
    %56 = tpu.matmul %55, %3, %cst_57 {dimension_numbers = #tpu.dot_dimension_numbers<[1], [0], [0], [1], [0, 0, 1, 1], [], []>} : vector<16x64xf32>, vector<64x4xf32>, vector<16x4xf32> -> vector<16x4xf32>
    %c7_58 = arith.constant 7 : index
    %c0_59 = arith.constant 0 : index
    %c0_60 = arith.constant 0 : index
    %57 = vector.load %arg4[%c7_58, %c0_59, %c0_60] : memref<16x4x16xf32, #tpu.memory_space<vmem>>, vector<1x4x16xf32>
    %58 = vector.shape_cast %57 : vector<1x4x16xf32> to vector<4x16xf32>
    %cst_61 = arith.constant dense<0.000000e+00> : vector<16x16xf32>
    %59 = tpu.matmul %56, %58, %cst_61 {dimension_numbers = #tpu.dot_dimension_numbers<[1], [0], [0], [1], [0, 0, 1, 1], [], []>} : vector<16x4xf32>, vector<4x16xf32>, vector<16x16xf32> -> vector<16x16xf32>
    %60 = arith.addf %53, %59 : vector<16x16xf32>
    %c8 = arith.constant 8 : index
    %c0_62 = arith.constant 0 : index
    %c0_63 = arith.constant 0 : index
    %61 = vector.load %arg3[%c8, %c0_62, %c0_63] : memref<16x16x64xf32, #tpu.memory_space<vmem>>, vector<1x16x64xf32>
    %62 = vector.shape_cast %61 : vector<1x16x64xf32> to vector<16x64xf32>
    %cst_64 = arith.constant dense<0.000000e+00> : vector<16x4xf32>
    %63 = tpu.matmul %62, %3, %cst_64 {dimension_numbers = #tpu.dot_dimension_numbers<[1], [0], [0], [1], [0, 0, 1, 1], [], []>} : vector<16x64xf32>, vector<64x4xf32>, vector<16x4xf32> -> vector<16x4xf32>
    %c8_65 = arith.constant 8 : index
    %c0_66 = arith.constant 0 : index
    %c0_67 = arith.constant 0 : index
    %64 = vector.load %arg4[%c8_65, %c0_66, %c0_67] : memref<16x4x16xf32, #tpu.memory_space<vmem>>, vector<1x4x16xf32>
    %65 = vector.shape_cast %64 : vector<1x4x16xf32> to vector<4x16xf32>
    %cst_68 = arith.constant dense<0.000000e+00> : vector<16x16xf32>
    %66 = tpu.matmul %63, %65, %cst_68 {dimension_numbers = #tpu.dot_dimension_numbers<[1], [0], [0], [1], [0, 0, 1, 1], [], []>} : vector<16x4xf32>, vector<4x16xf32>, vector<16x16xf32> -> vector<16x16xf32>
    %67 = arith.addf %60, %66 : vector<16x16xf32>
    %c9 = arith.constant 9 : index
    %c0_69 = arith.constant 0 : index
    %c0_70 = arith.constant 0 : index
    %68 = vector.load %arg3[%c9, %c0_69, %c0_70] : memref<16x16x64xf32, #tpu.memory_space<vmem>>, vector<1x16x64xf32>
    %69 = vector.shape_cast %68 : vector<1x16x64xf32> to vector<16x64xf32>
    %cst_71 = arith.constant dense<0.000000e+00> : vector<16x4xf32>
    %70 = tpu.matmul %69, %3, %cst_71 {dimension_numbers = #tpu.dot_dimension_numbers<[1], [0], [0], [1], [0, 0, 1, 1], [], []>} : vector<16x64xf32>, vector<64x4xf32>, vector<16x4xf32> -> vector<16x4xf32>
    %c9_72 = arith.constant 9 : index
    %c0_73 = arith.constant 0 : index
    %c0_74 = arith.constant 0 : index
    %71 = vector.load %arg4[%c9_72, %c0_73, %c0_74] : memref<16x4x16xf32, #tpu.memory_space<vmem>>, vector<1x4x16xf32>
    %72 = vector.shape_cast %71 : vector<1x4x16xf32> to vector<4x16xf32>
    %cst_75 = arith.constant dense<0.000000e+00> : vector<16x16xf32>
    %73 = tpu.matmul %70, %72, %cst_75 {dimension_numbers = #tpu.dot_dimension_numbers<[1], [0], [0], [1], [0, 0, 1, 1], [], []>} : vector<16x4xf32>, vector<4x16xf32>, vector<16x16xf32> -> vector<16x16xf32>
    %74 = arith.addf %67, %73 : vector<16x16xf32>
    %c10 = arith.constant 10 : index
    %c0_76 = arith.constant 0 : index
    %c0_77 = arith.constant 0 : index
    %75 = vector.load %arg3[%c10, %c0_76, %c0_77] : memref<16x16x64xf32, #tpu.memory_space<vmem>>, vector<1x16x64xf32>
    %76 = vector.shape_cast %75 : vector<1x16x64xf32> to vector<16x64xf32>
    %cst_78 = arith.constant dense<0.000000e+00> : vector<16x4xf32>
    %77 = tpu.matmul %76, %3, %cst_78 {dimension_numbers = #tpu.dot_dimension_numbers<[1], [0], [0], [1], [0, 0, 1, 1], [], []>} : vector<16x64xf32>, vector<64x4xf32>, vector<16x4xf32> -> vector<16x4xf32>
    %c10_79 = arith.constant 10 : index
    %c0_80 = arith.constant 0 : index
    %c0_81 = arith.constant 0 : index
    %78 = vector.load %arg4[%c10_79, %c0_80, %c0_81] : memref<16x4x16xf32, #tpu.memory_space<vmem>>, vector<1x4x16xf32>
    %79 = vector.shape_cast %78 : vector<1x4x16xf32> to vector<4x16xf32>
    %cst_82 = arith.constant dense<0.000000e+00> : vector<16x16xf32>
    %80 = tpu.matmul %77, %79, %cst_82 {dimension_numbers = #tpu.dot_dimension_numbers<[1], [0], [0], [1], [0, 0, 1, 1], [], []>} : vector<16x4xf32>, vector<4x16xf32>, vector<16x16xf32> -> vector<16x16xf32>
    %81 = arith.addf %74, %80 : vector<16x16xf32>
    %c11 = arith.constant 11 : index
    %c0_83 = arith.constant 0 : index
    %c0_84 = arith.constant 0 : index
    %82 = vector.load %arg3[%c11, %c0_83, %c0_84] : memref<16x16x64xf32, #tpu.memory_space<vmem>>, vector<1x16x64xf32>
    %83 = vector.shape_cast %82 : vector<1x16x64xf32> to vector<16x64xf32>
    %cst_85 = arith.constant dense<0.000000e+00> : vector<16x4xf32>
    %84 = tpu.matmul %83, %3, %cst_85 {dimension_numbers = #tpu.dot_dimension_numbers<[1], [0], [0], [1], [0, 0, 1, 1], [], []>} : vector<16x64xf32>, vector<64x4xf32>, vector<16x4xf32> -> vector<16x4xf32>
    %c11_86 = arith.constant 11 : index
    %c0_87 = arith.constant 0 : index
    %c0_88 = arith.constant 0 : index
    %85 = vector.load %arg4[%c11_86, %c0_87, %c0_88] : memref<16x4x16xf32, #tpu.memory_space<vmem>>, vector<1x4x16xf32>
    %86 = vector.shape_cast %85 : vector<1x4x16xf32> to vector<4x16xf32>
    %cst_89 = arith.constant dense<0.000000e+00> : vector<16x16xf32>
    %87 = tpu.matmul %84, %86, %cst_89 {dimension_numbers = #tpu.dot_dimension_numbers<[1], [0], [0], [1], [0, 0, 1, 1], [], []>} : vector<16x4xf32>, vector<4x16xf32>, vector<16x16xf32> -> vector<16x16xf32>
    %88 = arith.addf %81, %87 : vector<16x16xf32>
    %c12 = arith.constant 12 : index
    %c0_90 = arith.constant 0 : index
    %c0_91 = arith.constant 0 : index
    %89 = vector.load %arg3[%c12, %c0_90, %c0_91] : memref<16x16x64xf32, #tpu.memory_space<vmem>>, vector<1x16x64xf32>
    %90 = vector.shape_cast %89 : vector<1x16x64xf32> to vector<16x64xf32>
    %cst_92 = arith.constant dense<0.000000e+00> : vector<16x4xf32>
    %91 = tpu.matmul %90, %3, %cst_92 {dimension_numbers = #tpu.dot_dimension_numbers<[1], [0], [0], [1], [0, 0, 1, 1], [], []>} : vector<16x64xf32>, vector<64x4xf32>, vector<16x4xf32> -> vector<16x4xf32>
    %c12_93 = arith.constant 12 : index
    %c0_94 = arith.constant 0 : index
    %c0_95 = arith.constant 0 : index
    %92 = vector.load %arg4[%c12_93, %c0_94, %c0_95] : memref<16x4x16xf32, #tpu.memory_space<vmem>>, vector<1x4x16xf32>
    %93 = vector.shape_cast %92 : vector<1x4x16xf32> to vector<4x16xf32>
    %cst_96 = arith.constant dense<0.000000e+00> : vector<16x16xf32>
    %94 = tpu.matmul %91, %93, %cst_96 {dimension_numbers = #tpu.dot_dimension_numbers<[1], [0], [0], [1], [0, 0, 1, 1], [], []>} : vector<16x4xf32>, vector<4x16xf32>, vector<16x16xf32> -> vector<16x16xf32>
    %95 = arith.addf %88, %94 : vector<16x16xf32>
    %c13 = arith.constant 13 : index
    %c0_97 = arith.constant 0 : index
    %c0_98 = arith.constant 0 : index
    %96 = vector.load %arg3[%c13, %c0_97, %c0_98] : memref<16x16x64xf32, #tpu.memory_space<vmem>>, vector<1x16x64xf32>
    %97 = vector.shape_cast %96 : vector<1x16x64xf32> to vector<16x64xf32>
    %cst_99 = arith.constant dense<0.000000e+00> : vector<16x4xf32>
    %98 = tpu.matmul %97, %3, %cst_99 {dimension_numbers = #tpu.dot_dimension_numbers<[1], [0], [0], [1], [0, 0, 1, 1], [], []>} : vector<16x64xf32>, vector<64x4xf32>, vector<16x4xf32> -> vector<16x4xf32>
    %c13_100 = arith.constant 13 : index
    %c0_101 = arith.constant 0 : index
    %c0_102 = arith.constant 0 : index
    %99 = vector.load %arg4[%c13_100, %c0_101, %c0_102] : memref<16x4x16xf32, #tpu.memory_space<vmem>>, vector<1x4x16xf32>
    %100 = vector.shape_cast %99 : vector<1x4x16xf32> to vector<4x16xf32>
    %cst_103 = arith.constant dense<0.000000e+00> : vector<16x16xf32>
    %101 = tpu.matmul %98, %100, %cst_103 {dimension_numbers = #tpu.dot_dimension_numbers<[1], [0], [0], [1], [0, 0, 1, 1], [], []>} : vector<16x4xf32>, vector<4x16xf32>, vector<16x16xf32> -> vector<16x16xf32>
    %102 = arith.addf %95, %101 : vector<16x16xf32>
    %c14 = arith.constant 14 : index
    %c0_104 = arith.constant 0 : index
    %c0_105 = arith.constant 0 : index
    %103 = vector.load %arg3[%c14, %c0_104, %c0_105] : memref<16x16x64xf32, #tpu.memory_space<vmem>>, vector<1x16x64xf32>
    %104 = vector.shape_cast %103 : vector<1x16x64xf32> to vector<16x64xf32>
    %cst_106 = arith.constant dense<0.000000e+00> : vector<16x4xf32>
    %105 = tpu.matmul %104, %3, %cst_106 {dimension_numbers = #tpu.dot_dimension_numbers<[1], [0], [0], [1], [0, 0, 1, 1], [], []>} : vector<16x64xf32>, vector<64x4xf32>, vector<16x4xf32> -> vector<16x4xf32>
    %c14_107 = arith.constant 14 : index
    %c0_108 = arith.constant 0 : index
    %c0_109 = arith.constant 0 : index
    %106 = vector.load %arg4[%c14_107, %c0_108, %c0_109] : memref<16x4x16xf32, #tpu.memory_space<vmem>>, vector<1x4x16xf32>
    %107 = vector.shape_cast %106 : vector<1x4x16xf32> to vector<4x16xf32>
    %cst_110 = arith.constant dense<0.000000e+00> : vector<16x16xf32>
    %108 = tpu.matmul %105, %107, %cst_110 {dimension_numbers = #tpu.dot_dimension_numbers<[1], [0], [0], [1], [0, 0, 1, 1], [], []>} : vector<16x4xf32>, vector<4x16xf32>, vector<16x16xf32> -> vector<16x16xf32>
    %109 = arith.addf %102, %108 : vector<16x16xf32>
    %c15 = arith.constant 15 : index
    %c0_111 = arith.constant 0 : index
    %c0_112 = arith.constant 0 : index
    %110 = vector.load %arg3[%c15, %c0_111, %c0_112] : memref<16x16x64xf32, #tpu.memory_space<vmem>>, vector<1x16x64xf32>
    %111 = vector.shape_cast %110 : vector<1x16x64xf32> to vector<16x64xf32>
    %cst_113 = arith.constant dense<0.000000e+00> : vector<16x4xf32>
    %112 = tpu.matmul %111, %3, %cst_113 {dimension_numbers = #tpu.dot_dimension_numbers<[1], [0], [0], [1], [0, 0, 1, 1], [], []>} : vector<16x64xf32>, vector<64x4xf32>, vector<16x4xf32> -> vector<16x4xf32>
    %c15_114 = arith.constant 15 : index
    %c0_115 = arith.constant 0 : index
    %c0_116 = arith.constant 0 : index
    %113 = vector.load %arg4[%c15_114, %c0_115, %c0_116] : memref<16x4x16xf32, #tpu.memory_space<vmem>>, vector<1x4x16xf32>
    %114 = vector.shape_cast %113 : vector<1x4x16xf32> to vector<4x16xf32>
    %cst_117 = arith.constant dense<0.000000e+00> : vector<16x16xf32>
    %115 = tpu.matmul %112, %114, %cst_117 {dimension_numbers = #tpu.dot_dimension_numbers<[1], [0], [0], [1], [0, 0, 1, 1], [], []>} : vector<16x4xf32>, vector<4x16xf32>, vector<16x16xf32> -> vector<16x16xf32>
    %116 = arith.addf %109, %115 : vector<16x16xf32>
    %c0_118 = arith.constant 0 : index
    %c0_119 = arith.constant 0 : index
    %117 = vector.load %arg5[%c0_118, %c0_119] : memref<1x16xf32, #tpu.memory_space<vmem>>, vector<1x16xf32>
    %118 = vector.broadcast %117 : vector<1x16xf32> to vector<16x16xf32>
    %119 = arith.addf %116, %118 : vector<16x16xf32>
    %cst_120 = arith.constant 0.000000e+00 : f32
    %120 = vector.broadcast %cst_120 : f32 to vector<16x16xf32>
    %121 = arith.cmpf oge, %119, %120 : vector<16x16xf32>
    %cst_121 = arith.constant 2.000000e-01 : f32
    %122 = vector.broadcast %cst_121 : f32 to vector<16x16xf32>
    %123 = arith.mulf %122, %119 : vector<16x16xf32>
    %124 = arith.select %121, %119, %123 : vector<16x16xi1>, vector<16x16xf32>
    %cst_122 = arith.constant 0.000000e+00 : f32
    %125 = vector.broadcast %cst_122 : f32 to vector<4x32xf32>
    %c0_123 = arith.constant 0 : index
    %c0_124 = arith.constant 0 : index
    %c0_125 = arith.constant 0 : index
    %126 = vector.load %arg6[%c0_123, %c0_124, %c0_125] : memref<16x4x16xf32, #tpu.memory_space<vmem>>, vector<1x4x16xf32>
    %127 = vector.shape_cast %126 : vector<1x4x16xf32> to vector<4x16xf32>
    %cst_126 = arith.constant dense<0.000000e+00> : vector<4x16xf32>
    %128 = tpu.matmul %127, %124, %cst_126 {dimension_numbers = #tpu.dot_dimension_numbers<[1], [0], [0], [1], [0, 0, 1, 1], [], []>} : vector<4x16xf32>, vector<16x16xf32>, vector<4x16xf32> -> vector<4x16xf32>
    %c0_127 = arith.constant 0 : index
    %c0_128 = arith.constant 0 : index
    %c0_129 = arith.constant 0 : index
    %129 = vector.load %arg7[%c0_127, %c0_128, %c0_129] : memref<16x16x32xf32, #tpu.memory_space<vmem>>, vector<1x16x32xf32>
    %130 = vector.shape_cast %129 : vector<1x16x32xf32> to vector<16x32xf32>
    %cst_130 = arith.constant dense<0.000000e+00> : vector<4x32xf32>
    %131 = tpu.matmul %128, %130, %cst_130 {dimension_numbers = #tpu.dot_dimension_numbers<[1], [0], [0], [1], [0, 0, 1, 1], [], []>} : vector<4x16xf32>, vector<16x32xf32>, vector<4x32xf32> -> vector<4x32xf32>
    %132 = arith.addf %125, %131 : vector<4x32xf32>
    %c1_131 = arith.constant 1 : index
    %c0_132 = arith.constant 0 : index
    %c0_133 = arith.constant 0 : index
    %133 = vector.load %arg6[%c1_131, %c0_132, %c0_133] : memref<16x4x16xf32, #tpu.memory_space<vmem>>, vector<1x4x16xf32>
    %134 = vector.shape_cast %133 : vector<1x4x16xf32> to vector<4x16xf32>
    %cst_134 = arith.constant dense<0.000000e+00> : vector<4x16xf32>
    %135 = tpu.matmul %134, %124, %cst_134 {dimension_numbers = #tpu.dot_dimension_numbers<[1], [0], [0], [1], [0, 0, 1, 1], [], []>} : vector<4x16xf32>, vector<16x16xf32>, vector<4x16xf32> -> vector<4x16xf32>
    %c1_135 = arith.constant 1 : index
    %c0_136 = arith.constant 0 : index
    %c0_137 = arith.constant 0 : index
    %136 = vector.load %arg7[%c1_135, %c0_136, %c0_137] : memref<16x16x32xf32, #tpu.memory_space<vmem>>, vector<1x16x32xf32>
    %137 = vector.shape_cast %136 : vector<1x16x32xf32> to vector<16x32xf32>
    %cst_138 = arith.constant dense<0.000000e+00> : vector<4x32xf32>
    %138 = tpu.matmul %135, %137, %cst_138 {dimension_numbers = #tpu.dot_dimension_numbers<[1], [0], [0], [1], [0, 0, 1, 1], [], []>} : vector<4x16xf32>, vector<16x32xf32>, vector<4x32xf32> -> vector<4x32xf32>
    %139 = arith.addf %132, %138 : vector<4x32xf32>
    %c2_139 = arith.constant 2 : index
    %c0_140 = arith.constant 0 : index
    %c0_141 = arith.constant 0 : index
    %140 = vector.load %arg6[%c2_139, %c0_140, %c0_141] : memref<16x4x16xf32, #tpu.memory_space<vmem>>, vector<1x4x16xf32>
    %141 = vector.shape_cast %140 : vector<1x4x16xf32> to vector<4x16xf32>
    %cst_142 = arith.constant dense<0.000000e+00> : vector<4x16xf32>
    %142 = tpu.matmul %141, %124, %cst_142 {dimension_numbers = #tpu.dot_dimension_numbers<[1], [0], [0], [1], [0, 0, 1, 1], [], []>} : vector<4x16xf32>, vector<16x16xf32>, vector<4x16xf32> -> vector<4x16xf32>
    %c2_143 = arith.constant 2 : index
    %c0_144 = arith.constant 0 : index
    %c0_145 = arith.constant 0 : index
    %143 = vector.load %arg7[%c2_143, %c0_144, %c0_145] : memref<16x16x32xf32, #tpu.memory_space<vmem>>, vector<1x16x32xf32>
    %144 = vector.shape_cast %143 : vector<1x16x32xf32> to vector<16x32xf32>
    %cst_146 = arith.constant dense<0.000000e+00> : vector<4x32xf32>
    %145 = tpu.matmul %142, %144, %cst_146 {dimension_numbers = #tpu.dot_dimension_numbers<[1], [0], [0], [1], [0, 0, 1, 1], [], []>} : vector<4x16xf32>, vector<16x32xf32>, vector<4x32xf32> -> vector<4x32xf32>
    %146 = arith.addf %139, %145 : vector<4x32xf32>
    %c3_147 = arith.constant 3 : index
    %c0_148 = arith.constant 0 : index
    %c0_149 = arith.constant 0 : index
    %147 = vector.load %arg6[%c3_147, %c0_148, %c0_149] : memref<16x4x16xf32, #tpu.memory_space<vmem>>, vector<1x4x16xf32>
    %148 = vector.shape_cast %147 : vector<1x4x16xf32> to vector<4x16xf32>
    %cst_150 = arith.constant dense<0.000000e+00> : vector<4x16xf32>
    %149 = tpu.matmul %148, %124, %cst_150 {dimension_numbers = #tpu.dot_dimension_numbers<[1], [0], [0], [1], [0, 0, 1, 1], [], []>} : vector<4x16xf32>, vector<16x16xf32>, vector<4x16xf32> -> vector<4x16xf32>
    %c3_151 = arith.constant 3 : index
    %c0_152 = arith.constant 0 : index
    %c0_153 = arith.constant 0 : index
    %150 = vector.load %arg7[%c3_151, %c0_152, %c0_153] : memref<16x16x32xf32, #tpu.memory_space<vmem>>, vector<1x16x32xf32>
    %151 = vector.shape_cast %150 : vector<1x16x32xf32> to vector<16x32xf32>
    %cst_154 = arith.constant dense<0.000000e+00> : vector<4x32xf32>
    %152 = tpu.matmul %149, %151, %cst_154 {dimension_numbers = #tpu.dot_dimension_numbers<[1], [0], [0], [1], [0, 0, 1, 1], [], []>} : vector<4x16xf32>, vector<16x32xf32>, vector<4x32xf32> -> vector<4x32xf32>
    %153 = arith.addf %146, %152 : vector<4x32xf32>
    %c4_155 = arith.constant 4 : index
    %c0_156 = arith.constant 0 : index
    %c0_157 = arith.constant 0 : index
    %154 = vector.load %arg6[%c4_155, %c0_156, %c0_157] : memref<16x4x16xf32, #tpu.memory_space<vmem>>, vector<1x4x16xf32>
    %155 = vector.shape_cast %154 : vector<1x4x16xf32> to vector<4x16xf32>
    %cst_158 = arith.constant dense<0.000000e+00> : vector<4x16xf32>
    %156 = tpu.matmul %155, %124, %cst_158 {dimension_numbers = #tpu.dot_dimension_numbers<[1], [0], [0], [1], [0, 0, 1, 1], [], []>} : vector<4x16xf32>, vector<16x16xf32>, vector<4x16xf32> -> vector<4x16xf32>
    %c4_159 = arith.constant 4 : index
    %c0_160 = arith.constant 0 : index
    %c0_161 = arith.constant 0 : index
    %157 = vector.load %arg7[%c4_159, %c0_160, %c0_161] : memref<16x16x32xf32, #tpu.memory_space<vmem>>, vector<1x16x32xf32>
    %158 = vector.shape_cast %157 : vector<1x16x32xf32> to vector<16x32xf32>
    %cst_162 = arith.constant dense<0.000000e+00> : vector<4x32xf32>
    %159 = tpu.matmul %156, %158, %cst_162 {dimension_numbers = #tpu.dot_dimension_numbers<[1], [0], [0], [1], [0, 0, 1, 1], [], []>} : vector<4x16xf32>, vector<16x32xf32>, vector<4x32xf32> -> vector<4x32xf32>
    %160 = arith.addf %153, %159 : vector<4x32xf32>
    %c5_163 = arith.constant 5 : index
    %c0_164 = arith.constant 0 : index
    %c0_165 = arith.constant 0 : index
    %161 = vector.load %arg6[%c5_163, %c0_164, %c0_165] : memref<16x4x16xf32, #tpu.memory_space<vmem>>, vector<1x4x16xf32>
    %162 = vector.shape_cast %161 : vector<1x4x16xf32> to vector<4x16xf32>
    %cst_166 = arith.constant dense<0.000000e+00> : vector<4x16xf32>
    %163 = tpu.matmul %162, %124, %cst_166 {dimension_numbers = #tpu.dot_dimension_numbers<[1], [0], [0], [1], [0, 0, 1, 1], [], []>} : vector<4x16xf32>, vector<16x16xf32>, vector<4x16xf32> -> vector<4x16xf32>
    %c5_167 = arith.constant 5 : index
    %c0_168 = arith.constant 0 : index
    %c0_169 = arith.constant 0 : index
    %164 = vector.load %arg7[%c5_167, %c0_168, %c0_169] : memref<16x16x32xf32, #tpu.memory_space<vmem>>, vector<1x16x32xf32>
    %165 = vector.shape_cast %164 : vector<1x16x32xf32> to vector<16x32xf32>
    %cst_170 = arith.constant dense<0.000000e+00> : vector<4x32xf32>
    %166 = tpu.matmul %163, %165, %cst_170 {dimension_numbers = #tpu.dot_dimension_numbers<[1], [0], [0], [1], [0, 0, 1, 1], [], []>} : vector<4x16xf32>, vector<16x32xf32>, vector<4x32xf32> -> vector<4x32xf32>
    %167 = arith.addf %160, %166 : vector<4x32xf32>
    %c6_171 = arith.constant 6 : index
    %c0_172 = arith.constant 0 : index
    %c0_173 = arith.constant 0 : index
    %168 = vector.load %arg6[%c6_171, %c0_172, %c0_173] : memref<16x4x16xf32, #tpu.memory_space<vmem>>, vector<1x4x16xf32>
    %169 = vector.shape_cast %168 : vector<1x4x16xf32> to vector<4x16xf32>
    %cst_174 = arith.constant dense<0.000000e+00> : vector<4x16xf32>
    %170 = tpu.matmul %169, %124, %cst_174 {dimension_numbers = #tpu.dot_dimension_numbers<[1], [0], [0], [1], [0, 0, 1, 1], [], []>} : vector<4x16xf32>, vector<16x16xf32>, vector<4x16xf32> -> vector<4x16xf32>
    %c6_175 = arith.constant 6 : index
    %c0_176 = arith.constant 0 : index
    %c0_177 = arith.constant 0 : index
    %171 = vector.load %arg7[%c6_175, %c0_176, %c0_177] : memref<16x16x32xf32, #tpu.memory_space<vmem>>, vector<1x16x32xf32>
    %172 = vector.shape_cast %171 : vector<1x16x32xf32> to vector<16x32xf32>
    %cst_178 = arith.constant dense<0.000000e+00> : vector<4x32xf32>
    %173 = tpu.matmul %170, %172, %cst_178 {dimension_numbers = #tpu.dot_dimension_numbers<[1], [0], [0], [1], [0, 0, 1, 1], [], []>} : vector<4x16xf32>, vector<16x32xf32>, vector<4x32xf32> -> vector<4x32xf32>
    %174 = arith.addf %167, %173 : vector<4x32xf32>
    %c7_179 = arith.constant 7 : index
    %c0_180 = arith.constant 0 : index
    %c0_181 = arith.constant 0 : index
    %175 = vector.load %arg6[%c7_179, %c0_180, %c0_181] : memref<16x4x16xf32, #tpu.memory_space<vmem>>, vector<1x4x16xf32>
    %176 = vector.shape_cast %175 : vector<1x4x16xf32> to vector<4x16xf32>
    %cst_182 = arith.constant dense<0.000000e+00> : vector<4x16xf32>
    %177 = tpu.matmul %176, %124, %cst_182 {dimension_numbers = #tpu.dot_dimension_numbers<[1], [0], [0], [1], [0, 0, 1, 1], [], []>} : vector<4x16xf32>, vector<16x16xf32>, vector<4x16xf32> -> vector<4x16xf32>
    %c7_183 = arith.constant 7 : index
    %c0_184 = arith.constant 0 : index
    %c0_185 = arith.constant 0 : index
    %178 = vector.load %arg7[%c7_183, %c0_184, %c0_185] : memref<16x16x32xf32, #tpu.memory_space<vmem>>, vector<1x16x32xf32>
    %179 = vector.shape_cast %178 : vector<1x16x32xf32> to vector<16x32xf32>
    %cst_186 = arith.constant dense<0.000000e+00> : vector<4x32xf32>
    %180 = tpu.matmul %177, %179, %cst_186 {dimension_numbers = #tpu.dot_dimension_numbers<[1], [0], [0], [1], [0, 0, 1, 1], [], []>} : vector<4x16xf32>, vector<16x32xf32>, vector<4x32xf32> -> vector<4x32xf32>
    %181 = arith.addf %174, %180 : vector<4x32xf32>
    %c8_187 = arith.constant 8 : index
    %c0_188 = arith.constant 0 : index
    %c0_189 = arith.constant 0 : index
    %182 = vector.load %arg6[%c8_187, %c0_188, %c0_189] : memref<16x4x16xf32, #tpu.memory_space<vmem>>, vector<1x4x16xf32>
    %183 = vector.shape_cast %182 : vector<1x4x16xf32> to vector<4x16xf32>
    %cst_190 = arith.constant dense<0.000000e+00> : vector<4x16xf32>
    %184 = tpu.matmul %183, %124, %cst_190 {dimension_numbers = #tpu.dot_dimension_numbers<[1], [0], [0], [1], [0, 0, 1, 1], [], []>} : vector<4x16xf32>, vector<16x16xf32>, vector<4x16xf32> -> vector<4x16xf32>
    %c8_191 = arith.constant 8 : index
    %c0_192 = arith.constant 0 : index
    %c0_193 = arith.constant 0 : index
    %185 = vector.load %arg7[%c8_191, %c0_192, %c0_193] : memref<16x16x32xf32, #tpu.memory_space<vmem>>, vector<1x16x32xf32>
    %186 = vector.shape_cast %185 : vector<1x16x32xf32> to vector<16x32xf32>
    %cst_194 = arith.constant dense<0.000000e+00> : vector<4x32xf32>
    %187 = tpu.matmul %184, %186, %cst_194 {dimension_numbers = #tpu.dot_dimension_numbers<[1], [0], [0], [1], [0, 0, 1, 1], [], []>} : vector<4x16xf32>, vector<16x32xf32>, vector<4x32xf32> -> vector<4x32xf32>
    %188 = arith.addf %181, %187 : vector<4x32xf32>
    %c9_195 = arith.constant 9 : index
    %c0_196 = arith.constant 0 : index
    %c0_197 = arith.constant 0 : index
    %189 = vector.load %arg6[%c9_195, %c0_196, %c0_197] : memref<16x4x16xf32, #tpu.memory_space<vmem>>, vector<1x4x16xf32>
    %190 = vector.shape_cast %189 : vector<1x4x16xf32> to vector<4x16xf32>
    %cst_198 = arith.constant dense<0.000000e+00> : vector<4x16xf32>
    %191 = tpu.matmul %190, %124, %cst_198 {dimension_numbers = #tpu.dot_dimension_numbers<[1], [0], [0], [1], [0, 0, 1, 1], [], []>} : vector<4x16xf32>, vector<16x16xf32>, vector<4x16xf32> -> vector<4x16xf32>
    %c9_199 = arith.constant 9 : index
    %c0_200 = arith.constant 0 : index
    %c0_201 = arith.constant 0 : index
    %192 = vector.load %arg7[%c9_199, %c0_200, %c0_201] : memref<16x16x32xf32, #tpu.memory_space<vmem>>, vector<1x16x32xf32>
    %193 = vector.shape_cast %192 : vector<1x16x32xf32> to vector<16x32xf32>
    %cst_202 = arith.constant dense<0.000000e+00> : vector<4x32xf32>
    %194 = tpu.matmul %191, %193, %cst_202 {dimension_numbers = #tpu.dot_dimension_numbers<[1], [0], [0], [1], [0, 0, 1, 1], [], []>} : vector<4x16xf32>, vector<16x32xf32>, vector<4x32xf32> -> vector<4x32xf32>
    %195 = arith.addf %188, %194 : vector<4x32xf32>
    %c10_203 = arith.constant 10 : index
    %c0_204 = arith.constant 0 : index
    %c0_205 = arith.constant 0 : index
    %196 = vector.load %arg6[%c10_203, %c0_204, %c0_205] : memref<16x4x16xf32, #tpu.memory_space<vmem>>, vector<1x4x16xf32>
    %197 = vector.shape_cast %196 : vector<1x4x16xf32> to vector<4x16xf32>
    %cst_206 = arith.constant dense<0.000000e+00> : vector<4x16xf32>
    %198 = tpu.matmul %197, %124, %cst_206 {dimension_numbers = #tpu.dot_dimension_numbers<[1], [0], [0], [1], [0, 0, 1, 1], [], []>} : vector<4x16xf32>, vector<16x16xf32>, vector<4x16xf32> -> vector<4x16xf32>
    %c10_207 = arith.constant 10 : index
    %c0_208 = arith.constant 0 : index
    %c0_209 = arith.constant 0 : index
    %199 = vector.load %arg7[%c10_207, %c0_208, %c0_209] : memref<16x16x32xf32, #tpu.memory_space<vmem>>, vector<1x16x32xf32>
    %200 = vector.shape_cast %199 : vector<1x16x32xf32> to vector<16x32xf32>
    %cst_210 = arith.constant dense<0.000000e+00> : vector<4x32xf32>
    %201 = tpu.matmul %198, %200, %cst_210 {dimension_numbers = #tpu.dot_dimension_numbers<[1], [0], [0], [1], [0, 0, 1, 1], [], []>} : vector<4x16xf32>, vector<16x32xf32>, vector<4x32xf32> -> vector<4x32xf32>
    %202 = arith.addf %195, %201 : vector<4x32xf32>
    %c11_211 = arith.constant 11 : index
    %c0_212 = arith.constant 0 : index
    %c0_213 = arith.constant 0 : index
    %203 = vector.load %arg6[%c11_211, %c0_212, %c0_213] : memref<16x4x16xf32, #tpu.memory_space<vmem>>, vector<1x4x16xf32>
    %204 = vector.shape_cast %203 : vector<1x4x16xf32> to vector<4x16xf32>
    %cst_214 = arith.constant dense<0.000000e+00> : vector<4x16xf32>
    %205 = tpu.matmul %204, %124, %cst_214 {dimension_numbers = #tpu.dot_dimension_numbers<[1], [0], [0], [1], [0, 0, 1, 1], [], []>} : vector<4x16xf32>, vector<16x16xf32>, vector<4x16xf32> -> vector<4x16xf32>
    %c11_215 = arith.constant 11 : index
    %c0_216 = arith.constant 0 : index
    %c0_217 = arith.constant 0 : index
    %206 = vector.load %arg7[%c11_215, %c0_216, %c0_217] : memref<16x16x32xf32, #tpu.memory_space<vmem>>, vector<1x16x32xf32>
    %207 = vector.shape_cast %206 : vector<1x16x32xf32> to vector<16x32xf32>
    %cst_218 = arith.constant dense<0.000000e+00> : vector<4x32xf32>
    %208 = tpu.matmul %205, %207, %cst_218 {dimension_numbers = #tpu.dot_dimension_numbers<[1], [0], [0], [1], [0, 0, 1, 1], [], []>} : vector<4x16xf32>, vector<16x32xf32>, vector<4x32xf32> -> vector<4x32xf32>
    %209 = arith.addf %202, %208 : vector<4x32xf32>
    %c12_219 = arith.constant 12 : index
    %c0_220 = arith.constant 0 : index
    %c0_221 = arith.constant 0 : index
    %210 = vector.load %arg6[%c12_219, %c0_220, %c0_221] : memref<16x4x16xf32, #tpu.memory_space<vmem>>, vector<1x4x16xf32>
    %211 = vector.shape_cast %210 : vector<1x4x16xf32> to vector<4x16xf32>
    %cst_222 = arith.constant dense<0.000000e+00> : vector<4x16xf32>
    %212 = tpu.matmul %211, %124, %cst_222 {dimension_numbers = #tpu.dot_dimension_numbers<[1], [0], [0], [1], [0, 0, 1, 1], [], []>} : vector<4x16xf32>, vector<16x16xf32>, vector<4x16xf32> -> vector<4x16xf32>
    %c12_223 = arith.constant 12 : index
    %c0_224 = arith.constant 0 : index
    %c0_225 = arith.constant 0 : index
    %213 = vector.load %arg7[%c12_223, %c0_224, %c0_225] : memref<16x16x32xf32, #tpu.memory_space<vmem>>, vector<1x16x32xf32>
    %214 = vector.shape_cast %213 : vector<1x16x32xf32> to vector<16x32xf32>
    %cst_226 = arith.constant dense<0.000000e+00> : vector<4x32xf32>
    %215 = tpu.matmul %212, %214, %cst_226 {dimension_numbers = #tpu.dot_dimension_numbers<[1], [0], [0], [1], [0, 0, 1, 1], [], []>} : vector<4x16xf32>, vector<16x32xf32>, vector<4x32xf32> -> vector<4x32xf32>
    %216 = arith.addf %209, %215 : vector<4x32xf32>
    %c13_227 = arith.constant 13 : index
    %c0_228 = arith.constant 0 : index
    %c0_229 = arith.constant 0 : index
    %217 = vector.load %arg6[%c13_227, %c0_228, %c0_229] : memref<16x4x16xf32, #tpu.memory_space<vmem>>, vector<1x4x16xf32>
    %218 = vector.shape_cast %217 : vector<1x4x16xf32> to vector<4x16xf32>
    %cst_230 = arith.constant dense<0.000000e+00> : vector<4x16xf32>
    %219 = tpu.matmul %218, %124, %cst_230 {dimension_numbers = #tpu.dot_dimension_numbers<[1], [0], [0], [1], [0, 0, 1, 1], [], []>} : vector<4x16xf32>, vector<16x16xf32>, vector<4x16xf32> -> vector<4x16xf32>
    %c13_231 = arith.constant 13 : index
    %c0_232 = arith.constant 0 : index
    %c0_233 = arith.constant 0 : index
    %220 = vector.load %arg7[%c13_231, %c0_232, %c0_233] : memref<16x16x32xf32, #tpu.memory_space<vmem>>, vector<1x16x32xf32>
    %221 = vector.shape_cast %220 : vector<1x16x32xf32> to vector<16x32xf32>
    %cst_234 = arith.constant dense<0.000000e+00> : vector<4x32xf32>
    %222 = tpu.matmul %219, %221, %cst_234 {dimension_numbers = #tpu.dot_dimension_numbers<[1], [0], [0], [1], [0, 0, 1, 1], [], []>} : vector<4x16xf32>, vector<16x32xf32>, vector<4x32xf32> -> vector<4x32xf32>
    %223 = arith.addf %216, %222 : vector<4x32xf32>
    %c14_235 = arith.constant 14 : index
    %c0_236 = arith.constant 0 : index
    %c0_237 = arith.constant 0 : index
    %224 = vector.load %arg6[%c14_235, %c0_236, %c0_237] : memref<16x4x16xf32, #tpu.memory_space<vmem>>, vector<1x4x16xf32>
    %225 = vector.shape_cast %224 : vector<1x4x16xf32> to vector<4x16xf32>
    %cst_238 = arith.constant dense<0.000000e+00> : vector<4x16xf32>
    %226 = tpu.matmul %225, %124, %cst_238 {dimension_numbers = #tpu.dot_dimension_numbers<[1], [0], [0], [1], [0, 0, 1, 1], [], []>} : vector<4x16xf32>, vector<16x16xf32>, vector<4x16xf32> -> vector<4x16xf32>
    %c14_239 = arith.constant 14 : index
    %c0_240 = arith.constant 0 : index
    %c0_241 = arith.constant 0 : index
    %227 = vector.load %arg7[%c14_239, %c0_240, %c0_241] : memref<16x16x32xf32, #tpu.memory_space<vmem>>, vector<1x16x32xf32>
    %228 = vector.shape_cast %227 : vector<1x16x32xf32> to vector<16x32xf32>
    %cst_242 = arith.constant dense<0.000000e+00> : vector<4x32xf32>
    %229 = tpu.matmul %226, %228, %cst_242 {dimension_numbers = #tpu.dot_dimension_numbers<[1], [0], [0], [1], [0, 0, 1, 1], [], []>} : vector<4x16xf32>, vector<16x32xf32>, vector<4x32xf32> -> vector<4x32xf32>
    %230 = arith.addf %223, %229 : vector<4x32xf32>
    %c15_243 = arith.constant 15 : index
    %c0_244 = arith.constant 0 : index
    %c0_245 = arith.constant 0 : index
    %231 = vector.load %arg6[%c15_243, %c0_244, %c0_245] : memref<16x4x16xf32, #tpu.memory_space<vmem>>, vector<1x4x16xf32>
    %232 = vector.shape_cast %231 : vector<1x4x16xf32> to vector<4x16xf32>
    %cst_246 = arith.constant dense<0.000000e+00> : vector<4x16xf32>
    %233 = tpu.matmul %232, %124, %cst_246 {dimension_numbers = #tpu.dot_dimension_numbers<[1], [0], [0], [1], [0, 0, 1, 1], [], []>} : vector<4x16xf32>, vector<16x16xf32>, vector<4x16xf32> -> vector<4x16xf32>
    %c15_247 = arith.constant 15 : index
    %c0_248 = arith.constant 0 : index
    %c0_249 = arith.constant 0 : index
    %234 = vector.load %arg7[%c15_247, %c0_248, %c0_249] : memref<16x16x32xf32, #tpu.memory_space<vmem>>, vector<1x16x32xf32>
    %235 = vector.shape_cast %234 : vector<1x16x32xf32> to vector<16x32xf32>
    %cst_250 = arith.constant dense<0.000000e+00> : vector<4x32xf32>
    %236 = tpu.matmul %233, %235, %cst_250 {dimension_numbers = #tpu.dot_dimension_numbers<[1], [0], [0], [1], [0, 0, 1, 1], [], []>} : vector<4x16xf32>, vector<16x32xf32>, vector<4x32xf32> -> vector<4x32xf32>
    %237 = arith.addf %230, %236 : vector<4x32xf32>
    %c0_251 = arith.constant 0 : index
    %c0_252 = arith.constant 0 : index
    %238 = vector.load %arg8[%c0_251, %c0_252] : memref<1x32xf32, #tpu.memory_space<vmem>>, vector<1x32xf32>
    %239 = vector.broadcast %238 : vector<1x32xf32> to vector<4x32xf32>
    %240 = arith.addf %237, %239 : vector<4x32xf32>
    %cst_253 = arith.constant 0.000000e+00 : f32
    %241 = vector.broadcast %cst_253 : f32 to vector<4x32xf32>
    %242 = arith.cmpf oge, %240, %241 : vector<4x32xf32>
    %cst_254 = arith.constant 2.000000e-01 : f32
    %243 = vector.broadcast %cst_254 : f32 to vector<4x32xf32>
    %244 = arith.mulf %243, %240 : vector<4x32xf32>
    %245 = arith.select %242, %240, %244 : vector<4x32xi1>, vector<4x32xf32>
    %cst_255 = arith.constant 0.000000e+00 : f32
    %246 = vector.broadcast %cst_255 : f32 to vector<1x64xf32>
    %c0_256 = arith.constant 0 : index
    %c0_257 = arith.constant 0 : index
    %c0_258 = arith.constant 0 : index
    %247 = vector.load %arg9[%c0_256, %c0_257, %c0_258] : memref<16x1x4xf32, #tpu.memory_space<vmem>>, vector<1x1x4xf32>
    %248 = vector.shape_cast %247 : vector<1x1x4xf32> to vector<1x4xf32>
    %cst_259 = arith.constant dense<0.000000e+00> : vector<1x32xf32>
    %249 = tpu.matmul %248, %245, %cst_259 {dimension_numbers = #tpu.dot_dimension_numbers<[1], [0], [0], [1], [0, 0, 1, 1], [], []>} : vector<1x4xf32>, vector<4x32xf32>, vector<1x32xf32> -> vector<1x32xf32>
    %c0_260 = arith.constant 0 : index
    %c0_261 = arith.constant 0 : index
    %c0_262 = arith.constant 0 : index
    %250 = vector.load %arg10[%c0_260, %c0_261, %c0_262] : memref<16x32x64xf32, #tpu.memory_space<vmem>>, vector<1x32x64xf32>
    %251 = vector.shape_cast %250 : vector<1x32x64xf32> to vector<32x64xf32>
    %cst_263 = arith.constant dense<0.000000e+00> : vector<1x64xf32>
    %252 = tpu.matmul %249, %251, %cst_263 {dimension_numbers = #tpu.dot_dimension_numbers<[1], [0], [0], [1], [0, 0, 1, 1], [], []>} : vector<1x32xf32>, vector<32x64xf32>, vector<1x64xf32> -> vector<1x64xf32>
    %253 = arith.addf %246, %252 : vector<1x64xf32>
    %c1_264 = arith.constant 1 : index
    %c0_265 = arith.constant 0 : index
    %c0_266 = arith.constant 0 : index
    %254 = vector.load %arg9[%c1_264, %c0_265, %c0_266] : memref<16x1x4xf32, #tpu.memory_space<vmem>>, vector<1x1x4xf32>
    %255 = vector.shape_cast %254 : vector<1x1x4xf32> to vector<1x4xf32>
    %cst_267 = arith.constant dense<0.000000e+00> : vector<1x32xf32>
    %256 = tpu.matmul %255, %245, %cst_267 {dimension_numbers = #tpu.dot_dimension_numbers<[1], [0], [0], [1], [0, 0, 1, 1], [], []>} : vector<1x4xf32>, vector<4x32xf32>, vector<1x32xf32> -> vector<1x32xf32>
    %c1_268 = arith.constant 1 : index
    %c0_269 = arith.constant 0 : index
    %c0_270 = arith.constant 0 : index
    %257 = vector.load %arg10[%c1_268, %c0_269, %c0_270] : memref<16x32x64xf32, #tpu.memory_space<vmem>>, vector<1x32x64xf32>
    %258 = vector.shape_cast %257 : vector<1x32x64xf32> to vector<32x64xf32>
    %cst_271 = arith.constant dense<0.000000e+00> : vector<1x64xf32>
    %259 = tpu.matmul %256, %258, %cst_271 {dimension_numbers = #tpu.dot_dimension_numbers<[1], [0], [0], [1], [0, 0, 1, 1], [], []>} : vector<1x32xf32>, vector<32x64xf32>, vector<1x64xf32> -> vector<1x64xf32>
    %260 = arith.addf %253, %259 : vector<1x64xf32>
    %c2_272 = arith.constant 2 : index
    %c0_273 = arith.constant 0 : index
    %c0_274 = arith.constant 0 : index
    %261 = vector.load %arg9[%c2_272, %c0_273, %c0_274] : memref<16x1x4xf32, #tpu.memory_space<vmem>>, vector<1x1x4xf32>
    %262 = vector.shape_cast %261 : vector<1x1x4xf32> to vector<1x4xf32>
    %cst_275 = arith.constant dense<0.000000e+00> : vector<1x32xf32>
    %263 = tpu.matmul %262, %245, %cst_275 {dimension_numbers = #tpu.dot_dimension_numbers<[1], [0], [0], [1], [0, 0, 1, 1], [], []>} : vector<1x4xf32>, vector<4x32xf32>, vector<1x32xf32> -> vector<1x32xf32>
    %c2_276 = arith.constant 2 : index
    %c0_277 = arith.constant 0 : index
    %c0_278 = arith.constant 0 : index
    %264 = vector.load %arg10[%c2_276, %c0_277, %c0_278] : memref<16x32x64xf32, #tpu.memory_space<vmem>>, vector<1x32x64xf32>
    %265 = vector.shape_cast %264 : vector<1x32x64xf32> to vector<32x64xf32>
    %cst_279 = arith.constant dense<0.000000e+00> : vector<1x64xf32>
    %266 = tpu.matmul %263, %265, %cst_279 {dimension_numbers = #tpu.dot_dimension_numbers<[1], [0], [0], [1], [0, 0, 1, 1], [], []>} : vector<1x32xf32>, vector<32x64xf32>, vector<1x64xf32> -> vector<1x64xf32>
    %267 = arith.addf %260, %266 : vector<1x64xf32>
    %c3_280 = arith.constant 3 : index
    %c0_281 = arith.constant 0 : index
    %c0_282 = arith.constant 0 : index
    %268 = vector.load %arg9[%c3_280, %c0_281, %c0_282] : memref<16x1x4xf32, #tpu.memory_space<vmem>>, vector<1x1x4xf32>
    %269 = vector.shape_cast %268 : vector<1x1x4xf32> to vector<1x4xf32>
    %cst_283 = arith.constant dense<0.000000e+00> : vector<1x32xf32>
    %270 = tpu.matmul %269, %245, %cst_283 {dimension_numbers = #tpu.dot_dimension_numbers<[1], [0], [0], [1], [0, 0, 1, 1], [], []>} : vector<1x4xf32>, vector<4x32xf32>, vector<1x32xf32> -> vector<1x32xf32>
    %c3_284 = arith.constant 3 : index
    %c0_285 = arith.constant 0 : index
    %c0_286 = arith.constant 0 : index
    %271 = vector.load %arg10[%c3_284, %c0_285, %c0_286] : memref<16x32x64xf32, #tpu.memory_space<vmem>>, vector<1x32x64xf32>
    %272 = vector.shape_cast %271 : vector<1x32x64xf32> to vector<32x64xf32>
    %cst_287 = arith.constant dense<0.000000e+00> : vector<1x64xf32>
    %273 = tpu.matmul %270, %272, %cst_287 {dimension_numbers = #tpu.dot_dimension_numbers<[1], [0], [0], [1], [0, 0, 1, 1], [], []>} : vector<1x32xf32>, vector<32x64xf32>, vector<1x64xf32> -> vector<1x64xf32>
    %274 = arith.addf %267, %273 : vector<1x64xf32>
    %c4_288 = arith.constant 4 : index
    %c0_289 = arith.constant 0 : index
    %c0_290 = arith.constant 0 : index
    %275 = vector.load %arg9[%c4_288, %c0_289, %c0_290] : memref<16x1x4xf32, #tpu.memory_space<vmem>>, vector<1x1x4xf32>
    %276 = vector.shape_cast %275 : vector<1x1x4xf32> to vector<1x4xf32>
    %cst_291 = arith.constant dense<0.000000e+00> : vector<1x32xf32>
    %277 = tpu.matmul %276, %245, %cst_291 {dimension_numbers = #tpu.dot_dimension_numbers<[1], [0], [0], [1], [0, 0, 1, 1], [], []>} : vector<1x4xf32>, vector<4x32xf32>, vector<1x32xf32> -> vector<1x32xf32>
    %c4_292 = arith.constant 4 : index
    %c0_293 = arith.constant 0 : index
    %c0_294 = arith.constant 0 : index
    %278 = vector.load %arg10[%c4_292, %c0_293, %c0_294] : memref<16x32x64xf32, #tpu.memory_space<vmem>>, vector<1x32x64xf32>
    %279 = vector.shape_cast %278 : vector<1x32x64xf32> to vector<32x64xf32>
    %cst_295 = arith.constant dense<0.000000e+00> : vector<1x64xf32>
    %280 = tpu.matmul %277, %279, %cst_295 {dimension_numbers = #tpu.dot_dimension_numbers<[1], [0], [0], [1], [0, 0, 1, 1], [], []>} : vector<1x32xf32>, vector<32x64xf32>, vector<1x64xf32> -> vector<1x64xf32>
    %281 = arith.addf %274, %280 : vector<1x64xf32>
    %c5_296 = arith.constant 5 : index
    %c0_297 = arith.constant 0 : index
    %c0_298 = arith.constant 0 : index
    %282 = vector.load %arg9[%c5_296, %c0_297, %c0_298] : memref<16x1x4xf32, #tpu.memory_space<vmem>>, vector<1x1x4xf32>
    %283 = vector.shape_cast %282 : vector<1x1x4xf32> to vector<1x4xf32>
    %cst_299 = arith.constant dense<0.000000e+00> : vector<1x32xf32>
    %284 = tpu.matmul %283, %245, %cst_299 {dimension_numbers = #tpu.dot_dimension_numbers<[1], [0], [0], [1], [0, 0, 1, 1], [], []>} : vector<1x4xf32>, vector<4x32xf32>, vector<1x32xf32> -> vector<1x32xf32>
    %c5_300 = arith.constant 5 : index
    %c0_301 = arith.constant 0 : index
    %c0_302 = arith.constant 0 : index
    %285 = vector.load %arg10[%c5_300, %c0_301, %c0_302] : memref<16x32x64xf32, #tpu.memory_space<vmem>>, vector<1x32x64xf32>
    %286 = vector.shape_cast %285 : vector<1x32x64xf32> to vector<32x64xf32>
    %cst_303 = arith.constant dense<0.000000e+00> : vector<1x64xf32>
    %287 = tpu.matmul %284, %286, %cst_303 {dimension_numbers = #tpu.dot_dimension_numbers<[1], [0], [0], [1], [0, 0, 1, 1], [], []>} : vector<1x32xf32>, vector<32x64xf32>, vector<1x64xf32> -> vector<1x64xf32>
    %288 = arith.addf %281, %287 : vector<1x64xf32>
    %c6_304 = arith.constant 6 : index
    %c0_305 = arith.constant 0 : index
    %c0_306 = arith.constant 0 : index
    %289 = vector.load %arg9[%c6_304, %c0_305, %c0_306] : memref<16x1x4xf32, #tpu.memory_space<vmem>>, vector<1x1x4xf32>
    %290 = vector.shape_cast %289 : vector<1x1x4xf32> to vector<1x4xf32>
    %cst_307 = arith.constant dense<0.000000e+00> : vector<1x32xf32>
    %291 = tpu.matmul %290, %245, %cst_307 {dimension_numbers = #tpu.dot_dimension_numbers<[1], [0], [0], [1], [0, 0, 1, 1], [], []>} : vector<1x4xf32>, vector<4x32xf32>, vector<1x32xf32> -> vector<1x32xf32>
    %c6_308 = arith.constant 6 : index
    %c0_309 = arith.constant 0 : index
    %c0_310 = arith.constant 0 : index
    %292 = vector.load %arg10[%c6_308, %c0_309, %c0_310] : memref<16x32x64xf32, #tpu.memory_space<vmem>>, vector<1x32x64xf32>
    %293 = vector.shape_cast %292 : vector<1x32x64xf32> to vector<32x64xf32>
    %cst_311 = arith.constant dense<0.000000e+00> : vector<1x64xf32>
    %294 = tpu.matmul %291, %293, %cst_311 {dimension_numbers = #tpu.dot_dimension_numbers<[1], [0], [0], [1], [0, 0, 1, 1], [], []>} : vector<1x32xf32>, vector<32x64xf32>, vector<1x64xf32> -> vector<1x64xf32>
    %295 = arith.addf %288, %294 : vector<1x64xf32>
    %c7_312 = arith.constant 7 : index
    %c0_313 = arith.constant 0 : index
    %c0_314 = arith.constant 0 : index
    %296 = vector.load %arg9[%c7_312, %c0_313, %c0_314] : memref<16x1x4xf32, #tpu.memory_space<vmem>>, vector<1x1x4xf32>
    %297 = vector.shape_cast %296 : vector<1x1x4xf32> to vector<1x4xf32>
    %cst_315 = arith.constant dense<0.000000e+00> : vector<1x32xf32>
    %298 = tpu.matmul %297, %245, %cst_315 {dimension_numbers = #tpu.dot_dimension_numbers<[1], [0], [0], [1], [0, 0, 1, 1], [], []>} : vector<1x4xf32>, vector<4x32xf32>, vector<1x32xf32> -> vector<1x32xf32>
    %c7_316 = arith.constant 7 : index
    %c0_317 = arith.constant 0 : index
    %c0_318 = arith.constant 0 : index
    %299 = vector.load %arg10[%c7_316, %c0_317, %c0_318] : memref<16x32x64xf32, #tpu.memory_space<vmem>>, vector<1x32x64xf32>
    %300 = vector.shape_cast %299 : vector<1x32x64xf32> to vector<32x64xf32>
    %cst_319 = arith.constant dense<0.000000e+00> : vector<1x64xf32>
    %301 = tpu.matmul %298, %300, %cst_319 {dimension_numbers = #tpu.dot_dimension_numbers<[1], [0], [0], [1], [0, 0, 1, 1], [], []>} : vector<1x32xf32>, vector<32x64xf32>, vector<1x64xf32> -> vector<1x64xf32>
    %302 = arith.addf %295, %301 : vector<1x64xf32>
    %c8_320 = arith.constant 8 : index
    %c0_321 = arith.constant 0 : index
    %c0_322 = arith.constant 0 : index
    %303 = vector.load %arg9[%c8_320, %c0_321, %c0_322] : memref<16x1x4xf32, #tpu.memory_space<vmem>>, vector<1x1x4xf32>
    %304 = vector.shape_cast %303 : vector<1x1x4xf32> to vector<1x4xf32>
    %cst_323 = arith.constant dense<0.000000e+00> : vector<1x32xf32>
    %305 = tpu.matmul %304, %245, %cst_323 {dimension_numbers = #tpu.dot_dimension_numbers<[1], [0], [0], [1], [0, 0, 1, 1], [], []>} : vector<1x4xf32>, vector<4x32xf32>, vector<1x32xf32> -> vector<1x32xf32>
    %c8_324 = arith.constant 8 : index
    %c0_325 = arith.constant 0 : index
    %c0_326 = arith.constant 0 : index
    %306 = vector.load %arg10[%c8_324, %c0_325, %c0_326] : memref<16x32x64xf32, #tpu.memory_space<vmem>>, vector<1x32x64xf32>
    %307 = vector.shape_cast %306 : vector<1x32x64xf32> to vector<32x64xf32>
    %cst_327 = arith.constant dense<0.000000e+00> : vector<1x64xf32>
    %308 = tpu.matmul %305, %307, %cst_327 {dimension_numbers = #tpu.dot_dimension_numbers<[1], [0], [0], [1], [0, 0, 1, 1], [], []>} : vector<1x32xf32>, vector<32x64xf32>, vector<1x64xf32> -> vector<1x64xf32>
    %309 = arith.addf %302, %308 : vector<1x64xf32>
    %c9_328 = arith.constant 9 : index
    %c0_329 = arith.constant 0 : index
    %c0_330 = arith.constant 0 : index
    %310 = vector.load %arg9[%c9_328, %c0_329, %c0_330] : memref<16x1x4xf32, #tpu.memory_space<vmem>>, vector<1x1x4xf32>
    %311 = vector.shape_cast %310 : vector<1x1x4xf32> to vector<1x4xf32>
    %cst_331 = arith.constant dense<0.000000e+00> : vector<1x32xf32>
    %312 = tpu.matmul %311, %245, %cst_331 {dimension_numbers = #tpu.dot_dimension_numbers<[1], [0], [0], [1], [0, 0, 1, 1], [], []>} : vector<1x4xf32>, vector<4x32xf32>, vector<1x32xf32> -> vector<1x32xf32>
    %c9_332 = arith.constant 9 : index
    %c0_333 = arith.constant 0 : index
    %c0_334 = arith.constant 0 : index
    %313 = vector.load %arg10[%c9_332, %c0_333, %c0_334] : memref<16x32x64xf32, #tpu.memory_space<vmem>>, vector<1x32x64xf32>
    %314 = vector.shape_cast %313 : vector<1x32x64xf32> to vector<32x64xf32>
    %cst_335 = arith.constant dense<0.000000e+00> : vector<1x64xf32>
    %315 = tpu.matmul %312, %314, %cst_335 {dimension_numbers = #tpu.dot_dimension_numbers<[1], [0], [0], [1], [0, 0, 1, 1], [], []>} : vector<1x32xf32>, vector<32x64xf32>, vector<1x64xf32> -> vector<1x64xf32>
    %316 = arith.addf %309, %315 : vector<1x64xf32>
    %c10_336 = arith.constant 10 : index
    %c0_337 = arith.constant 0 : index
    %c0_338 = arith.constant 0 : index
    %317 = vector.load %arg9[%c10_336, %c0_337, %c0_338] : memref<16x1x4xf32, #tpu.memory_space<vmem>>, vector<1x1x4xf32>
    %318 = vector.shape_cast %317 : vector<1x1x4xf32> to vector<1x4xf32>
    %cst_339 = arith.constant dense<0.000000e+00> : vector<1x32xf32>
    %319 = tpu.matmul %318, %245, %cst_339 {dimension_numbers = #tpu.dot_dimension_numbers<[1], [0], [0], [1], [0, 0, 1, 1], [], []>} : vector<1x4xf32>, vector<4x32xf32>, vector<1x32xf32> -> vector<1x32xf32>
    %c10_340 = arith.constant 10 : index
    %c0_341 = arith.constant 0 : index
    %c0_342 = arith.constant 0 : index
    %320 = vector.load %arg10[%c10_340, %c0_341, %c0_342] : memref<16x32x64xf32, #tpu.memory_space<vmem>>, vector<1x32x64xf32>
    %321 = vector.shape_cast %320 : vector<1x32x64xf32> to vector<32x64xf32>
    %cst_343 = arith.constant dense<0.000000e+00> : vector<1x64xf32>
    %322 = tpu.matmul %319, %321, %cst_343 {dimension_numbers = #tpu.dot_dimension_numbers<[1], [0], [0], [1], [0, 0, 1, 1], [], []>} : vector<1x32xf32>, vector<32x64xf32>, vector<1x64xf32> -> vector<1x64xf32>
    %323 = arith.addf %316, %322 : vector<1x64xf32>
    %c11_344 = arith.constant 11 : index
    %c0_345 = arith.constant 0 : index
    %c0_346 = arith.constant 0 : index
    %324 = vector.load %arg9[%c11_344, %c0_345, %c0_346] : memref<16x1x4xf32, #tpu.memory_space<vmem>>, vector<1x1x4xf32>
    %325 = vector.shape_cast %324 : vector<1x1x4xf32> to vector<1x4xf32>
    %cst_347 = arith.constant dense<0.000000e+00> : vector<1x32xf32>
    %326 = tpu.matmul %325, %245, %cst_347 {dimension_numbers = #tpu.dot_dimension_numbers<[1], [0], [0], [1], [0, 0, 1, 1], [], []>} : vector<1x4xf32>, vector<4x32xf32>, vector<1x32xf32> -> vector<1x32xf32>
    %c11_348 = arith.constant 11 : index
    %c0_349 = arith.constant 0 : index
    %c0_350 = arith.constant 0 : index
    %327 = vector.load %arg10[%c11_348, %c0_349, %c0_350] : memref<16x32x64xf32, #tpu.memory_space<vmem>>, vector<1x32x64xf32>
    %328 = vector.shape_cast %327 : vector<1x32x64xf32> to vector<32x64xf32>
    %cst_351 = arith.constant dense<0.000000e+00> : vector<1x64xf32>
    %329 = tpu.matmul %326, %328, %cst_351 {dimension_numbers = #tpu.dot_dimension_numbers<[1], [0], [0], [1], [0, 0, 1, 1], [], []>} : vector<1x32xf32>, vector<32x64xf32>, vector<1x64xf32> -> vector<1x64xf32>
    %330 = arith.addf %323, %329 : vector<1x64xf32>
    %c12_352 = arith.constant 12 : index
    %c0_353 = arith.constant 0 : index
    %c0_354 = arith.constant 0 : index
    %331 = vector.load %arg9[%c12_352, %c0_353, %c0_354] : memref<16x1x4xf32, #tpu.memory_space<vmem>>, vector<1x1x4xf32>
    %332 = vector.shape_cast %331 : vector<1x1x4xf32> to vector<1x4xf32>
    %cst_355 = arith.constant dense<0.000000e+00> : vector<1x32xf32>
    %333 = tpu.matmul %332, %245, %cst_355 {dimension_numbers = #tpu.dot_dimension_numbers<[1], [0], [0], [1], [0, 0, 1, 1], [], []>} : vector<1x4xf32>, vector<4x32xf32>, vector<1x32xf32> -> vector<1x32xf32>
    %c12_356 = arith.constant 12 : index
    %c0_357 = arith.constant 0 : index
    %c0_358 = arith.constant 0 : index
    %334 = vector.load %arg10[%c12_356, %c0_357, %c0_358] : memref<16x32x64xf32, #tpu.memory_space<vmem>>, vector<1x32x64xf32>
    %335 = vector.shape_cast %334 : vector<1x32x64xf32> to vector<32x64xf32>
    %cst_359 = arith.constant dense<0.000000e+00> : vector<1x64xf32>
    %336 = tpu.matmul %333, %335, %cst_359 {dimension_numbers = #tpu.dot_dimension_numbers<[1], [0], [0], [1], [0, 0, 1, 1], [], []>} : vector<1x32xf32>, vector<32x64xf32>, vector<1x64xf32> -> vector<1x64xf32>
    %337 = arith.addf %330, %336 : vector<1x64xf32>
    %c13_360 = arith.constant 13 : index
    %c0_361 = arith.constant 0 : index
    %c0_362 = arith.constant 0 : index
    %338 = vector.load %arg9[%c13_360, %c0_361, %c0_362] : memref<16x1x4xf32, #tpu.memory_space<vmem>>, vector<1x1x4xf32>
    %339 = vector.shape_cast %338 : vector<1x1x4xf32> to vector<1x4xf32>
    %cst_363 = arith.constant dense<0.000000e+00> : vector<1x32xf32>
    %340 = tpu.matmul %339, %245, %cst_363 {dimension_numbers = #tpu.dot_dimension_numbers<[1], [0], [0], [1], [0, 0, 1, 1], [], []>} : vector<1x4xf32>, vector<4x32xf32>, vector<1x32xf32> -> vector<1x32xf32>
    %c13_364 = arith.constant 13 : index
    %c0_365 = arith.constant 0 : index
    %c0_366 = arith.constant 0 : index
    %341 = vector.load %arg10[%c13_364, %c0_365, %c0_366] : memref<16x32x64xf32, #tpu.memory_space<vmem>>, vector<1x32x64xf32>
    %342 = vector.shape_cast %341 : vector<1x32x64xf32> to vector<32x64xf32>
    %cst_367 = arith.constant dense<0.000000e+00> : vector<1x64xf32>
    %343 = tpu.matmul %340, %342, %cst_367 {dimension_numbers = #tpu.dot_dimension_numbers<[1], [0], [0], [1], [0, 0, 1, 1], [], []>} : vector<1x32xf32>, vector<32x64xf32>, vector<1x64xf32> -> vector<1x64xf32>
    %344 = arith.addf %337, %343 : vector<1x64xf32>
    %c14_368 = arith.constant 14 : index
    %c0_369 = arith.constant 0 : index
    %c0_370 = arith.constant 0 : index
    %345 = vector.load %arg9[%c14_368, %c0_369, %c0_370] : memref<16x1x4xf32, #tpu.memory_space<vmem>>, vector<1x1x4xf32>
    %346 = vector.shape_cast %345 : vector<1x1x4xf32> to vector<1x4xf32>
    %cst_371 = arith.constant dense<0.000000e+00> : vector<1x32xf32>
    %347 = tpu.matmul %346, %245, %cst_371 {dimension_numbers = #tpu.dot_dimension_numbers<[1], [0], [0], [1], [0, 0, 1, 1], [], []>} : vector<1x4xf32>, vector<4x32xf32>, vector<1x32xf32> -> vector<1x32xf32>
    %c14_372 = arith.constant 14 : index
    %c0_373 = arith.constant 0 : index
    %c0_374 = arith.constant 0 : index
    %348 = vector.load %arg10[%c14_372, %c0_373, %c0_374] : memref<16x32x64xf32, #tpu.memory_space<vmem>>, vector<1x32x64xf32>
    %349 = vector.shape_cast %348 : vector<1x32x64xf32> to vector<32x64xf32>
    %cst_375 = arith.constant dense<0.000000e+00> : vector<1x64xf32>
    %350 = tpu.matmul %347, %349, %cst_375 {dimension_numbers = #tpu.dot_dimension_numbers<[1], [0], [0], [1], [0, 0, 1, 1], [], []>} : vector<1x32xf32>, vector<32x64xf32>, vector<1x64xf32> -> vector<1x64xf32>
    %351 = arith.addf %344, %350 : vector<1x64xf32>
    %c15_376 = arith.constant 15 : index
    %c0_377 = arith.constant 0 : index
    %c0_378 = arith.constant 0 : index
    %352 = vector.load %arg9[%c15_376, %c0_377, %c0_378] : memref<16x1x4xf32, #tpu.memory_space<vmem>>, vector<1x1x4xf32>
    %353 = vector.shape_cast %352 : vector<1x1x4xf32> to vector<1x4xf32>
    %cst_379 = arith.constant dense<0.000000e+00> : vector<1x32xf32>
    %354 = tpu.matmul %353, %245, %cst_379 {dimension_numbers = #tpu.dot_dimension_numbers<[1], [0], [0], [1], [0, 0, 1, 1], [], []>} : vector<1x4xf32>, vector<4x32xf32>, vector<1x32xf32> -> vector<1x32xf32>
    %c15_380 = arith.constant 15 : index
    %c0_381 = arith.constant 0 : index
    %c0_382 = arith.constant 0 : index
    %355 = vector.load %arg10[%c15_380, %c0_381, %c0_382] : memref<16x32x64xf32, #tpu.memory_space<vmem>>, vector<1x32x64xf32>
    %356 = vector.shape_cast %355 : vector<1x32x64xf32> to vector<32x64xf32>
    %cst_383 = arith.constant dense<0.000000e+00> : vector<1x64xf32>
    %357 = tpu.matmul %354, %356, %cst_383 {dimension_numbers = #tpu.dot_dimension_numbers<[1], [0], [0], [1], [0, 0, 1, 1], [], []>} : vector<1x32xf32>, vector<32x64xf32>, vector<1x64xf32> -> vector<1x64xf32>
    %358 = arith.addf %351, %357 : vector<1x64xf32>
    %c0_384 = arith.constant 0 : index
    %c0_385 = arith.constant 0 : index
    %359 = vector.load %arg11[%c0_384, %c0_385] : memref<1x64xf32, #tpu.memory_space<vmem>>, vector<1x64xf32>
    %360 = arith.addf %358, %359 : vector<1x64xf32>
    %cst_386 = arith.constant 0.000000e+00 : f32
    %361 = vector.broadcast %cst_386 : f32 to vector<1x64xf32>
    %362 = arith.cmpf oge, %360, %361 : vector<1x64xf32>
    %cst_387 = arith.constant 2.000000e-01 : f32
    %363 = vector.broadcast %cst_387 : f32 to vector<1x64xf32>
    %364 = arith.mulf %363, %360 : vector<1x64xf32>
    %365 = arith.select %362, %360, %364 : vector<1x64xi1>, vector<1x64xf32>
    %c0_388 = arith.constant 0 : index
    %c0_389 = arith.constant 0 : index
    %366 = vector.load %arg12[%c0_388, %c0_389] : memref<1x64xf32, #tpu.memory_space<vmem>>, vector<1x64xf32>
    %367 = arith.mulf %365, %366 : vector<1x64xf32>
    %cst_390 = arith.constant dense<0.000000e+00> : vector<1xf32>
    %368 = vector.multi_reduction <add>, %367, %cst_390 [1] : vector<1x64xf32> to vector<1xf32>
    %369 = vector.shape_cast %368 : vector<1xf32> to vector<1x1xf32>
    %c0_391 = arith.constant 0 : index
    %c0_392 = arith.constant 0 : index
    %370 = vector.load %arg13[%c0_391, %c0_392] : memref<1x1xf32, #tpu.memory_space<vmem>>, vector<1x1xf32>
    %371 = arith.addf %369, %370 : vector<1x1xf32>
    %c0_393 = arith.constant 0 : index
    %c0_394 = arith.constant 0 : index
    %c0_395 = arith.constant 0 : index
    %372 = vector.load %arg14[%c0_393, %c0_394, %c0_395] : memref<1x1x1xf32, #tpu.memory_space<vmem>>, vector<1x1x1xf32>
    %373 = vector.shape_cast %372 : vector<1x1x1xf32> to vector<1x1xf32>
    %374 = vector.shape_cast %371 : vector<1x1xf32> to vector<1x1x1xf32>
    tpu.vector_store %arg14[%c0_393, %c0_394, %c0_395], %374 {strides = array<i32>} : memref<1x1x1xf32, #tpu.memory_space<vmem>>, vector<1x1x1xf32>,
    return
  }
  func.func @transform_0(%arg0: i32) -> (i32, i32, i32) {
    %c0_i32 = arith.constant 0 : i32
    %c0_i32_0 = arith.constant 0 : i32
    %c0_i32_1 = arith.constant 0 : i32
    return %arg0, %c0_i32, %c0_i32_0 : i32, i32, i32
  }
  func.func @transform_1(%arg0: i32) -> (i32, i32) {
    %c0_i32 = arith.constant 0 : i32
    %c0_i32_0 = arith.constant 0 : i32
    %c0_i32_1 = arith.constant 0 : i32
    return %c0_i32, %c0_i32_0 : i32, i32
  }
  func.func @transform_2(%arg0: i32) -> (i32, i32, i32) {
    %c0_i32 = arith.constant 0 : i32
    %c0_i32_0 = arith.constant 0 : i32
    %c0_i32_1 = arith.constant 0 : i32
    %c0_i32_2 = arith.constant 0 : i32
    return %c0_i32, %c0_i32_0, %c0_i32_1 : i32, i32, i32
  }
  func.func @transform_3(%arg0: i32) -> (i32, i32, i32) {
    %c0_i32 = arith.constant 0 : i32
    %c0_i32_0 = arith.constant 0 : i32
    %c0_i32_1 = arith.constant 0 : i32
    %c0_i32_2 = arith.constant 0 : i32
    return %c0_i32, %c0_i32_0, %c0_i32_1 : i32, i32, i32
  }
  func.func @transform_4(%arg0: i32) -> (i32, i32) {
    %c0_i32 = arith.constant 0 : i32
    %c0_i32_0 = arith.constant 0 : i32
    %c0_i32_1 = arith.constant 0 : i32
    return %c0_i32, %c0_i32_0 : i32, i32
  }
  func.func @transform_5(%arg0: i32) -> (i32, i32, i32) {
    %c0_i32 = arith.constant 0 : i32
    %c0_i32_0 = arith.constant 0 : i32
    %c0_i32_1 = arith.constant 0 : i32
    %c0_i32_2 = arith.constant 0 : i32
    return %c0_i32, %c0_i32_0, %c0_i32_1 : i32, i32, i32
  }
  func.func @transform_6(%arg0: i32) -> (i32, i32, i32) {
    %c0_i32 = arith.constant 0 : i32
    %c0_i32_0 = arith.constant 0 : i32
    %c0_i32_1 = arith.constant 0 : i32
    %c0_i32_2 = arith.constant 0 : i32
    return %c0_i32, %c0_i32_0, %c0_i32_1 : i32, i32, i32
  }
  func.func @transform_7(%arg0: i32) -> (i32, i32) {
    %c0_i32 = arith.constant 0 : i32
    %c0_i32_0 = arith.constant 0 : i32
    %c0_i32_1 = arith.constant 0 : i32
    return %c0_i32, %c0_i32_0 : i32, i32
  }
  func.func @transform_8(%arg0: i32) -> (i32, i32, i32) {
    %c0_i32 = arith.constant 0 : i32
    %c0_i32_0 = arith.constant 0 : i32
    %c0_i32_1 = arith.constant 0 : i32
    %c0_i32_2 = arith.constant 0 : i32
    return %c0_i32, %c0_i32_0, %c0_i32_1 : i32, i32, i32
  }
  func.func @transform_9(%arg0: i32) -> (i32, i32, i32) {
    %c0_i32 = arith.constant 0 : i32
    %c0_i32_0 = arith.constant 0 : i32
    %c0_i32_1 = arith.constant 0 : i32
    %c0_i32_2 = arith.constant 0 : i32
    return %c0_i32, %c0_i32_0, %c0_i32_1 : i32, i32, i32
  }
  func.func @transform_10(%arg0: i32) -> (i32, i32) {
    %c0_i32 = arith.constant 0 : i32
    %c0_i32_0 = arith.constant 0 : i32
    %c0_i32_1 = arith.constant 0 : i32
    return %c0_i32, %c0_i32_0 : i32, i32
  }
  func.func @transform_11(%arg0: i32) -> (i32, i32) {
    %c0_i32 = arith.constant 0 : i32
    %c0_i32_0 = arith.constant 0 : i32
    %c0_i32_1 = arith.constant 0 : i32
    return %c0_i32, %c0_i32_0 : i32, i32
  }
  func.func @transform_12(%arg0: i32) -> (i32, i32) {
    %c0_i32 = arith.constant 0 : i32
    %c0_i32_0 = arith.constant 0 : i32
    %c0_i32_1 = arith.constant 0 : i32
    return %c0_i32, %c0_i32_0 : i32, i32
  }
  func.func @transform_13(%arg0: i32) -> (i32, i32, i32) {
    %c0_i32 = arith.constant 0 : i32
    %c0_i32_0 = arith.constant 0 : i32
    %c0_i32_1 = arith.constant 0 : i32
    return %arg0, %c0_i32, %c0_i32_0 : i32, i32, i32
  }
}

</mosaic_0001>

<bundles_post_ra>
// kernel: fc_discriminator_forward.1
= control target key start
LH: loop header
LB: loop body
LE: loop exit
PB: predicated region body
PF: predicated region fallthrough
CT: control target
= control target key end

     0   :  { %s4839_s0 = inlined_call_operand.vmem [shape: f32[2,256,4], index: 0, kind: input, shape index: {}]   ;;  %s4840_s1 = inlined_call_operand.vmem [shape: f32[64,256], index: 1, kind: input, shape index: {}]   ;;  %s4841_s2 = inlined_call_operand.hbm [shape: f32[16,16,64], index: 2, kind: input, shape index: {}]   ;;  %s4842_s3 = inlined_call_operand.hbm [shape: f32[16,4,16], index: 3, kind: input, shape index: {}]   ;;  %s4843_s4 = inlined_call_operand.vmem [shape: f32[1,16], index: 4, kind: input, shape index: {}]   ;;  %s4844_s5 = inlined_call_operand.hbm [shape: f32[16,4,16], index: 5, kind: input, shape index: {}]   ;;  %s4845_s6 = inlined_call_operand.hbm [shape: f32[16,16,32], index: 6, kind: input, shape index: {}]   ;;  %s4846_s7 = inlined_call_operand.vmem [shape: f32[1,32], index: 7, kind: input, shape index: {}]   ;;  %s4847_s8 = inlined_call_operand.vmem [shape: f32[16,1,4], index: 8, kind: input, shape index: {}]   ;;  %s4848_s9 = inlined_call_operand.vmem [shape: f32[16,32,64], index: 9, kind: input, shape index: {}]   ;;  %s4849_s10 = inlined_call_operand.vmem [shape: f32[1,64], index: 10, kind: input, shape index: {}]   ;;  %s4850_s11 = inlined_call_operand.vmem [shape: f32[1,64], index: 11, kind: input, shape index: {}]   ;;  %s4851_s12 = inlined_call_operand.<no memory space> [shape: f32[1,1], index: 12, kind: input, shape index: {}]   ;;  %s4852_s13 = inlined_call_operand.vmem [shape: f32[2,1,1], index: 13, kind: output, shape index: {}]  }
   0x1   :  { %4853 = sst [smem:[#allocation13_spill]] %s4841_s2  ;;  %v18_v0 = vstv %s4851_s12 }
   0x2   :  { %4854 = sst [smem:[#allocation14_spill]] %s4842_s3  ;;  %19 = vst [vmem:[#allocation2] sm:$0x1] %v18_v0 }
   0x3   :  { %20 = vsyncpa [#allocation4], 0 }
   0x4   :  { %21 = vsyncpa [#allocation6], 0 }
   0x5   :  { %22 = vsyncpa [#allocation9], 0  ;;  %s4066_s27 = smov 0  }
   0x6 LB: > { %s4855_s3 = sld [smem:[#allocation14_spill]]  ;;  %s4075_s12 = sadd.s32 4294967295, %s3983_s27   ;;  %s3983_s27 = sphi %s4066_s27, %s28_s27  }
   0x7   : > { %p3539_p0 = scmp.ge.s32.totalorder %s3983_s27, 1  ;;  %p337_p1 = scmp.lt.s32.totalorder %s3983_s27, 3 }
   0x8   : > { %p3819_p2 = scmp.eq.s32.totalorder %s4075_s12, 0  ;;  %s3985_s15 = smov [#allocation5]  }
   0x9   : > { %p4080_p3 = pnand %p3539_p0, %p337_p1  ;;  %s367_s16 = sshll.u32 %s3985_s15, 4  ;;  %s368_s16 = int_to_ptr.vmem [resolvable:$true] %s367_s16 }
   0xa   : > { %s4857_s2 = sld [smem:[#allocation13_spill]]  ;;  %s3986_s21 = smov [#allocation3]  }
   0xb   : > { %p3806_p4 = pneg %p4080_p3  ;;  %s353_s22 = sshll.u32 %s3986_s21, 4  ;;  %s354_s22 = int_to_ptr.vmem [resolvable:$true] %s353_s22 }
   0xc   : > { %s365_s30 = sshll.u32 %s4855_s3, 4  ;;  %s3987_s23 = smov 64   ;;  %s366_s30 = int_to_ptr.hbm [resolvable:$true] %s365_s30 }
   0xd   : > { %p4091_p5 = pnand %p3819_p2, %p3806_p4  ;;  %s3988_s24 = smov 4  }
   0xe   : > { %s382_s28 = sshll.u32 %s4844_s5, 4  ;;  %s3989_s29 = smov 128   ;;  %s383_s28 = int_to_ptr.hbm [resolvable:$true] %s382_s28 }
   0xf   : > { %3812 = dma.hbm_to_vmem [thread:$0]  (!%p4091_p5), %s366_s30, 1024, %s368_s16, [#allocation6], %s3987_s23, %s3987_s23, %s3988_s24  }
  0x10   : > { %s351_s19 = sshll.u32 %s4857_s2, 4  ;;  %s3990_s15 = smov 8   ;;  %s352_s19 = int_to_ptr.hbm [resolvable:$true] %s351_s19 }
  0x11   : > { %3809 = dma.hbm_to_vmem [thread:$0]  (!%p4091_p5), %s352_s19, 4096, %s354_s22, [#allocation4], %s3989_s29, %s3989_s29, %s3990_s15  }
  0x12   : > { %s3991_s17 = smov [#allocation7]   ;;  %s396_s21 = sshll.u32 %s4845_s6, 4  ;;  %s397_s21 = int_to_ptr.hbm [resolvable:$true] %s396_s21 }
  0x13   : > { %s384_s18 = sshll.u32 %s3991_s17, 4  ;;  %s3992_s30 = smov [#allocation8]   ;;  %s385_s18 = int_to_ptr.vmem [resolvable:$true] %s384_s18 }
  0x14   : > { %3815 = dma.hbm_to_vmem [thread:$0]  (!%p4091_p5), %s383_s28, 1024, %s385_s18, [#allocation6], %s3987_s23, %s3987_s23, %s3988_s24  }
  0x15   : > { %s398_s16 = sshll.u32 %s3992_s30, 4  ;;  %440 = sbr.rel (%p4080_p3) target bundleno = 1849 (0x739), region = 72  ;;  %s399_s16 = int_to_ptr.vmem [resolvable:$true] %s398_s16 }
  0x16   : > { %3818 = dma.hbm_to_vmem [thread:$0]  (!%p4091_p5), %s397_s21, 4096, %s399_s16, [#allocation9], %s3989_s29, %s3989_s29, %s3990_s15  }
  0x1a   : > { %3970 = dma.done.wait (%p3819_p2), [#allocation4], 4096  }
  0x1b   : > { %3972 = vsyncadd (%p3819_p2), [#allocation4], 4294963200 }
  0x1c   : > { %3974 = dma.done.wait (%p3819_p2), [#allocation6], 2048  }
  0x1d   : > { %3976 = vsyncadd (%p3819_p2), [#allocation6], 4294965248 }
  0x1e   : > { %3978 = dma.done.wait (%p3819_p2), [#allocation9], 4096  }
  0x1f   : > { %3980 = vsyncadd (%p3819_p2), [#allocation9], 4294963200  ;;  %p498_p6 = scmp.lt.s32.totalorder %s4075_s12, 1  ;;  %v538_v33 = vld [vmem:[%s4840_s1] sm:$0xff]  ;;  %v539_v34 = vld [vmem:[%s4840_s1 + $0x8] sm:$0xff]  ;;  %vm638_vm0 = vcmask 523264  }
  0x20   : > { %v540_v35 = vld [vmem:[%s4840_s1 + $0x10] sm:$0xff]  ;;  %v541_v36 = vld [vmem:[%s4840_s1 + $0x18] sm:$0xff]  ;;  %v542_v37 = vld [vmem:[%s4840_s1 + $0x20] sm:$0xff]  ;;  %vm710_vm1 = vcmask 1043456   ;;  %vm703_vm2 = vcmask 31744   ;;  %vm1734_vm5 = vcmask 130048  }
  0x21   : > { %s4860_s12 = smov (!%p498_p6, %s4075_s12), 1  ;;  %v543_v38 = vld [vmem:[%s4840_s1 + $0x28] sm:$0xff]  ;;  %v544_v39 = vld [vmem:[%s4840_s1 + $0x30] sm:$0xff]  ;;  %v545_v40 = vld [vmem:[%s4840_s1 + $0x38] sm:$0xff]  ;;  %vm2631_vm7 = vcmask 261120   ;;  %vm3441_vm9 = vcmask 516096  }
  0x22   : > { %s3789_s2 = sshll.u32 %s4860_s12, 8  ;;  %v546_v41 = vld [vmem:[%s4840_s1 + $0x40] sm:$0xff]  ;;  %v547_v42 = vld [vmem:[%s4840_s1 + $0x48] sm:$0xff]  ;;  %v548_v43 = vld [vmem:[%s4840_s1 + $0x50] sm:$0xff]  ;;  %s505_s25 = scalar_lea.vmem %s4852_s13, %s4860_s12  ;;  %vm3447_vm10 = vcmask 0  }
  0x23   : > { %s4131_s19 = scalar_lea.vmem %s4839_s0, %s3789_s2  ;;  %v549_v44 = vld [vmem:[%s4840_s1 + $0x58] sm:$0xff]  ;;  %v550_v45 = vld [vmem:[%s4840_s1 + $0x60] sm:$0xff]  ;;  %v551_v46 = vld [vmem:[%s4840_s1 + $0x68] sm:$0xff] }
  0x24   : > { %v521_v1 = vld [vmem:[%s4131_s19 + $0x78] sm:$0xff]  ;;  %v520_v3 = vld [vmem:[%s4131_s19 + $0x70] sm:$0xff]  ;;  %v519_v5 = vld [vmem:[%s4131_s19 + $0x68] sm:$0xff] }
  0x25   : > { %v537_v2 = vld [vmem:[%s4131_s19 + $0xf8] sm:$0xff]  ;;  %554 = vmatpush.msra.mxu0 %v521_v1  ;;  %v536_v4 = vld [vmem:[%s4131_s19 + $0xf0] sm:$0xff]  ;;  %v535_v6 = vld [vmem:[%s4131_s19 + $0xe8] sm:$0xff] }
  0x26   : > { %595 = vmatpush.msra.mxu1 %v537_v2  ;;  %v518_v7 = vld [vmem:[%s4131_s19 + $0x60] sm:$0xff]  ;;  %v517_v9 = vld [vmem:[%s4131_s19 + $0x58] sm:$0xff]  ;;  %v516_v11 = vld [vmem:[%s4131_s19 + $0x50] sm:$0xff] }
  0x27   : > { %555 = vmatpush.msra.mxu0 %v520_v3  ;;  %v534_v8 = vld [vmem:[%s4131_s19 + $0xe0] sm:$0xff]  ;;  %v533_v10 = vld [vmem:[%s4131_s19 + $0xd8] sm:$0xff]  ;;  %v532_v12 = vld [vmem:[%s4131_s19 + $0xd0] sm:$0xff] }
  0x28   : > { %596 = vmatpush.msra.mxu1 %v536_v4  ;;  %v515_v13 = vld [vmem:[%s4131_s19 + $0x48] sm:$0xff]  ;;  %v514_v15 = vld [vmem:[%s4131_s19 + $0x40] sm:$0xff]  ;;  %v513_v17 = vld [vmem:[%s4131_s19 + $0x38] sm:$0xff] }
  0x29   : > { %556 = vmatpush.msra.mxu0 %v519_v5  ;;  %v531_v14 = vld [vmem:[%s4131_s19 + $0xc8] sm:$0xff]  ;;  %v530_v16 = vld [vmem:[%s4131_s19 + $0xc0] sm:$0xff]  ;;  %v529_v18 = vld [vmem:[%s4131_s19 + $0xb8] sm:$0xff] }
  0x2a   : > { %597 = vmatpush.msra.mxu1 %v535_v6  ;;  %v512_v19 = vld [vmem:[%s4131_s19 + $0x30] sm:$0xff]  ;;  %v511_v21 = vld [vmem:[%s4131_s19 + $0x28] sm:$0xff]  ;;  %v510_v23 = vld [vmem:[%s4131_s19 + $0x20] sm:$0xff] }
  0x2b   : > { %557 = vmatpush.msra.mxu0 %v518_v7  ;;  %v528_v20 = vld [vmem:[%s4131_s19 + $0xb0] sm:$0xff]  ;;  %v527_v22 = vld [vmem:[%s4131_s19 + $0xa8] sm:$0xff]  ;;  %v526_v24 = vld [vmem:[%s4131_s19 + $0xa0] sm:$0xff] }
  0x2c   : > { %598 = vmatpush.msra.mxu1 %v534_v8  ;;  %v509_v25 = vld [vmem:[%s4131_s19 + $0x18] sm:$0xff]  ;;  %v508_v27 = vld [vmem:[%s4131_s19 + $0x10] sm:$0xff]  ;;  %v507_v29 = vld [vmem:[%s4131_s19 + $0x8] sm:$0xff] }
  0x2d   : > { %558 = vmatpush.msra.mxu0 %v517_v9  ;;  %v525_v26 = vld [vmem:[%s4131_s19 + $0x98] sm:$0xff]  ;;  %v524_v28 = vld [vmem:[%s4131_s19 + $0x90] sm:$0xff]  ;;  %v523_v30 = vld [vmem:[%s4131_s19 + $0x88] sm:$0xff] }
  0x2e   : > { %599 = vmatpush.msra.mxu1 %v533_v10  ;;  %v506_v31 = vld [vmem:[%s4131_s19] sm:$0xff]  ;;  %v552_v47 = vld [vmem:[%s4840_s1 + $0x70] sm:$0xff]  ;;  %v553_v48 = vld [vmem:[%s4840_s1 + $0x78] sm:$0xff] }
  0x2f   : > { %559 = vmatpush.msra.mxu0 %v516_v11  ;;  %v522_v32 = vld [vmem:[%s4131_s19 + $0x80] sm:$0xff]  ;;  %v670_v10 = vld [vmem:[#allocation3 + $0x10] sm:$0xff] }
  0x30   : > { %600 = vmatpush.msra.mxu1 %v532_v12  ;;  %v636_v9 = vld [vmem:[#allocation3] sm:$0xff]  ;;  %v974_v12 = vld [vmem:[#allocation3 + $0x50] sm:$0xff] }
  0x31   : > { %560 = vmatpush.msra.mxu0 %v515_v13  ;;  %v702_v11 = vld [vmem:[#allocation5 + $0x4] sm:$0xf]  ;;  %v637_v13 = vld [vmem:[#allocation3 + $0x8] sm:$0xff] }
  0x32   : > { %601 = vmatpush.msra.mxu1 %v531_v14  ;;  %v671_v14 = vld [vmem:[#allocation3 + $0x18] sm:$0xff] }
  0x33   : > { %561 = vmatpush.msra.mxu0 %v514_v15  ;;  %v975_v15 = vld [vmem:[#allocation3 + $0x58] sm:$0xff] }
  0x34   : > { %602 = vmatpush.msra.mxu1 %v530_v16  ;;  %v1110_v16 = vld [vmem:[#allocation3 + $0x70] sm:$0xff] }
  0x35   : > { %562 = vmatpush.msra.mxu0 %v513_v17  ;;  %v1111_v17 = vld [vmem:[#allocation3 + $0x78] sm:$0xff] }
  0x36   : > { %603 = vmatpush.msra.mxu1 %v529_v18  ;;  %v1246_v18 = vld [vmem:[#allocation3 + $0x90] sm:$0xff] }
  0x37   : > { %563 = vmatpush.msra.mxu0 %v512_v19  ;;  %v1247_v19 = vld [vmem:[#allocation3 + $0x98] sm:$0xff] }
  0x38   : > { %604 = vmatpush.msra.mxu1 %v528_v20  ;;  %v1382_v20 = vld [vmem:[#allocation3 + $0xb0] sm:$0xff] }
  0x39   : > { %564 = vmatpush.msra.mxu0 %v511_v21  ;;  %v668_v21 = vld [vmem:[#allocation5] sm:$0xf] }
  0x3a   : > { %605 = vmatpush.msra.mxu1 %v527_v22 }
  0x3b   : > { %565 = vmatpush.msra.mxu0 %v510_v23 }
  0x3c   : > { %606 = vmatpush.msra.mxu1 %v526_v24 }
  0x3d   : > { %566 = vmatpush.msra.mxu0 %v509_v25 }
  0x3e   : > { %607 = vmatpush.msra.mxu1 %v525_v26  ;;  %v770_v26 = vld [vmem:[#allocation3 + $0x20] sm:$0xff] }
  0x3f   : > { %567 = vmatpush.msra.mxu0 %v508_v27  ;;  %v771_v27 = vld [vmem:[#allocation3 + $0x28] sm:$0xff] }
  0x40   : > { %608 = vmatpush.msra.mxu1 %v524_v28  ;;  %v838_v28 = vld [vmem:[#allocation3 + $0x30] sm:$0xff] }
  0x41   : > { %568 = vmatpush.msra.mxu0 %v507_v29  ;;  %v839_v29 = vld [vmem:[#allocation3 + $0x38] sm:$0xff] }
  0x42   : > { %609 = vmatpush.msra.mxu1 %v523_v30  ;;  %v906_v30 = vld [vmem:[#allocation3 + $0x40] sm:$0xff] }
  0x43   : > { %569 = vmatpush.msra.mxu0 %v506_v31  ;;  %v907_v31 = vld [vmem:[#allocation3 + $0x48] sm:$0xff] }
  0x44   : > { %610 = vmatpush.msra.mxu1 %v522_v32  ;;  %570 = vmatmul.f32.vlgmr.msra.gmra.mxu0 %v538_v33  ;;  %v1042_v32 = vld [vmem:[#allocation3 + $0x60] sm:$0xff]  ;;  %v1043_v33 = vld [vmem:[#allocation3 + $0x68] sm:$0xff] }
  0x45   : > { %611 = vmatmul.f32.vlgmr.msra.gmra.mxu1 %v539_v34  ;;  %v1178_v34 = vld [vmem:[#allocation3 + $0x80] sm:$0xff] }
  0x4c   : > { %573 = vmatmul.f32.gmra.mxu0 %v540_v35  ;;  %v1383_v35 = vld [vmem:[#allocation3 + $0xb8] sm:$0xff] }
  0x4d   : > { %614 = vmatmul.f32.gmra.mxu1 %v541_v36  ;;  %v1179_v36 = vld [vmem:[#allocation3 + $0x88] sm:$0xff] }
  0x54   : > { %576 = vmatmul.f32.gmra.mxu0 %v542_v37  ;;  %v1518_v37 = vld [vmem:[#allocation3 + $0xd0] sm:$0xff] }
  0x55   : > { %617 = vmatmul.f32.gmra.mxu1 %v543_v38  ;;  %v1314_v38 = vld [vmem:[#allocation3 + $0xa0] sm:$0xff] }
  0x5c   : > { %579 = vmatmul.f32.gmra.mxu0 %v544_v39  ;;  %v1519_v39 = vld [vmem:[#allocation3 + $0xd8] sm:$0xff] }
  0x5d   : > { %620 = vmatmul.f32.gmra.mxu1 %v545_v40  ;;  %v1315_v40 = vld [vmem:[#allocation3 + $0xa8] sm:$0xff] }
  0x64   : > { %582 = vmatmul.f32.gmra.mxu0 %v546_v41  ;;  %v1006_v41 = vld [vmem:[#allocation5 + $0x14] sm:$0xf] }
  0x65   : > { %623 = vmatmul.f32.gmra.mxu1 %v547_v42  ;;  %v1654_v42 = vld [vmem:[#allocation3 + $0xf0] sm:$0xff] }
  0x66   : > { %3579 = vmatpush.msk.msrb.mxu1 %vm710_vm1, %v1006_v41 }
  0x6c   : > { %585 = vmatmul.f32.gmra.mxu0 %v548_v43  ;;  %v802_v43 = vld [vmem:[#allocation5 + $0x8] sm:$0xf] }
  0x6d   : > { %626 = vmatmul.f32.gmra.mxu1 %v549_v44  ;;  %v1450_v44 = vld [vmem:[#allocation3 + $0xc0] sm:$0xff] }
  0x74   : > { %588 = vmatmul.f32.gmra.mxu0 %v550_v45  ;;  %v1655_v45 = vld [vmem:[#allocation3 + $0xf8] sm:$0xff] }
  0x75   : > { %629 = vmatmul.f32.gmra.mxu1 %v551_v46  ;;  %v1451_v46 = vld [vmem:[#allocation3 + $0xc8] sm:$0xff] }
  0x7c   : > { %591 = vmatmul.f32.gmra.mxu0 %v552_v47  ;;  %v870_v47 = vld [vmem:[#allocation5 + $0xc] sm:$0xf] }
  0x7d   : > { %632 = vmatmul.f32.gmra.mxu1 %v553_v48  ;;  %v1586_v48 = vld [vmem:[#allocation3 + $0xe0] sm:$0xff] }
  0xc1   : > { %v571_v49 = vpop.f32.mrf.mxu0 }
  0xc2   : > { %v612_v50 = vpop.f32.mrf.mxu1 }
  0xc3   : > { %v4245_v8 = vadd.f32 %v612_v50, %v571_v49  ;;  %v1587_v50 = vld [vmem:[#allocation3 + $0xe8] sm:$0xff] }
  0xc9   : > { %v574_v51 = vpop.f32.mrf.mxu0 }
  0xca   : > { %v615_v52 = vpop.f32.mrf.mxu1 }
  0xcb   : > { %v4240_v7 = vadd.f32 %v615_v52, %v574_v51  ;;  %v938_v52 = vld [vmem:[#allocation5 + $0x10] sm:$0xf] }
  0xd1   : > { %v577_v53 = vpop.f32.mrf.mxu0 }
  0xd2   : > { %v618_v54 = vpop.f32.mrf.mxu1 }
  0xd3   : > { %v4235_v6 = vadd.f32 %v618_v54, %v577_v53 }
  0xd9   : > { %v580_v55 = vpop.f32.mrf.mxu0 }
  0xda   : > { %v621_v56 = vpop.f32.mrf.mxu1 }
  0xdb   : > { %v4230_v5 = vadd.f32 %v621_v56, %v580_v55  ;;  %v1074_v56 = vld [vmem:[#allocation5 + $0x18] sm:$0xf] }
  0xe1   : > { %v583_v57 = vpop.f32.mrf.mxu0 }
  0xe2   : > { %v624_v58 = vpop.f32.mrf.mxu1 }
  0xe3   : > { %v4225_v4 = vadd.f32 %v624_v58, %v583_v57 }
  0xe9   : > { %v586_v59 = vpop.f32.mrf.mxu0 }
  0xea   : > { %v627_v60 = vpop.f32.mrf.mxu1 }
  0xeb   : > { %v4220_v3 = vadd.f32 %v627_v60, %v586_v59  ;;  %v1142_v59 = vld [vmem:[#allocation5 + $0x1c] sm:$0xf] }
  0xec   : > { %3589 = vmatpush.msk.msra.mxu1 %vm710_vm1, %v1142_v59 }
  0xf1   : > { %v589_v61 = vpop.f32.mrf.mxu0 }
  0xf2   : > { %v630_v62 = vpop.f32.mrf.mxu1 }
  0xf3   : > { %v4215_v2 = vadd.f32 %v630_v62, %v589_v61  ;;  %v1210_v62 = vld [vmem:[#allocation5 + $0x20] sm:$0xf] }
  0xf9   : > { %v592_v63 = vpop.f32.mrf.mxu0 }
  0xfa   : > { %v633_v0 = vpop.f32.mrf.mxu1 }
  0xfb   : > { %v4213_v1 = vadd.f32 %v633_v0, %v592_v63 }
  0xfd   : > { %653 = vmatpush.msra.mxu2 %v4213_v1  ;;  %686 = vmatpush.msra.mxu3 %v4213_v1 }
  0xfe   : > { %990 = vmatpush.msrb.mxu0 %v4213_v1 }
  0xff   : > { %654 = vmatpush.msra.mxu2 %v4215_v2  ;;  %687 = vmatpush.msra.mxu3 %v4215_v2 }
 0x100   : > { %991 = vmatpush.msrb.mxu0 %v4215_v2 }
 0x101   : > { %655 = vmatpush.msra.mxu2 %v4220_v3  ;;  %688 = vmatpush.msra.mxu3 %v4220_v3 }
 0x102   : > { %992 = vmatpush.msrb.mxu0 %v4220_v3 }
 0x103   : > { %656 = vmatpush.msra.mxu2 %v4225_v4  ;;  %689 = vmatpush.msra.mxu3 %v4225_v4 }
 0x104   : > { %993 = vmatpush.msrb.mxu0 %v4225_v4 }
 0x105   : > { %657 = vmatpush.msra.mxu2 %v4230_v5  ;;  %690 = vmatpush.msra.mxu3 %v4230_v5 }
 0x106   : > { %994 = vmatpush.msrb.mxu0 %v4230_v5 }
 0x107   : > { %658 = vmatpush.msra.mxu2 %v4235_v6  ;;  %691 = vmatpush.msra.mxu3 %v4235_v6 }
 0x108   : > { %995 = vmatpush.msrb.mxu0 %v4235_v6 }
 0x109   : > { %659 = vmatpush.msra.mxu2 %v4240_v7  ;;  %692 = vmatpush.msra.mxu3 %v4240_v7 }
 0x10a   : > { %996 = vmatpush.msrb.mxu0 %v4240_v7 }
 0x10b   : > { %660 = vmatpush.msra.mxu2 %v4245_v8  ;;  %693 = vmatpush.msra.mxu3 %v4245_v8 }
 0x10c   : > { %997 = vmatpush.msrb.mxu0 %v4245_v8  ;;  %3552 = vmatmul.msk.f32.vlgmr.msra.gmra.mxu2 %vm638_vm0, %v636_v9 }
 0x10d   : > { %3554 = vmatmul.msk.f32.vlgmr.msra.gmra.mxu3 %vm638_vm0, %v670_v10  ;;  %3556 = vmatpush.msk.msrb.mxu2 %vm710_vm1, %v702_v11  ;;  %v1482_v10 = vld [vmem:[#allocation5 + $0x30] sm:$0xf] }
 0x10e   : > { %1126 = vmatpush.msra.mxu0 %v4213_v1  ;;  %3559 = vmatpush.msk.msrb.mxu3 %vm710_vm1, %v668_v21 }
 0x10f   : > { %786 = vmatpush.msra.mxu2 %v4213_v1  ;;  %3577 = vmatmul.msk.f32.vlgmr.msrb.gmra.mxu0 %vm638_vm0, %v974_v12 }
 0x110   : > { %1127 = vmatpush.msra.mxu0 %v4215_v2  ;;  %3564 = vmatpush.msk.msra.mxu3 %vm710_vm1, %v802_v43 }
 0x111   : > { %787 = vmatpush.msra.mxu2 %v4215_v2 }
 0x112   : > { %1128 = vmatpush.msra.mxu0 %v4220_v3 }
 0x113   : > { %788 = vmatpush.msra.mxu2 %v4220_v3 }
 0x114   : > { %1129 = vmatpush.msra.mxu0 %v4225_v4  ;;  %3553 = vmatmul.msk.f32.gmra.mxu2 %vm638_vm0, %v637_v13  ;;  %v1550_v13 = vld [vmem:[#allocation5 + $0x34] sm:$0xf] }
 0x115   : > { %789 = vmatpush.msra.mxu2 %v4225_v4  ;;  %3555 = vmatmul.msk.f32.gmra.mxu3 %vm638_vm0, %v671_v14 }
 0x116   : > { %1130 = vmatpush.msra.mxu0 %v4230_v5 }
 0x117   : > { %790 = vmatpush.msra.mxu2 %v4230_v5  ;;  %3578 = vmatmul.msk.f32.gmra.mxu0 %vm638_vm0, %v975_v15 }
 0x118   : > { %1131 = vmatpush.msra.mxu0 %v4235_v6 }
 0x119   : > { %791 = vmatpush.msra.mxu2 %v4235_v6 }
 0x11a   : > { %1132 = vmatpush.msra.mxu0 %v4240_v7 }
 0x11b   : > { %792 = vmatpush.msra.mxu2 %v4240_v7 }
 0x11c   : > { %1133 = vmatpush.msra.mxu0 %v4245_v8 }
 0x11d   : > { %793 = vmatpush.msra.mxu2 %v4245_v8 }
 0x11e   : > { %1262 = vmatpush.msrb.mxu0 %v4213_v1 }
 0x11f   : > { %3587 = vmatmul.msk.f32.vlgmr.msra.gmra.mxu0 %vm638_vm0, %v1110_v16  ;;  %v1618_v16 = vld [vmem:[#allocation5 + $0x38] sm:$0xf] }
 0x120   : > { %1263 = vmatpush.msrb.mxu0 %v4215_v2 }
 0x122   : > { %1264 = vmatpush.msrb.mxu0 %v4220_v3 }
 0x124   : > { %1265 = vmatpush.msrb.mxu0 %v4225_v4 }
 0x126   : > { %1266 = vmatpush.msrb.mxu0 %v4230_v5 }
 0x127   : > { %3588 = vmatmul.msk.f32.gmra.mxu0 %vm638_vm0, %v1111_v17 }
 0x128   : > { %1267 = vmatpush.msrb.mxu0 %v4235_v6 }
 0x12a   : > { %1268 = vmatpush.msrb.mxu0 %v4240_v7 }
 0x12c   : > { %1269 = vmatpush.msrb.mxu0 %v4245_v8 }
 0x12e   : > { %1398 = vmatpush.msra.mxu0 %v4213_v1 }
 0x12f   : > { %3597 = vmatmul.msk.f32.vlgmr.msrb.gmra.mxu0 %vm638_vm0, %v1246_v18 }
 0x130   : > { %1399 = vmatpush.msra.mxu0 %v4215_v2 }
 0x132   : > { %1400 = vmatpush.msra.mxu0 %v4220_v3 }
 0x134   : > { %1401 = vmatpush.msra.mxu0 %v4225_v4 }
 0x136   : > { %1402 = vmatpush.msra.mxu0 %v4230_v5 }
 0x137   : > { %3598 = vmatmul.msk.f32.gmra.mxu0 %vm638_vm0, %v1247_v19  ;;  %v1686_v19 = vld [vmem:[#allocation5 + $0x3c] sm:$0xf] }
 0x138   : > { %1403 = vmatpush.msra.mxu0 %v4235_v6 }
 0x13a   : > { %1404 = vmatpush.msra.mxu0 %v4240_v7 }
 0x13c   : > { %1405 = vmatpush.msra.mxu0 %v4245_v8 }
 0x13e   : > { %1534 = vmatpush.msrb.mxu0 %v4213_v1 }
 0x13f   : > { %3607 = vmatmul.msk.f32.vlgmr.msra.gmra.mxu0 %vm638_vm0, %v1382_v20 }
 0x140   : > { %1535 = vmatpush.msrb.mxu0 %v4215_v2 }
 0x142   : > { %1536 = vmatpush.msrb.mxu0 %v4220_v3 }
 0x144   : > { %1537 = vmatpush.msrb.mxu0 %v4225_v4 }
 0x146   : > { %1538 = vmatpush.msrb.mxu0 %v4230_v5 }
 0x147   : > { %3608 = vmatmul.msk.f32.gmra.mxu0 %vm638_vm0, %v1383_v35 }
 0x148   : > { %1539 = vmatpush.msrb.mxu0 %v4235_v6 }
 0x14a   : > { %1540 = vmatpush.msrb.mxu0 %v4240_v7 }
 0x14c   : > { %1541 = vmatpush.msrb.mxu0 %v4245_v8 }
 0x14e   : > { %1670 = vmatpush.msra.mxu0 %v4213_v1 }
 0x14f   : > { %3617 = vmatmul.msk.f32.vlgmr.msrb.gmra.mxu0 %vm638_vm0, %v1518_v37 }
 0x150   : > { %1671 = vmatpush.msra.mxu0 %v4215_v2 }
 0x152   : > { %1672 = vmatpush.msra.mxu0 %v4220_v3 }
 0x154   : > { %1673 = vmatpush.msra.mxu0 %v4225_v4 }
 0x156   : > { %1674 = vmatpush.msra.mxu0 %v4230_v5 }
 0x157   : > { %3618 = vmatmul.msk.f32.gmra.mxu0 %vm638_vm0, %v1519_v39 }
 0x158   : > { %1675 = vmatpush.msra.mxu0 %v4235_v6 }
 0x15a   : > { %1676 = vmatpush.msra.mxu0 %v4240_v7 }
 0x15c   : > { %1677 = vmatpush.msra.mxu0 %v4245_v8 }
 0x15f   : > { %3627 = vmatmul.msk.f32.vlgmr.msra.gmra.mxu0 %vm638_vm0, %v1654_v42 }
 0x167   : > { %3628 = vmatmul.msk.f32.gmra.mxu0 %vm638_vm0, %v1655_v45 }
 0x18c   : > { %v999_v55 = vpop.f32.mrf.mxu0 }
 0x18d   : > { %3580 = vmatmul.msk.f32.vlgmr.msrb.gmra.mxu1 %vm703_vm2, %v999_v55 }
 0x18f   : > { %v662_v22 = vpop.f32.mrf.mxu2 }
 0x190   : > { %v695_v23 = vpop.f32.mrf.mxu3  ;;  %3560 = vmatmul.msk.f32.vlgmr.msrb.gmra.mxu3 %vm703_vm2, %v662_v22 }
 0x191   : > { %3557 = vmatmul.msk.f32.vlgmr.msrb.gmra.mxu2 %vm703_vm2, %v695_v23  ;;  %3569 = vmatpush.msk.msrb.mxu3 %vm710_vm1, %v870_v47 }
 0x192   : > { %854 = vmatpush.msrb.mxu2 %v4213_v1 }
 0x194   : > { %855 = vmatpush.msrb.mxu2 %v4215_v2  ;;  %v1002_v58 = vpop.f32.mrf.mxu0 }
 0x195   : > { %3581 = vmatmul.msk.f32.gmra.mxu1 %vm703_vm2, %v1002_v58 }
 0x196   : > { %856 = vmatpush.msrb.mxu2 %v4220_v3 }
 0x197   : > { %v665_v24 = vpop.f32.mrf.mxu2 }
 0x198   : > { %857 = vmatpush.msrb.mxu2 %v4225_v4  ;;  %v698_v25 = vpop.f32.mrf.mxu3  ;;  %3561 = vmatmul.msk.f32.gmra.mxu3 %vm703_vm2, %v665_v24 }
 0x199   : > { %3558 = vmatmul.msk.f32.gmra.mxu2 %vm703_vm2, %v698_v25 }
 0x19a   : > { %858 = vmatpush.msrb.mxu2 %v4230_v5 }
 0x19c   : > { %859 = vmatpush.msrb.mxu2 %v4235_v6  ;;  %v1135_v61 = vpop.f32.mrf.mxu0 }
 0x19d   : > { %3590 = vmatmul.msk.f32.vlgmr.msra.gmra.mxu1 %vm703_vm2, %v1135_v61 }
 0x19e   : > { %860 = vmatpush.msrb.mxu2 %v4240_v7 }
 0x1a0   : > { %861 = vmatpush.msrb.mxu2 %v4245_v8 }
 0x1a1   : > { %3562 = vmatmul.msk.f32.vlgmr.msra.gmra.mxu2 %vm638_vm0, %v770_v26 }
 0x1a2   : > { %922 = vmatpush.msra.mxu2 %v4213_v1 }
 0x1a4   : > { %923 = vmatpush.msra.mxu2 %v4215_v2  ;;  %v1138_v0 = vpop.f32.mrf.mxu0 }
 0x1a5   : > { %3591 = vmatmul.msk.f32.gmra.mxu1 %vm703_vm2, %v1138_v0 }
 0x1a6   : > { %924 = vmatpush.msra.mxu2 %v4220_v3 }
 0x1a8   : > { %925 = vmatpush.msra.mxu2 %v4225_v4 }
 0x1a9   : > { %3563 = vmatmul.msk.f32.gmra.mxu2 %vm638_vm0, %v771_v27 }
 0x1aa   : > { %926 = vmatpush.msra.mxu2 %v4230_v5 }
 0x1ac   : > { %927 = vmatpush.msra.mxu2 %v4235_v6 }
 0x1ae   : > { %928 = vmatpush.msra.mxu2 %v4240_v7 }
 0x1b0   : > { %929 = vmatpush.msra.mxu2 %v4245_v8 }
 0x1b1   : > { %3567 = vmatmul.msk.f32.vlgmr.msrb.gmra.mxu2 %vm638_vm0, %v838_v28 }
 0x1b2   : > { %1058 = vmatpush.msrb.mxu2 %v4213_v1 }
 0x1b4   : > { %1059 = vmatpush.msrb.mxu2 %v4215_v2 }
 0x1b6   : > { %1060 = vmatpush.msrb.mxu2 %v4220_v3 }
 0x1b8   : > { %1061 = vmatpush.msrb.mxu2 %v4225_v4 }
 0x1b9   : > { %3568 = vmatmul.msk.f32.gmra.mxu2 %vm638_vm0, %v839_v29 }
 0x1ba   : > { %1062 = vmatpush.msrb.mxu2 %v4230_v5 }
 0x1bc   : > { %1063 = vmatpush.msrb.mxu2 %v4235_v6 }
 0x1be   : > { %1064 = vmatpush.msrb.mxu2 %v4240_v7 }
 0x1c0   : > { %1065 = vmatpush.msrb.mxu2 %v4245_v8 }
 0x1c1   : > { %3572 = vmatmul.msk.f32.vlgmr.msra.gmra.mxu2 %vm638_vm0, %v906_v30 }
 0x1c2   : > { %1194 = vmatpush.msra.mxu2 %v4213_v1 }
 0x1c4   : > { %1195 = vmatpush.msra.mxu2 %v4215_v2 }
 0x1c6   : > { %1196 = vmatpush.msra.mxu2 %v4220_v3 }
 0x1c8   : > { %1197 = vmatpush.msra.mxu2 %v4225_v4 }
 0x1c9   : > { %3573 = vmatmul.msk.f32.gmra.mxu2 %vm638_vm0, %v907_v31 }
 0x1ca   : > { %1198 = vmatpush.msra.mxu2 %v4230_v5 }
 0x1cc   : > { %1199 = vmatpush.msra.mxu2 %v4235_v6 }
 0x1ce   : > { %1200 = vmatpush.msra.mxu2 %v4240_v7 }
 0x1d0   : > { %1201 = vmatpush.msra.mxu2 %v4245_v8 }
 0x1d1   : > { %3582 = vmatmul.msk.f32.vlgmr.msrb.gmra.mxu2 %vm638_vm0, %v1042_v32 }
 0x1d2   : > { %1330 = vmatpush.msrb.mxu2 %v4213_v1 }
 0x1d4   : > { %1331 = vmatpush.msrb.mxu2 %v4215_v2 }
 0x1d6   : > { %1332 = vmatpush.msrb.mxu2 %v4220_v3 }
 0x1d8   : > { %1333 = vmatpush.msrb.mxu2 %v4225_v4 }
 0x1d9   : > { %3583 = vmatmul.msk.f32.gmra.mxu2 %vm638_vm0, %v1043_v33 }
 0x1da   : > { %1334 = vmatpush.msrb.mxu2 %v4230_v5 }
 0x1dc   : > { %1335 = vmatpush.msrb.mxu2 %v4235_v6 }
 0x1de   : > { %1336 = vmatpush.msrb.mxu2 %v4240_v7 }
 0x1e0   : > { %1337 = vmatpush.msrb.mxu2 %v4245_v8 }
 0x1e1   : > { %3592 = vmatmul.msk.f32.vlgmr.msra.gmra.mxu2 %vm638_vm0, %v1178_v34 }
 0x1e2   : > { %1466 = vmatpush.msra.mxu2 %v4213_v1 }
 0x1e4   : > { %1467 = vmatpush.msra.mxu2 %v4215_v2 }
 0x1e6   : > { %1468 = vmatpush.msra.mxu2 %v4220_v3 }
 0x1e8   : > { %1469 = vmatpush.msra.mxu2 %v4225_v4 }
 0x1e9   : > { %3593 = vmatmul.msk.f32.gmra.mxu2 %vm638_vm0, %v1179_v36 }
 0x1ea   : > { %1470 = vmatpush.msra.mxu2 %v4230_v5 }
 0x1ec   : > { %1471 = vmatpush.msra.mxu2 %v4235_v6 }
 0x1ee   : > { %1472 = vmatpush.msra.mxu2 %v4240_v7 }
 0x1f0   : > { %1473 = vmatpush.msra.mxu2 %v4245_v8 }
 0x1f1   : > { %3602 = vmatmul.msk.f32.vlgmr.msrb.gmra.mxu2 %vm638_vm0, %v1314_v38 }
 0x1f2   : > { %1602 = vmatpush.msrb.mxu2 %v4213_v1  ;;  %v1278_v1 = vld [vmem:[#allocation5 + $0x24] sm:$0xf] }
 0x1f3   : > { %3599 = vmatpush.msk.msrb.mxu1 %vm710_vm1, %v1278_v1 }
 0x1f4   : > { %1603 = vmatpush.msrb.mxu2 %v4215_v2 }
 0x1f6   : > { %1604 = vmatpush.msrb.mxu2 %v4220_v3  ;;  %v1271_v3 = vpop.f32.mrf.mxu0 }
 0x1f7   : > { %3600 = vmatmul.msk.f32.vlgmr.msrb.gmra.mxu1 %vm703_vm2, %v1271_v3 }
 0x1f8   : > { %1605 = vmatpush.msrb.mxu2 %v4225_v4  ;;  %v1346_v4 = vld [vmem:[#allocation5 + $0x28] sm:$0xf] }
 0x1f9   : > { %3603 = vmatmul.msk.f32.gmra.mxu2 %vm638_vm0, %v1315_v40 }
 0x1fa   : > { %1606 = vmatpush.msrb.mxu2 %v4230_v5 }
 0x1fc   : > { %1607 = vmatpush.msrb.mxu2 %v4235_v6 }
 0x1fe   : > { %1608 = vmatpush.msrb.mxu2 %v4240_v7  ;;  %v1274_v6 = vpop.f32.mrf.mxu0  ;;  %v1414_v7 = vld [vmem:[#allocation5 + $0x2c] sm:$0xf] }
 0x1ff   : > { %3601 = vmatmul.msk.f32.gmra.mxu1 %vm703_vm2, %v1274_v6 }
 0x200   : > { %1609 = vmatpush.msrb.mxu2 %v4245_v8  ;;  %3609 = vmatpush.msk.msra.mxu1 %vm710_vm1, %v1414_v7 }
 0x201   : > { %3612 = vmatmul.msk.f32.vlgmr.msra.gmra.mxu2 %vm638_vm0, %v1450_v44 }
 0x202   : > { %3619 = vmatpush.msk.msrb.mxu1 %vm710_vm1, %v1550_v13 }
 0x206   : > { %v1407_v9 = vpop.f32.mrf.mxu0 }
 0x207   : > { %3610 = vmatmul.msk.f32.vlgmr.msra.gmra.mxu1 %vm703_vm2, %v1407_v9 }
 0x208   : > { %3629 = vmatpush.msk.msra.mxu1 %vm710_vm1, %v1686_v19  ;;  %v3843_v19 = vld [vmem:[%s4843_s4] ss:$0 sm:$0xff] }
 0x209   : > { %3613 = vmatmul.msk.f32.gmra.mxu2 %vm638_vm0, %v1451_v46 }
 0x20a   : > { %v1033_v31 = vpop.f32.mrf.mxu1 }
 0x20e   : > { %v1410_v12 = vpop.f32.mrf.mxu0 }
 0x20f   : > { %3611 = vmatmul.msk.f32.gmra.mxu1 %vm703_vm2, %v1410_v12 }
 0x211   : > { %3622 = vmatmul.msk.f32.vlgmr.msrb.gmra.mxu2 %vm638_vm0, %v1586_v48 }
 0x212   : > { %v1036_v33 = vpop.f32.mrf.mxu1 }
 0x213   : > { %v763_v26 = vpop.f32.mrf.mxu3 }
 0x214   : > { %v4397_v49 = vpop.f32.mrf.mxu2 }
 0x215   : > { %v764_v46 = vadd.f32 %v763_v26, %v4397_v49 }
 0x216   : > { %v1543_v15 = vpop.f32.mrf.mxu0 }
 0x217   : > { %3620 = vmatmul.msk.f32.vlgmr.msrb.gmra.mxu1 %vm703_vm2, %v1543_v15 }
 0x219   : > { %3623 = vmatmul.msk.f32.gmra.mxu2 %vm638_vm0, %v1587_v50 }
 0x21a   : > { %v1169_v35 = vpop.f32.mrf.mxu1 }
 0x21b   : > { %v766_v28 = vpop.f32.mrf.mxu3 }
 0x21c   : > { %v4400_v51 = vpop.f32.mrf.mxu2 }
 0x21e   : > { %v1546_v18 = vpop.f32.mrf.mxu0 }
 0x21f   : > { %3621 = vmatmul.msk.f32.gmra.mxu1 %vm703_vm2, %v1546_v18 }
 0x222   : > { %v1172_v38 = vpop.f32.mrf.mxu1 }
 0x224   : > { %v795_v53 = vpop.f32.mrf.mxu2 }
 0x225   : > { %3565 = vmatmul.msk.f32.vlgmr.msra.gmra.mxu3 %vm703_vm2, %v795_v53  ;;  %v767_v53 = vadd.f32 %v766_v28, %v4400_v51 }
 0x226   : > { %3574 = vmatpush.msk.msra.mxu3 %vm710_vm1, %v938_v52  ;;  %v1679_v21 = vpop.f32.mrf.mxu0 }
 0x227   : > { %3630 = vmatmul.msk.f32.vlgmr.msra.gmra.mxu1 %vm703_vm2, %v1679_v21 }
 0x22c   : > { %v798_v54 = vpop.f32.mrf.mxu2 }
 0x22d   : > { %3566 = vmatmul.msk.f32.gmra.mxu3 %vm703_vm2, %v798_v54 }
 0x22e   : > { %v1682_v23 = vpop.f32.mrf.mxu0 }
 0x22f   : > { %3631 = vmatmul.msk.f32.gmra.mxu1 %vm703_vm2, %v1682_v23 }
 0x234   : > { %v863_v57 = vpop.f32.mrf.mxu2 }
 0x235   : > { %3570 = vmatmul.msk.f32.vlgmr.msrb.gmra.mxu3 %vm703_vm2, %v863_v57 }
 0x236   : > { %3584 = vmatpush.msk.msrb.mxu3 %vm710_vm1, %v1074_v56 }
 0x23c   : > { %v866_v60 = vpop.f32.mrf.mxu2 }
 0x23d   : > { %3571 = vmatmul.msk.f32.gmra.mxu3 %vm703_vm2, %v866_v60 }
 0x244   : > { %v931_v63 = vpop.f32.mrf.mxu2 }
 0x245   : > { %3575 = vmatmul.msk.f32.vlgmr.msra.gmra.mxu3 %vm703_vm2, %v931_v63 }
 0x246   : > { %3594 = vmatpush.msk.msra.mxu3 %vm710_vm1, %v1210_v62 }
 0x24c   : > { %v934_v2 = vpop.f32.mrf.mxu2 }
 0x24d   : > { %3576 = vmatmul.msk.f32.gmra.mxu3 %vm703_vm2, %v934_v2 }
 0x254   : > { %v1067_v5 = vpop.f32.mrf.mxu2 }
 0x255   : > { %3585 = vmatmul.msk.f32.vlgmr.msrb.gmra.mxu3 %vm703_vm2, %v1067_v5 }
 0x256   : > { %3604 = vmatpush.msk.msrb.mxu3 %vm710_vm1, %v1346_v4 }
 0x25c   : > { %v1070_v8 = vpop.f32.mrf.mxu2 }
 0x25d   : > { %3586 = vmatmul.msk.f32.gmra.mxu3 %vm703_vm2, %v1070_v8 }
 0x264   : > { %v1203_v11 = vpop.f32.mrf.mxu2 }
 0x265   : > { %3595 = vmatmul.msk.f32.vlgmr.msra.gmra.mxu3 %vm703_vm2, %v1203_v11 }
 0x266   : > { %3614 = vmatpush.msk.msra.mxu3 %vm710_vm1, %v1482_v10 }
 0x26c   : > { %v1206_v14 = vpop.f32.mrf.mxu2 }
 0x26d   : > { %3596 = vmatmul.msk.f32.gmra.mxu3 %vm703_vm2, %v1206_v14 }
 0x274   : > { %v1339_v17 = vpop.f32.mrf.mxu2  ;;  %v1305_v40 = vpop.f32.mrf.mxu1 }
 0x275   : > { %3605 = vmatmul.msk.f32.vlgmr.msrb.gmra.mxu3 %vm703_vm2, %v1339_v17 }
 0x276   : > { %3624 = vmatpush.msk.msrb.mxu3 %vm710_vm1, %v1618_v16 }
 0x27c   : > { %v1342_v20 = vpop.f32.mrf.mxu2  ;;  %v1308_v42 = vpop.f32.mrf.mxu1 }
 0x27d   : > { %3606 = vmatmul.msk.f32.gmra.mxu3 %vm703_vm2, %v1342_v20 }
 0x284   : > { %v1475_v22 = vpop.f32.mrf.mxu2  ;;  %v1441_v44 = vpop.f32.mrf.mxu1 }
 0x285   : > { %3615 = vmatmul.msk.f32.vlgmr.msra.gmra.mxu3 %vm703_vm2, %v1475_v22 }
 0x28c   : > { %v1478_v24 = vpop.f32.mrf.mxu2  ;;  %v1444_v48 = vpop.f32.mrf.mxu1 }
 0x28d   : > { %3616 = vmatmul.msk.f32.gmra.mxu3 %vm703_vm2, %v1478_v24 }
 0x294   : > { %v1611_v25 = vpop.f32.mrf.mxu2  ;;  %v1577_v59 = vpop.f32.mrf.mxu1 }
 0x295   : > { %3625 = vmatmul.msk.f32.vlgmr.msrb.gmra.mxu3 %vm703_vm2, %v1611_v25 }
 0x29c   : > { %v1614_v27 = vpop.f32.mrf.mxu2  ;;  %v1580_v49 = vpop.f32.mrf.mxu1 }
 0x29d   : > { %3626 = vmatmul.msk.f32.gmra.mxu3 %vm703_vm2, %v1614_v27 }
 0x2a4   : > { %v1713_v11 = vpop.f32.mrf.mxu1 }
 0x2a8   : > { %v829_v29 = vpop.f32.mrf.mxu3 }
 0x2a9   : > { %v835_v50 = vadd.f32 %v829_v29, %v764_v46  ;;  %v1761_v29 = vld [vmem:[#allocation7 + $0x4] sm:$0xf]  ;;  %v1887_v46 = vld [vmem:[#allocation7 + $0xc] sm:$0xf] }
 0x2ac   : > { %v1716_v21 = vpop.f32.mrf.mxu1 }
 0x2b0   : > { %v832_v30 = vpop.f32.mrf.mxu3 }
 0x2b1   : > { %v836_v55 = vadd.f32 %v832_v30, %v767_v53  ;;  %v2199_v53 = vld [vmem:[#allocation7 + $0x24] sm:$0xf] }
 0x2b8   : > { %v897_v32 = vpop.f32.mrf.mxu3 }
 0x2b9   : > { %v903_v52 = vadd.f32 %v897_v32, %v835_v50  ;;  %v1835_v32 = vld [vmem:[#allocation7 + $0x8] sm:$0xf]  ;;  %v2095_v50 = vld [vmem:[#allocation7 + $0x1c] sm:$0xf] }
 0x2c0   : > { %v900_v34 = vpop.f32.mrf.mxu3 }
 0x2c1   : > { %v904_v57 = vadd.f32 %v900_v34, %v836_v55  ;;  %v1786_v34 = vld [vmem:[#allocation8 + $0x10] sm:$0xff] }
 0x2c2   : > { %v2407_v55 = vld [vmem:[#allocation7 + $0x34] sm:$0xf] }
 0x2c8   : > { %v965_v36 = vpop.f32.mrf.mxu3 }
 0x2c9   : > { %v971_v54 = vadd.f32 %v965_v36, %v903_v52  ;;  %v2043_v36 = vld [vmem:[#allocation7 + $0x18] sm:$0xf] }
 0x2ca   : > { %v2459_v52 = vld [vmem:[#allocation7 + $0x38] sm:$0xf] }
 0x2cb   : > { %v1039_v58 = vadd.f32 %v1033_v31, %v971_v54  ;;  %v1787_v31 = vld [vmem:[#allocation8 + $0x18] sm:$0xff]  ;;  %v2303_v54 = vld [vmem:[#allocation7 + $0x2c] sm:$0xf] }
 0x2d0   : > { %v968_v37 = vpop.f32.mrf.mxu3 }
 0x2d1   : > { %v972_v60 = vadd.f32 %v968_v37, %v904_v57  ;;  %v2147_v37 = vld [vmem:[#allocation7 + $0x20] sm:$0xf]  ;;  %v1913_v57 = vld [vmem:[#allocation8 + $0x38] sm:$0xff] }
 0x2d3   : > { %v1040_v62 = vadd.f32 %v1036_v33, %v972_v60  ;;  %v1733_v33 = vld [vmem:[#allocation7] sm:$0xf]  ;;  %v2017_v60 = vld [vmem:[#allocation8 + $0x58] sm:$0xff] }
 0x2d8   : > { %v1101_v39 = vpop.f32.mrf.mxu3 }
 0x2d9   : > { %v1107_v61 = vadd.f32 %v1101_v39, %v1039_v58  ;;  %v1759_v39 = vld [vmem:[#allocation8 + $0x8] sm:$0xff]  ;;  %v1912_v58 = vld [vmem:[#allocation8 + $0x30] sm:$0xff] }
 0x2db   : > { %v1175_v63 = vadd.f32 %v1169_v35, %v1107_v61  ;;  %v1939_v35 = vld [vmem:[#allocation7 + $0x10] sm:$0xf] }
 0x2e0   : > { %v1104_v41 = vpop.f32.mrf.mxu3 }
 0x2e1   : > { %v1108_v1 = vadd.f32 %v1104_v41, %v1040_v62  ;;  %v1861_v41 = vld [vmem:[#allocation8 + $0x28] sm:$0xff]  ;;  %v1964_v62 = vld [vmem:[#allocation8 + $0x40] sm:$0xff] }
 0x2e2   : > { %1879 = vmatpush.msrb.mxu1 %v1861_v41 }
 0x2e3   : > { %v1176_v3 = vadd.f32 %v1172_v38, %v1108_v1  ;;  %v2251_v38 = vld [vmem:[#allocation7 + $0x28] sm:$0xf] }
 0x2e8   : > { %v1237_v43 = vpop.f32.mrf.mxu3 }
 0x2e9   : > { %v1243_v2 = vadd.f32 %v1237_v43, %v1175_v63  ;;  %v2016_v63 = vld [vmem:[#allocation8 + $0x50] sm:$0xff] }
 0x2eb   : > { %v1311_v4 = vadd.f32 %v1305_v40, %v1243_v2  ;;  %v1758_v40 = vld [vmem:[#allocation8] sm:$0xff] }
 0x2ec   : > { %v2068_v2 = vld [vmem:[#allocation8 + $0x60] sm:$0xff] }
 0x2f0   : > { %v1240_v45 = vpop.f32.mrf.mxu3 }
 0x2f1   : > { %v1244_v5 = vadd.f32 %v1240_v45, %v1176_v3 }
 0x2f3   : > { %v1312_v51 = vadd.f32 %v1308_v42, %v1244_v5  ;;  %v1860_v42 = vld [vmem:[#allocation8 + $0x20] sm:$0xff] }
 0x2f4   : > { %1880 = vmatpush.msrb.mxu1 %v1860_v42 }
 0x2f8   : > { %v1373_v47 = vpop.f32.mrf.mxu3 }
 0x2f9   : > { %v1379_v6 = vadd.f32 %v1373_v47, %v1311_v4  ;;  %v1991_v47 = vld [vmem:[#allocation7 + $0x14] sm:$0xf]  ;;  %v2172_v4 = vld [vmem:[#allocation8 + $0x80] sm:$0xff] }
 0x2fb   : > { %v1447_v8 = vadd.f32 %v1441_v44, %v1379_v6  ;;  %v2277_v6 = vld [vmem:[#allocation8 + $0xa8] sm:$0xff] }
 0x300   : > { %v1376_v56 = vpop.f32.mrf.mxu3 }
 0x301   : > { %v1380_v9 = vadd.f32 %v1376_v56, %v1312_v51  ;;  %v2511_v56 = vld [vmem:[#allocation7 + $0x3c] sm:$0xf]  ;;  %v2276_v51 = vld [vmem:[#allocation8 + $0xa0] sm:$0xff] }
 0x303   : > { %v1448_v13 = vadd.f32 %v1444_v48, %v1380_v9  ;;  %v2355_v48 = vld [vmem:[#allocation7 + $0x30] sm:$0xf] }
 0x308   : > { %v1509_v0 = vpop.f32.mrf.mxu3 }
 0x309   : > { %v1515_v10 = vadd.f32 %v1509_v0, %v1447_v8  ;;  %v2069_v0 = vld [vmem:[#allocation8 + $0x68] sm:$0xff]  ;;  %v2121_v8 = vld [vmem:[#allocation8 + $0x78] sm:$0xff] }
 0x30b   : > { %v1583_v14 = vadd.f32 %v1577_v59, %v1515_v10  ;;  %v1965_v59 = vld [vmem:[#allocation8 + $0x48] sm:$0xff]  ;;  %v2120_v10 = vld [vmem:[#allocation8 + $0x70] sm:$0xff] }
 0x30c   : > { %1983 = vmatpush.msra.mxu1 %v1965_v59 }
 0x30e   : > { %1984 = vmatpush.msra.mxu1 %v1964_v62 }
 0x310   : > { %v1512_v7 = vpop.f32.mrf.mxu3 }
 0x311   : > { %v1516_v15 = vadd.f32 %v1512_v7, %v1448_v13 }
 0x313   : > { %v1584_v17 = vadd.f32 %v1580_v49, %v1516_v15  ;;  %v2173_v49 = vld [vmem:[#allocation8 + $0x88] sm:$0xff] }
 0x318   : > { %v1645_v12 = vpop.f32.mrf.mxu3 }
 0x319   : > { %v1651_v16 = vadd.f32 %v1645_v12, %v1583_v14  ;;  %v2380_v12 = vld [vmem:[#allocation8 + $0xc0] sm:$0xff]  ;;  %v2225_v14 = vld [vmem:[#allocation8 + $0x98] sm:$0xff] }
 0x31b   : > { %v1719_v18 = vadd.f32 %v1713_v11, %v1651_v16  ;;  %v2381_v11 = vld [vmem:[#allocation8 + $0xc8] sm:$0xff]  ;;  %v2224_v16 = vld [vmem:[#allocation8 + $0x90] sm:$0xff] }
 0x31d   : > { %v1725_v23 = vadd.f32 %v3843_v19, %v1719_v18  ;;  %v2484_v18 = vld [vmem:[#allocation8 + $0xe0] sm:$0xff] }
 0x31f   : > { %v1729_v26 = vmul.f32 0.2, %v1725_v23  ;;  %vm1727_vm4 = vcmp.ge.f32.partialorder %v1725_v23, 0.0 }
 0x320   : > { %v1648_v20 = vpop.f32.mrf.mxu3 }
 0x321   : > { %v1652_v22 = vadd.f32 %v1648_v20, %v1584_v17  ;;  %v4450_v30 = vsel %vm1727_vm4, %v1725_v23, %v1729_v26  ;;  %v2485_v17 = vld [vmem:[#allocation8 + $0xe8] sm:$0xff]  ;;  %v2329_v20 = vld [vmem:[#allocation8 + $0xb8] sm:$0xff] }
 0x322   : > { %v2433_v23 = vld [vmem:[#allocation8 + $0xd8] sm:$0xff] }
 0x323   : > { %v1720_v24 = vadd.f32 %v1716_v21, %v1652_v22  ;;  %v2328_v22 = vld [vmem:[#allocation8 + $0xb0] sm:$0xff]  ;;  %v2537_v26 = vld [vmem:[#allocation8 + $0xf8] sm:$0xff] }
 0x325   : > { %v1726_v25 = vadd.f32 %v3843_v19, %v1720_v24 }
 0x327   : > { %vm1728_vm3 = vcmp.ge.f32.partialorder %v1726_v25, 0.0  ;;  %v1730_v27 = vmul.f32 0.2, %v1726_v25 }
 0x329   : > { %v4446_v28 = vsel %vm1728_vm3, %v1726_v25, %v1730_v27  ;;  %v2432_v25 = vld [vmem:[#allocation8 + $0xd0] sm:$0xff] }
 0x32a   : > { %1752 = vmatpush.msra.mxu2 %v4446_v28  ;;  %1779 = vmatpush.msra.mxu3 %v4446_v28 }
 0x32b   : > { %1853 = vmatpush.msrb.mxu0 %v4446_v28 }
 0x32c   : > { %1753 = vmatpush.msra.mxu2 %v4450_v30  ;;  %1780 = vmatpush.msra.mxu3 %v4450_v30 }
 0x32d   : > { %1854 = vmatpush.msrb.mxu0 %v4450_v30  ;;  %3633 = vmatmul.msk.f32.vlgmr.msra.gmra.mxu3 %vm1734_vm5, %v1761_v29 }
 0x32e   : > { %1805 = vmatpush.msrb.mxu2 %v1787_v31  ;;  %3636 = vmatmul.msk.f32.vlgmr.msrb.gmra.mxu0 %vm1734_vm5, %v1835_v32 }
 0x32f   : > { %1957 = vmatpush.msra.mxu0 %v4446_v28  ;;  %3632 = vmatmul.msk.f32.vlgmr.msra.gmra.mxu2 %vm1734_vm5, %v1733_v33 }
 0x330   : > { %1806 = vmatpush.msrb.mxu2 %v1786_v34  ;;  %1828 = vmatpush.msrb.mxu3 %v1759_v39 }
 0x331   : > { %1958 = vmatpush.msra.mxu0 %v4450_v30 }
 0x332   : > { %1905 = vmatpush.msra.mxu2 %v4446_v28  ;;  %1829 = vmatpush.msrb.mxu3 %v1758_v40 }
 0x333   : > { %2061 = vmatpush.msrb.mxu0 %v4446_v28 }
 0x334   : > { %1906 = vmatpush.msra.mxu2 %v4450_v30  ;;  %1931 = vmatpush.msra.mxu3 %v1913_v57 }
 0x335   : > { %2062 = vmatpush.msrb.mxu0 %v4450_v30 }
 0x336   : > { %3640 = vmatmul.msk.f32.vlgmr.msra.gmra.mxu0 %vm1734_vm5, %v1939_v35  ;;  %1932 = vmatpush.msra.mxu3 %v1912_v58 }
 0x337   : > { %2165 = vmatpush.msra.mxu0 %v4446_v28 }
 0x339   : > { %2166 = vmatpush.msra.mxu0 %v4450_v30 }
 0x33e   : > { %3644 = vmatmul.msk.f32.vlgmr.msrb.gmra.mxu0 %vm1734_vm5, %v2043_v36 }
 0x33f   : > { %2269 = vmatpush.msrb.mxu0 %v4446_v28 }
 0x341   : > { %2270 = vmatpush.msrb.mxu0 %v4450_v30 }
 0x346   : > { %3648 = vmatmul.msk.f32.vlgmr.msra.gmra.mxu0 %vm1734_vm5, %v2147_v37 }
 0x347   : > { %2373 = vmatpush.msra.mxu0 %v4446_v28 }
 0x349   : > { %2374 = vmatpush.msra.mxu0 %v4450_v30 }
 0x34e   : > { %3652 = vmatmul.msk.f32.vlgmr.msrb.gmra.mxu0 %vm1734_vm5, %v2251_v38 }
 0x34f   : > { %2477 = vmatpush.msrb.mxu0 %v4446_v28 }
 0x351   : > { %2478 = vmatpush.msrb.mxu0 %v4450_v30 }
 0x356   : > { %3656 = vmatmul.msk.f32.vlgmr.msra.gmra.mxu0 %vm1734_vm5, %v2355_v48  ;;  %v3669_v48 = vld [vmem:[%s4848_s9 + $0x20] sm:$0xff] }
 0x35e   : > { %3660 = vmatmul.msk.f32.vlgmr.msrb.gmra.mxu0 %vm1734_vm5, %v2459_v52 }
 0x3ab   : > { %v1856_v43 = vpop.f32.mrf.mxu0 }
 0x3ac   : > { %3637 = vmatmul.msk.f32.vlgmr.msrb.gmra.mxu1 %vm1734_vm5, %v1856_v43  ;;  %v3672_v43 = vld [vmem:[%s4848_s9 + $0x38] sm:$0xff] }
 0x3ad   : > { %2087 = vmatpush.msrb.mxu1 %v2069_v0 }
 0x3af   : > { %2088 = vmatpush.msrb.mxu1 %v2068_v2 }
 0x3b0   : > { %v1782_v44 = vpop.f32.mrf.mxu3 }
 0x3b1   : > { %3634 = vmatmul.msk.f32.vlgmr.msrb.gmra.mxu2 %vm1734_vm5, %v1782_v44 }
 0x3b2   : > { %2009 = vmatpush.msrb.mxu2 %v4446_v28  ;;  %v1755_v45 = vpop.f32.mrf.mxu2 }
 0x3b3   : > { %3635 = vmatmul.msk.f32.vlgmr.msrb.gmra.mxu3 %vm1734_vm5, %v1755_v45  ;;  %v1960_v61 = vpop.f32.mrf.mxu0  ;;  %v3671_v45 = vld [vmem:[%s4848_s9 + $0x30] sm:$0xff] }
 0x3b4   : > { %2010 = vmatpush.msrb.mxu2 %v4450_v30  ;;  %2035 = vmatpush.msrb.mxu3 %v2017_v60 }
 0x3b5   : > { %3641 = vmatmul.msk.f32.vlgmr.msra.gmra.mxu1 %vm1734_vm5, %v1960_v61 }
 0x3b6   : > { %2036 = vmatpush.msrb.mxu3 %v2016_v63  ;;  %2191 = vmatpush.msra.mxu1 %v2173_v49 }
 0x3b8   : > { %2192 = vmatpush.msra.mxu1 %v2172_v4 }
 0x3b9   : > { %3638 = vmatmul.msk.f32.vlgmr.msra.gmra.mxu2 %vm1734_vm5, %v1887_v46  ;;  %v3670_v46 = vld [vmem:[%s4848_s9 + $0x28] sm:$0xff] }
 0x3ba   : > { %2113 = vmatpush.msra.mxu2 %v4446_v28 }
 0x3bb   : > { %v2064_v1 = vpop.f32.mrf.mxu0 }
 0x3bc   : > { %2114 = vmatpush.msra.mxu2 %v4450_v30 }
 0x3bd   : > { %3645 = vmatmul.msk.f32.vlgmr.msrb.gmra.mxu1 %vm1734_vm5, %v2064_v1  ;;  %v3844_v1 = vld [vmem:[%s4846_s7] ss:$0 sm:$0xff] }
 0x3be   : > { %2295 = vmatpush.msrb.mxu1 %v2277_v6 }
 0x3c0   : > { %2296 = vmatpush.msrb.mxu1 %v2276_v51  ;;  %v3675_v51 = vld [vmem:[%s4847_s8 + $0x2] sm:$0x1] }
 0x3c1   : > { %3642 = vmatmul.msk.f32.vlgmr.msrb.gmra.mxu2 %vm1734_vm5, %v1991_v47 }
 0x3c2   : > { %2217 = vmatpush.msrb.mxu2 %v4446_v28 }
 0x3c3   : > { %v2168_v3 = vpop.f32.mrf.mxu0 }
 0x3c4   : > { %2218 = vmatpush.msrb.mxu2 %v4450_v30 }
 0x3c5   : > { %3649 = vmatmul.msk.f32.vlgmr.msra.gmra.mxu1 %vm1734_vm5, %v2168_v3 }
 0x3c6   : > { %2399 = vmatpush.msra.mxu1 %v2381_v11  ;;  %v3739_v11 = vld [vmem:[%s4847_s8 + $0xa] sm:$0x1] }
 0x3c8   : > { %2400 = vmatpush.msra.mxu1 %v2380_v12  ;;  %v2600_v12 = vld [vmem:[%s4848_s9 + $0x18] sm:$0xff] }
 0x3c9   : > { %3646 = vmatmul.msk.f32.vlgmr.msra.gmra.mxu2 %vm1734_vm5, %v2095_v50 }
 0x3ca   : > { %2321 = vmatpush.msra.mxu2 %v4446_v28 }
 0x3cb   : > { %v2272_v7 = vpop.f32.mrf.mxu0 }
 0x3cc   : > { %2322 = vmatpush.msra.mxu2 %v4450_v30 }
 0x3cd   : > { %3653 = vmatmul.msk.f32.vlgmr.msrb.gmra.mxu1 %vm1734_vm5, %v2272_v7  ;;  %v3666_v7 = vld [vmem:[%s4847_s8 + $0x1] sm:$0x1] }
 0x3ce   : > { %2503 = vmatpush.msrb.mxu1 %v2485_v17  ;;  %v3680_v17 = vld [vmem:[%s4848_s9 + $0x50] sm:$0xff] }
 0x3d0   : > { %2504 = vmatpush.msrb.mxu1 %v2484_v18  ;;  %v3679_v18 = vld [vmem:[%s4848_s9 + $0x48] sm:$0xff] }
 0x3d1   : > { %3650 = vmatmul.msk.f32.vlgmr.msrb.gmra.mxu2 %vm1734_vm5, %v2199_v53 }
 0x3d2   : > { %2425 = vmatpush.msrb.mxu2 %v4446_v28 }
 0x3d3   : > { %v2376_v13 = vpop.f32.mrf.mxu0 }
 0x3d4   : > { %2426 = vmatpush.msrb.mxu2 %v4450_v30 }
 0x3d5   : > { %3657 = vmatmul.msk.f32.vlgmr.msra.gmra.mxu1 %vm1734_vm5, %v2376_v13  ;;  %v2599_v13 = vld [vmem:[%s4848_s9 + $0x10] sm:$0xff] }
 0x3d9   : > { %3654 = vmatmul.msk.f32.vlgmr.msra.gmra.mxu2 %vm1734_vm5, %v2303_v54 }
 0x3da   : > { %2529 = vmatpush.msra.mxu2 %v4446_v28  ;;  %v2536_v28 = vld [vmem:[#allocation8 + $0xf0] sm:$0xff] }
 0x3db   : > { %v2480_v19 = vpop.f32.mrf.mxu0 }
 0x3dc   : > { %2530 = vmatpush.msra.mxu2 %v4450_v30 }
 0x3dd   : > { %3661 = vmatmul.msk.f32.vlgmr.msrb.gmra.mxu1 %vm1734_vm5, %v2480_v19  ;;  %v3678_v19 = vld [vmem:[%s4848_s9 + $0x40] sm:$0xff] }
 0x3e1   : > { %3658 = vmatmul.msk.f32.vlgmr.msrb.gmra.mxu2 %vm1734_vm5, %v2407_v55 }
 0x3e2   : > { %2647 = vmatpush.msrb.mxu2 %v3672_v43  ;;  %v3694_v43 = vld [vmem:[%s4848_s9 + $0x80] sm:$0xff] }
 0x3e4   : > { %2648 = vmatpush.msrb.mxu2 %v3671_v45  ;;  %v3713_v45 = vld [vmem:[%s4848_s9 + $0xd8] sm:$0xff] }
 0x3e6   : > { %2649 = vmatpush.msrb.mxu2 %v3670_v46  ;;  %v3712_v46 = vld [vmem:[%s4848_s9 + $0xd0] sm:$0xff] }
 0x3e8   : > { %2650 = vmatpush.msrb.mxu2 %v3669_v48  ;;  %v3711_v48 = vld [vmem:[%s4848_s9 + $0xc8] sm:$0xff] }
 0x3e9   : > { %3662 = vmatmul.msk.f32.vlgmr.msra.gmra.mxu2 %vm1734_vm5, %v2511_v56 }
 0x429   : > { %v1882_v31 = vpop.f32.mrf.mxu1 }
 0x432   : > { %v1986_v33 = vpop.f32.mrf.mxu1 }
 0x434   : > { %v1808_v5 = vpop.f32.mrf.mxu2 }
 0x436   : > { %v1831_v32 = vpop.f32.mrf.mxu3 }
 0x437   : > { %v1832_v36 = vadd.f32 %v1831_v32, %v1808_v5  ;;  %v2570_v5 = vld [vmem:[%s4847_s8] sm:$0x1]  ;;  %v3689_v32 = vld [vmem:[%s4848_s9 + $0x78] sm:$0xff] }
 0x439   : > { %v1885_v38 = vadd.f32 %v1882_v31, %v1832_v36  ;;  %v3779_v31 = vld [vmem:[%s4847_s8 + $0xf] sm:$0x1]  ;;  %v3697_v36 = vld [vmem:[%s4848_s9 + $0x98] sm:$0xff] }
 0x43a   : > { %v2090_v35 = vpop.f32.mrf.mxu1 }
 0x43c   : > { %v1908_v9 = vpop.f32.mrf.mxu2 }
 0x43d   : > { %3639 = vmatmul.msk.f32.vlgmr.msra.gmra.mxu3 %vm1734_vm5, %v1908_v9  ;;  %v3707_v9 = vld [vmem:[%s4847_s8 + $0x6] sm:$0x1] }
 0x43e   : > { %2139 = vmatpush.msra.mxu3 %v2121_v8  ;;  %v3691_v8 = vld [vmem:[%s4847_s8 + $0x4] sm:$0x1] }
 0x440   : > { %2140 = vmatpush.msra.mxu3 %v2120_v10  ;;  %v3723_v10 = vld [vmem:[%s4847_s8 + $0x8] sm:$0x1] }
 0x442   : > { %v2194_v40 = vpop.f32.mrf.mxu1 }
 0x444   : > { %v2012_v15 = vpop.f32.mrf.mxu2 }
 0x445   : > { %3643 = vmatmul.msk.f32.vlgmr.msrb.gmra.mxu3 %vm1734_vm5, %v2012_v15  ;;  %v2597_v15 = vld [vmem:[%s4848_s9] sm:$0xff] }
 0x446   : > { %2243 = vmatpush.msrb.mxu3 %v2225_v14  ;;  %v2598_v14 = vld [vmem:[%s4848_s9 + $0x8] sm:$0xff] }
 0x448   : > { %2244 = vmatpush.msrb.mxu3 %v2224_v16  ;;  %v3681_v16 = vld [vmem:[%s4848_s9 + $0x58] sm:$0xff] }
 0x44a   : > { %v2298_v52 = vpop.f32.mrf.mxu1 }
 0x44c   : > { %v2116_v21 = vpop.f32.mrf.mxu2 }
 0x44d   : > { %3647 = vmatmul.msk.f32.vlgmr.msra.gmra.mxu3 %vm1734_vm5, %v2116_v21 }
 0x44e   : > { %2347 = vmatpush.msra.mxu3 %v2329_v20 }
 0x450   : > { %2348 = vmatpush.msra.mxu3 %v2328_v22  ;;  %v3683_v22 = vld [vmem:[%s4847_s8 + $0x3] sm:$0x1] }
 0x452   : > { %v2402_v57 = vpop.f32.mrf.mxu1 }
 0x454   : > { %v2220_v24 = vpop.f32.mrf.mxu2 }
 0x455   : > { %3651 = vmatmul.msk.f32.vlgmr.msrb.gmra.mxu3 %vm1734_vm5, %v2220_v24  ;;  %v3699_v24 = vld [vmem:[%s4847_s8 + $0x5] sm:$0x1] }
 0x456   : > { %2451 = vmatpush.msrb.mxu3 %v2433_v23 }
 0x458   : > { %2452 = vmatpush.msrb.mxu3 %v2432_v25  ;;  %v3755_v25 = vld [vmem:[%s4847_s8 + $0xc] sm:$0x1] }
 0x45a   : > { %v2506_v63 = vpop.f32.mrf.mxu1 }
 0x45c   : > { %v2324_v27 = vpop.f32.mrf.mxu2 }
 0x45d   : > { %3655 = vmatmul.msk.f32.vlgmr.msra.gmra.mxu3 %vm1734_vm5, %v2324_v27  ;;  %v3771_v27 = vld [vmem:[%s4847_s8 + $0xe] sm:$0x1] }
 0x45e   : > { %2555 = vmatpush.msra.mxu3 %v2537_v26  ;;  %v3715_v26 = vld [vmem:[%s4847_s8 + $0x7] sm:$0x1] }
 0x460   : > { %2556 = vmatpush.msra.mxu3 %v2536_v28  ;;  %v3731_v28 = vld [vmem:[%s4847_s8 + $0x9] sm:$0x1] }
 0x464   : > { %v2428_v29 = vpop.f32.mrf.mxu2 }
 0x465   : > { %3659 = vmatmul.msk.f32.vlgmr.msrb.gmra.mxu3 %vm1734_vm5, %v2428_v29  ;;  %v3747_v29 = vld [vmem:[%s4847_s8 + $0xb] sm:$0x1] }
 0x466   : > { %2670 = vmatpush.msrb.mxu3 %v2600_v12  ;;  %v3735_v12 = vld [vmem:[%s4848_s9 + $0x128] sm:$0xff] }
 0x468   : > { %2671 = vmatpush.msrb.mxu3 %v2599_v13  ;;  %v3775_v13 = vld [vmem:[%s4848_s9 + $0x1c8] sm:$0xff] }
 0x46a   : > { %2672 = vmatpush.msrb.mxu3 %v2598_v14  ;;  %v3734_v14 = vld [vmem:[%s4848_s9 + $0x120] sm:$0xff] }
 0x46c   : > { %v2532_v30 = vpop.f32.mrf.mxu2  ;;  %2673 = vmatpush.msrb.mxu3 %v2597_v15  ;;  %v3774_v15 = vld [vmem:[%s4848_s9 + $0x1c0] sm:$0xff] }
 0x46d   : > { %3663 = vmatmul.msk.f32.vlgmr.msra.gmra.mxu3 %vm1734_vm5, %v2532_v30  ;;  %v3763_v30 = vld [vmem:[%s4847_s8 + $0xd] sm:$0x1] }
 0x46e   : > { %2777 = vmatpush.msra.mxu3 %v3689_v32 }
 0x4c0   : > { %v1934_v34 = vpop.f32.mrf.mxu3 }
 0x4c1   : > { %v1937_v39 = vadd.f32 %v1934_v34, %v1885_v38  ;;  %v3687_v34 = vld [vmem:[%s4848_s9 + $0x68] sm:$0xff]  ;;  %v3696_v38 = vld [vmem:[%s4848_s9 + $0x90] sm:$0xff] }
 0x4c3   : > { %v1989_v42 = vadd.f32 %v1986_v33, %v1937_v39  ;;  %v3688_v33 = vld [vmem:[%s4848_s9 + $0x70] sm:$0xff] }
 0x4c4   : > { %2778 = vmatpush.msra.mxu3 %v3688_v33 }
 0x4c6   : > { %2779 = vmatpush.msra.mxu3 %v3687_v34 }
 0x4c8   : > { %v2038_v37 = vpop.f32.mrf.mxu3 }
 0x4c9   : > { %v2041_v44 = vadd.f32 %v2038_v37, %v1989_v42  ;;  %v3705_v37 = vld [vmem:[%s4848_s9 + $0xb8] sm:$0xff]  ;;  %v3703_v42 = vld [vmem:[%s4848_s9 + $0xa8] sm:$0xff] }
 0x4cb   : > { %v2093_v47 = vadd.f32 %v2090_v35, %v2041_v44  ;;  %v3686_v35 = vld [vmem:[%s4848_s9 + $0x60] sm:$0xff] }
 0x4cc   : > { %2780 = vmatpush.msra.mxu3 %v3686_v35  ;;  %v3702_v44 = vld [vmem:[%s4848_s9 + $0xa0] sm:$0xff] }
 0x4d0   : > { %v2142_v41 = vpop.f32.mrf.mxu3 }
 0x4d1   : > { %v2145_v53 = vadd.f32 %v2142_v41, %v2093_v47  ;;  %v3695_v41 = vld [vmem:[%s4848_s9 + $0x88] sm:$0xff] }
 0x4d3   : > { %v2197_v54 = vadd.f32 %v2194_v40, %v2145_v53  ;;  %v3704_v40 = vld [vmem:[%s4848_s9 + $0xb0] sm:$0xff] }
 0x4d4   : > { %v3728_v53 = vld [vmem:[%s4848_s9 + $0x110] sm:$0xff] }
 0x4d8   : > { %v2246_v50 = vpop.f32.mrf.mxu3 }
 0x4d9   : > { %v2249_v55 = vadd.f32 %v2246_v50, %v2197_v54  ;;  %v3710_v50 = vld [vmem:[%s4848_s9 + $0xc0] sm:$0xff] }
 0x4db   : > { %v2301_v58 = vadd.f32 %v2298_v52, %v2249_v55  ;;  %v3729_v52 = vld [vmem:[%s4848_s9 + $0x118] sm:$0xff]  ;;  %v3727_v55 = vld [vmem:[%s4848_s9 + $0x108] sm:$0xff] }
 0x4e0   : > { %v2350_v56 = vpop.f32.mrf.mxu3 }
 0x4e1   : > { %v2353_v59 = vadd.f32 %v2350_v56, %v2301_v58  ;;  %v3726_v56 = vld [vmem:[%s4848_s9 + $0x100] sm:$0xff]  ;;  %v3745_v58 = vld [vmem:[%s4848_s9 + $0x158] sm:$0xff] }
 0x4e3   : > { %v2405_v61 = vadd.f32 %v2402_v57, %v2353_v59  ;;  %v3744_v59 = vld [vmem:[%s4848_s9 + $0x150] sm:$0xff] }
 0x4e8   : > { %v2454_v60 = vpop.f32.mrf.mxu3 }
 0x4e9   : > { %v2457_v62 = vadd.f32 %v2454_v60, %v2405_v61  ;;  %v3743_v61 = vld [vmem:[%s4848_s9 + $0x148] sm:$0xff] }
 0x4eb   : > { %v2509_v0 = vadd.f32 %v2506_v63, %v2457_v62  ;;  %v3742_v62 = vld [vmem:[%s4848_s9 + $0x140] sm:$0xff]  ;;  %v3721_v63 = vld [vmem:[%s4848_s9 + $0xf8] sm:$0xff] }
 0x4f0   : > { %v2558_v2 = vpop.f32.mrf.mxu3 }
 0x4f1   : > { %v2561_v49 = vadd.f32 %v2558_v2, %v2509_v0  ;;  %v3761_v2 = vld [vmem:[%s4848_s9 + $0x198] sm:$0xff] }
 0x4f3   : > { %v2566_v3 = vadd.f32 %v3844_v1, %v2561_v49  ;;  %v3720_v1 = vld [vmem:[%s4848_s9 + $0xf0] sm:$0xff] }
 0x4f4   : > { %v3760_v49 = vld [vmem:[%s4848_s9 + $0x190] sm:$0xff] }
 0x4f5   : > { %vm2567_vm6 = vcmp.ge.f32.partialorder %v2566_v3, 0.0  ;;  %v2568_v4 = vmul.f32 0.2, %v2566_v3 }
 0x4f7   : > { %v4532_v6 = vsel %vm2567_vm6, %v2566_v3, %v2568_v4  ;;  %v3719_v3 = vld [vmem:[%s4848_s9 + $0xe8] sm:$0xff] }
 0x4f8   : > { %3664 = vmatpush.msk.msra.mxu0 %vm710_vm1, %v4532_v6  ;;  %3667 = vmatpush.msk.msra.mxu1 %vm710_vm1, %v4532_v6  ;;  %v3759_v4 = vld [vmem:[%s4848_s9 + $0x188] sm:$0xff] }
 0x4f9   : > { %3684 = vmatpush.msk.msra.mxu2 %vm710_vm1, %v4532_v6  ;;  %3665 = vmatmul.msk.f32.vlgmr.msra.gmra.mxu0 %vm703_vm2, %v2570_v5 }
 0x4fa   : > { %3668 = vmatmul.msk.f32.vlgmr.msra.gmra.mxu1 %vm703_vm2, %v3666_v7  ;;  %3676 = vmatpush.msk.msrb.mxu0 %vm710_vm1, %v4532_v6  ;;  %v3758_v7 = vld [vmem:[%s4848_s9 + $0x180] sm:$0xff] }
 0x4fb   : > { %2723 = vmatpush.msrb.mxu1 %v3681_v16 }
 0x4fc   : > { %3692 = vmatpush.msk.msra.mxu0 %vm710_vm1, %v4532_v6 }
 0x4fd   : > { %2724 = vmatpush.msrb.mxu1 %v3680_v17  ;;  %v3753_v17 = vld [vmem:[%s4848_s9 + $0x178] sm:$0xff] }
 0x4ff   : > { %2725 = vmatpush.msrb.mxu1 %v3679_v18 }
 0x501   : > { %3677 = vmatmul.msk.f32.vlgmr.msrb.gmra.mxu0 %vm703_vm2, %v3675_v51  ;;  %2726 = vmatpush.msrb.mxu1 %v3678_v19  ;;  %v3737_v51 = vld [vmem:[%s4848_s9 + $0x138] sm:$0xff]  ;;  %v3752_v19 = vld [vmem:[%s4848_s9 + $0x170] sm:$0xff] }
 0x502   : > { %3708 = vmatpush.msk.msrb.mxu0 %vm710_vm1, %v4532_v6 }
 0x503   : > { %2831 = vmatpush.msra.mxu1 %v3697_v36 }
 0x505   : > { %2832 = vmatpush.msra.mxu1 %v3696_v38 }
 0x507   : > { %2833 = vmatpush.msra.mxu1 %v3695_v41 }
 0x509   : > { %3693 = vmatmul.msk.f32.vlgmr.msra.gmra.mxu0 %vm703_vm2, %v3691_v8  ;;  %2834 = vmatpush.msra.mxu1 %v3694_v43 }
 0x50a   : > { %3724 = vmatpush.msk.msra.mxu0 %vm710_vm1, %v4532_v6 }
 0x511   : > { %3709 = vmatmul.msk.f32.vlgmr.msrb.gmra.mxu0 %vm703_vm2, %v3707_v9  ;;  %v3736_v9 = vld [vmem:[%s4848_s9 + $0x130] sm:$0xff] }
 0x512   : > { %3740 = vmatpush.msk.msrb.mxu0 %vm710_vm1, %v4532_v6 }
 0x519   : > { %3725 = vmatmul.msk.f32.vlgmr.msra.gmra.mxu0 %vm703_vm2, %v3723_v10  ;;  %v3777_v10 = vld [vmem:[%s4848_s9 + $0x1d8] sm:$0xff] }
 0x51a   : > { %3756 = vmatpush.msk.msra.mxu0 %vm710_vm1, %v4532_v6 }
 0x521   : > { %3741 = vmatmul.msk.f32.vlgmr.msrb.gmra.mxu0 %vm703_vm2, %v3739_v11  ;;  %v3776_v11 = vld [vmem:[%s4848_s9 + $0x1d0] sm:$0xff] }
 0x522   : > { %3772 = vmatpush.msk.msrb.mxu0 %vm710_vm1, %v4532_v6 }
 0x529   : > { %3757 = vmatmul.msk.f32.vlgmr.msra.gmra.mxu0 %vm703_vm2, %v3755_v25  ;;  %v3767_v25 = vld [vmem:[%s4848_s9 + $0x1a8] sm:$0xff] }
 0x531   : > { %3773 = vmatmul.msk.f32.vlgmr.msrb.gmra.mxu0 %vm703_vm2, %v3771_v27  ;;  %v3785_v27 = vld [vmem:[%s4848_s9 + $0x1f8] sm:$0xff] }
 0x576   : > { %v2594_v20 = vpop.f32.mrf.mxu0 }
 0x577   : > { %v2623_v21 = vpop.f32.mrf.mxu1  ;;  %3674 = vmatmul.msk.f32.vlgmr.msrb.gmra.mxu3 %vm2631_vm7, %v2594_v20  ;;  %v3751_v20 = vld [vmem:[%s4848_s9 + $0x168] sm:$0xff] }
 0x578   : > { %3673 = vmatmul.msk.f32.vlgmr.msrb.gmra.mxu2 %vm2631_vm7, %v2623_v21  ;;  %2885 = vmatpush.msrb.mxu3 %v3705_v37  ;;  %v3750_v21 = vld [vmem:[%s4848_s9 + $0x160] sm:$0xff] }
 0x579   : > { %3700 = vmatpush.msk.msrb.mxu2 %vm710_vm1, %v4532_v6 }
 0x57a   : > { %2886 = vmatpush.msrb.mxu3 %v3704_v40 }
 0x57c   : > { %2887 = vmatpush.msrb.mxu3 %v3703_v42 }
 0x57e   : > { %v2700_v23 = vpop.f32.mrf.mxu0  ;;  %2888 = vmatpush.msrb.mxu3 %v3702_v44 }
 0x57f   : > { %3682 = vmatmul.msk.f32.vlgmr.msrb.gmra.mxu1 %vm2631_vm7, %v2700_v23 }
 0x580   : > { %3685 = vmatmul.msk.f32.vlgmr.msra.gmra.mxu2 %vm703_vm2, %v3683_v22  ;;  %2939 = vmatpush.msrb.mxu1 %v3713_v45  ;;  %v3769_v22 = vld [vmem:[%s4848_s9 + $0x1b8] sm:$0xff] }
 0x581   : > { %3716 = vmatpush.msk.msra.mxu2 %vm710_vm1, %v4532_v6 }
 0x582   : > { %2940 = vmatpush.msrb.mxu1 %v3712_v46 }
 0x584   : > { %2941 = vmatpush.msrb.mxu1 %v3711_v48 }
 0x586   : > { %v2808_v39 = vpop.f32.mrf.mxu0  ;;  %2942 = vmatpush.msrb.mxu1 %v3710_v50 }
 0x587   : > { %3698 = vmatmul.msk.f32.vlgmr.msra.gmra.mxu1 %vm2631_vm7, %v2808_v39 }
 0x588   : > { %3701 = vmatmul.msk.f32.vlgmr.msrb.gmra.mxu2 %vm703_vm2, %v3699_v24  ;;  %3047 = vmatpush.msra.mxu1 %v3729_v52  ;;  %v3768_v24 = vld [vmem:[%s4848_s9 + $0x1b0] sm:$0xff] }
 0x589   : > { %3732 = vmatpush.msk.msrb.mxu2 %vm710_vm1, %v4532_v6 }
 0x58a   : > { %3048 = vmatpush.msra.mxu1 %v3728_v53 }
 0x58c   : > { %3049 = vmatpush.msra.mxu1 %v3727_v55 }
 0x58e   : > { %v2916_v47 = vpop.f32.mrf.mxu0  ;;  %3050 = vmatpush.msra.mxu1 %v3726_v56 }
 0x58f   : > { %3714 = vmatmul.msk.f32.vlgmr.msrb.gmra.mxu1 %vm2631_vm7, %v2916_v47 }
 0x590   : > { %3717 = vmatmul.msk.f32.vlgmr.msra.gmra.mxu2 %vm703_vm2, %v3715_v26  ;;  %3155 = vmatpush.msrb.mxu1 %v3745_v58  ;;  %v3766_v26 = vld [vmem:[%s4848_s9 + $0x1a0] sm:$0xff] }
 0x591   : > { %3748 = vmatpush.msk.msra.mxu2 %vm710_vm1, %v4532_v6 }
 0x592   : > { %3156 = vmatpush.msrb.mxu1 %v3744_v59 }
 0x594   : > { %3157 = vmatpush.msrb.mxu1 %v3743_v61 }
 0x596   : > { %v3024_v54 = vpop.f32.mrf.mxu0  ;;  %3158 = vmatpush.msrb.mxu1 %v3742_v62 }
 0x597   : > { %3730 = vmatmul.msk.f32.vlgmr.msra.gmra.mxu1 %vm2631_vm7, %v3024_v54 }
 0x598   : > { %3733 = vmatmul.msk.f32.vlgmr.msrb.gmra.mxu2 %vm703_vm2, %v3731_v28  ;;  %3263 = vmatpush.msra.mxu1 %v3761_v2 }
 0x599   : > { %3764 = vmatpush.msk.msrb.mxu2 %vm710_vm1, %v4532_v6 }
 0x59a   : > { %3264 = vmatpush.msra.mxu1 %v3760_v49 }
 0x59c   : > { %3265 = vmatpush.msra.mxu1 %v3759_v4  ;;  %v3439_v4 = vld [vmem:[%s4850_s11] sm:$0x1] }
 0x59e   : > { %v3132_v60 = vpop.f32.mrf.mxu0  ;;  %3266 = vmatpush.msra.mxu1 %v3758_v7 }
 0x59f   : > { %3746 = vmatmul.msk.f32.vlgmr.msrb.gmra.mxu1 %vm2631_vm7, %v3132_v60 }
 0x5a0   : > { %3749 = vmatmul.msk.f32.vlgmr.msra.gmra.mxu2 %vm703_vm2, %v3747_v29  ;;  %3371 = vmatpush.msrb.mxu1 %v3777_v10  ;;  %v3784_v29 = vld [vmem:[%s4848_s9 + $0x1f0] sm:$0xff] }
 0x5a1   : > { %3780 = vmatpush.msk.msra.mxu2 %vm710_vm1, %v4532_v6  ;;  %v3718_v6 = vld [vmem:[%s4848_s9 + $0xe0] sm:$0xff] }
 0x5a2   : > { %3372 = vmatpush.msrb.mxu1 %v3776_v11 }
 0x5a4   : > { %3373 = vmatpush.msrb.mxu1 %v3775_v13 }
 0x5a6   : > { %v3240_v5 = vpop.f32.mrf.mxu0  ;;  %3374 = vmatpush.msrb.mxu1 %v3774_v15 }
 0x5a7   : > { %3762 = vmatmul.msk.f32.vlgmr.msra.gmra.mxu1 %vm2631_vm7, %v3240_v5 }
 0x5a8   : > { %3765 = vmatmul.msk.f32.vlgmr.msrb.gmra.mxu2 %vm703_vm2, %v3763_v30  ;;  %v3783_v30 = vld [vmem:[%s4848_s9 + $0x1e8] sm:$0xff] }
 0x5ae   : > { %v3348_v16 = vpop.f32.mrf.mxu0 }
 0x5af   : > { %3778 = vmatmul.msk.f32.vlgmr.msrb.gmra.mxu1 %vm2631_vm7, %v3348_v16 }
 0x5b0   : > { %3781 = vmatmul.msk.f32.vlgmr.msra.gmra.mxu2 %vm703_vm2, %v3779_v31  ;;  %v3782_v31 = vld [vmem:[%s4848_s9 + $0x1e0] sm:$0xff] }
 0x5fa   : > { %v2675_v35 = vpop.f32.mrf.mxu3 }
 0x5fb   : > { %v4716_v57 = vpop.f32.mrf.mxu2 }
 0x5fc   : > { %v2728_v34 = vpop.f32.mrf.mxu1  ;;  %v2676_v39 = vadd.f32 %v2675_v35, %v4716_v57 }
 0x5fe   : > { %v2731_v41 = vadd.f32 %v2728_v34, %v2676_v39 }
 0x603   : > { %v2754_v0 = vpop.f32.mrf.mxu2 }
 0x604   : > { %3690 = vmatmul.msk.f32.vlgmr.msra.gmra.mxu3 %vm2631_vm7, %v2754_v0  ;;  %v2836_v36 = vpop.f32.mrf.mxu1 }
 0x605   : > { %2993 = vmatpush.msra.mxu3 %v3721_v63 }
 0x607   : > { %2994 = vmatpush.msra.mxu3 %v3720_v1  ;;  %v3434_v1 = vld [vmem:[%s4849_s10] sm:$0x1] }
 0x609   : > { %2995 = vmatpush.msra.mxu3 %v3719_v3 }
 0x60b   : > { %v2862_v8 = vpop.f32.mrf.mxu2  ;;  %2996 = vmatpush.msra.mxu3 %v3718_v6 }
 0x60c   : > { %3706 = vmatmul.msk.f32.vlgmr.msrb.gmra.mxu3 %vm2631_vm7, %v2862_v8  ;;  %v2944_v38 = vpop.f32.mrf.mxu1 }
 0x60d   : > { %3101 = vmatpush.msrb.mxu3 %v3737_v51  ;;  %v3445_v51 = vld [vmem:[#allocation2] sm:$0x1] }
 0x60f   : > { %3102 = vmatpush.msrb.mxu3 %v3736_v9 }
 0x611   : > { %3103 = vmatpush.msrb.mxu3 %v3735_v12 }
 0x613   : > { %v2970_v18 = vpop.f32.mrf.mxu2  ;;  %3104 = vmatpush.msrb.mxu3 %v3734_v14 }
 0x614   : > { %3722 = vmatmul.msk.f32.vlgmr.msra.gmra.mxu3 %vm2631_vm7, %v2970_v18  ;;  %v3052_v43 = vpop.f32.mrf.mxu1 }
 0x615   : > { %3209 = vmatpush.msra.mxu3 %v3753_v17 }
 0x617   : > { %3210 = vmatpush.msra.mxu3 %v3752_v19 }
 0x619   : > { %3211 = vmatpush.msra.mxu3 %v3751_v20 }
 0x61b   : > { %v3078_v23 = vpop.f32.mrf.mxu2  ;;  %3212 = vmatpush.msra.mxu3 %v3750_v21 }
 0x61c   : > { %3738 = vmatmul.msk.f32.vlgmr.msrb.gmra.mxu3 %vm2631_vm7, %v3078_v23  ;;  %v3160_v50 = vpop.f32.mrf.mxu1 }
 0x61d   : > { %3317 = vmatpush.msrb.mxu3 %v3769_v22 }
 0x61f   : > { %3318 = vmatpush.msrb.mxu3 %v3768_v24 }
 0x621   : > { %3319 = vmatpush.msrb.mxu3 %v3767_v25 }
 0x623   : > { %v3186_v28 = vpop.f32.mrf.mxu2  ;;  %3320 = vmatpush.msrb.mxu3 %v3766_v26 }
 0x624   : > { %3754 = vmatmul.msk.f32.vlgmr.msra.gmra.mxu3 %vm2631_vm7, %v3186_v28  ;;  %v3268_v56 = vpop.f32.mrf.mxu1 }
 0x625   : > { %3425 = vmatpush.msra.mxu3 %v3785_v27 }
 0x627   : > { %3426 = vmatpush.msra.mxu3 %v3784_v29 }
 0x629   : > { %3427 = vmatpush.msra.mxu3 %v3783_v30 }
 0x62b   : > { %v3294_v32 = vpop.f32.mrf.mxu2  ;;  %3428 = vmatpush.msra.mxu3 %v3782_v31 }
 0x62c   : > { %3770 = vmatmul.msk.f32.vlgmr.msrb.gmra.mxu3 %vm2631_vm7, %v3294_v32  ;;  %v3376_v62 = vpop.f32.mrf.mxu1 }
 0x633   : > { %v3402_v33 = vpop.f32.mrf.mxu2 }
 0x634   : > { %3786 = vmatmul.msk.f32.vlgmr.msra.gmra.mxu3 %vm2631_vm7, %v3402_v33 }
 0x687   : > { %v2782_v37 = vpop.f32.mrf.mxu3 }
 0x688   : > { %v2785_v42 = vadd.f32 %v2782_v37, %v2731_v41 }
 0x68a   : > { %v2839_v45 = vadd.f32 %v2836_v36, %v2785_v42 }
 0x68f   : > { %v2890_v40 = vpop.f32.mrf.mxu3 }
 0x690   : > { %v2893_v46 = vadd.f32 %v2890_v40, %v2839_v45 }
 0x692   : > { %v2947_v47 = vadd.f32 %v2944_v38, %v2893_v46 }
 0x697   : > { %v2998_v44 = vpop.f32.mrf.mxu3 }
 0x698   : > { %v3001_v52 = vadd.f32 %v2998_v44, %v2947_v47 }
 0x69a   : > { %v3055_v53 = vadd.f32 %v3052_v43, %v3001_v52 }
 0x69f   : > { %v3106_v48 = vpop.f32.mrf.mxu3 }
 0x6a0   : > { %v3109_v54 = vadd.f32 %v3106_v48, %v3055_v53 }
 0x6a2   : > { %v3163_v58 = vadd.f32 %v3160_v50, %v3109_v54 }
 0x6a7   : > { %v3214_v55 = vpop.f32.mrf.mxu3 }
 0x6a8   : > { %v3217_v59 = vadd.f32 %v3214_v55, %v3163_v58 }
 0x6aa   : > { %v3271_v61 = vadd.f32 %v3268_v56, %v3217_v59 }
 0x6af   : > { %v3322_v60 = vpop.f32.mrf.mxu3 }
 0x6b0   : > { %v3325_v57 = vadd.f32 %v3322_v60, %v3271_v61 }
 0x6b2   : > { %v3379_v63 = vadd.f32 %v3376_v62, %v3325_v57 }
 0x6b7   : > { %v3430_v0 = vpop.f32.mrf.mxu3 }
 0x6b8   : > { %v3433_v2 = vadd.f32 %v3430_v0, %v3379_v63 }
 0x6ba   : > { %v3435_v49 = vadd.f32 %v3434_v1, %v3433_v2 }
 0x6bc   : > { %v3437_v3 = vmul.f32 0.2, %v3435_v49  ;;  %vm3436_vm8 = vcmp.ge.f32.partialorder %v3435_v49, 0.0 }
 0x6be   : > { %v3438_v5 = vsel %vm3436_vm8, %v3435_v49, %v3437_v3 }
 0x6bf   : > { %v3440_v6 = vmul.f32 %v3439_v4, %v3438_v5 }
 0x6c1   : > { %v3442_v7 = vsel %vm3441_vm9, %v3440_v6, 0.0 }
 0x6c2   : > { %3443 = vadd.xlane.f32.xlu0 %v3442_v7 }
 0x735   : > { %v3444_v8 = vpop.xlane.xlu0 %3443 }
 0x736   : > { %v3446_v9 = vadd.f32 %v3445_v51, %v3444_v8 }
 0x738   : > { %3448 = vst.msk [vmem:[%s505_s25] sm:$0x1] %vm3447_vm10, %v3446_v9 }
 0x739 PF: > { %s28_s27 = sadd.s32 1, %s3983_s27  }
 0x73a   : > { %p25_p7 = scmp.ge.s32.totalorder %s28_s27, 4  }
 0x73c   :  { %27 = sbr.rel (!%p25_p7) target bundleno = 6 (0x6), region = 209 }
 0x741   :  { %3466 = vsyncpa [#allocation4], 1 }
 0x742   :  { %3468 = vsyncpa [#allocation4 + $0x1], 1 }
 0x743   :  { %3469 = vsyncpa [#allocation6], 1 }
 0x744   :  { %3470 = vsyncpa [#allocation9], 1 }

</bundles_post_ra>
